<compile_context>
chip_gen: v7x
topology: tpu7x:2x2x1
jax: 0.10.0
libtpu: 0.0.40
codegen_flags: <defaults>
</compile_context>

<pallas_src>
import math

import jax
import jax.numpy as jnp
from jax.experimental import pallas as pl
from jax.experimental.pallas import tpu as pltpu

D_PE = 16
D_HIDDEN = 32


# ----------------------------------------------------------------------------
# Plain-JAX helpers (parameter setup / positional encoding = glue)
# ----------------------------------------------------------------------------
def positional_encoding_1d(d_model, length):
    if d_model % 2 != 0:
        raise ValueError("d_model must be even")
    position = jnp.arange(length, dtype=jnp.float32)[:, None]            # (L, 1)
    div_term = jnp.exp(
        jnp.arange(0, d_model, 2, dtype=jnp.float32) * -(math.log(10000.0) / d_model)
    )                                                                     # (d_model/2,)
    pe = jnp.zeros((length, d_model), jnp.float32)
    pe = pe.at[:, 0::2].set(jnp.sin(position * div_term))
    pe = pe.at[:, 1::2].set(jnp.cos(position * div_term))
    return pe


def init_params(key, d_pe, d_hidden):
    """Deterministic synthetic parameters, PyTorch-style uniform init.

    GRU gate order is (r, z, n), matching torch.nn.GRU weight layout.
    Weights are stored pre-transposed for the kernel:
      w_ih: (d_pe, 3H)   w_hh: (H, 3H)   biases: (1, 3H)   linear: (1, H)
    """
    stdv = 1.0 / math.sqrt(d_hidden)
    ks = jax.random.split(key, 9)

    def u(k, shape):
        return jax.random.uniform(k, shape, jnp.float32, -stdv, stdv)

    params = dict(
        wih_f=u(ks[0], (3 * d_hidden, d_pe)).T,
        whh_f=u(ks[1], (3 * d_hidden, d_hidden)).T,
        bih_f=u(ks[2], (1, 3 * d_hidden)),
        bhh_f=u(ks[3], (1, 3 * d_hidden)),
        wih_b=u(ks[4], (3 * d_hidden, d_pe)).T,
        whh_b=u(ks[5], (3 * d_hidden, d_hidden)).T,
        bih_b=u(ks[6], (1, 3 * d_hidden)),
        bhh_b=u(ks[7], (1, 3 * d_hidden)),
        wlin=u(ks[8], (1, d_hidden)),     # nn.Linear(d_hidden, 1, bias=False)
    )
    return params


# ----------------------------------------------------------------------------
# Fused kernel: bi-GRU over positional encodings + linear score
#               + masked softmax(scores / 0.1) + weighted pooling.
# ----------------------------------------------------------------------------
def gpo_kernel(
    pe_ref,         # (L, P)      positional encodings (batch-independent)
    mask_ref,       # (L, B, 1)   1.0 where t < length, else 0.0
    sf_ref,         # (L, B, D)   sorted features, time-major
    wih_f_ref, whh_f_ref, bih_f_ref, bhh_f_ref,   # forward-direction GRU params
    wih_b_ref, whh_b_ref, bih_b_ref, bhh_b_ref,   # backward-direction GRU params
    wlin_ref,       # (1, H)      linear scoring weight
    pooled_ref,     # (B, D)      output: pooled features
    weights_ref,    # (L, B, 1)   output: softmax pooling weights (time-major)
    scf_ref,        # (L, B, 1)   scratch: per-step forward scores
    scb_ref,        # (L, B, 1)   scratch: per-step backward scores
):
    L = pe_ref.shape[0]
    B = mask_ref.shape[1]
    H = whh_f_ref.shape[0]

    # Hoisted input projections: one MXU matmul per direction over all steps.
    # (Padded timesteps are gated out of the recurrence, so the per-batch
    #  masking of pes in the reference is unnecessary for the hidden states.)
    pe = pe_ref[...]                                                    # (L, P)
    gif = jnp.dot(pe, wih_f_ref[...], preferred_element_type=jnp.float32) + bih_f_ref[...]  # (L, 3H)
    gib = jnp.dot(pe, wih_b_ref[...], preferred_element_type=jnp.float32) + bih_b_ref[...]  # (L, 3H)

    whh_f = whh_f_ref[...]
    bhh_f = bhh_f_ref[...]
    whh_b = whh_b_ref[...]
    bhh_b = bhh_b_ref[...]
    wlin = wlin_ref[...]                                                # (1, H)
    mask = mask_ref[...]                                                # (L, B, 1)

    def gru_step(gi_row, h, whh, bhh):
        # gi_row: (1, 3H) precomputed input projection (incl. b_ih); h: (B, H)
        gh = jnp.dot(h, whh, preferred_element_type=jnp.float32) + bhh  # (B, 3H)
        r = jax.nn.sigmoid(gi_row[:, 0:H] + gh[:, 0:H])
        z = jax.nn.sigmoid(gi_row[:, H:2 * H] + gh[:, H:2 * H])
        n = jnp.tanh(gi_row[:, 2 * H:3 * H] + r * gh[:, 2 * H:3 * H])
        return (1.0 - z) * n + z * h

    hf = jnp.zeros((B, H), jnp.float32)
    hb = jnp.zeros((B, H), jnp.float32)

    # Fused, fully-unrolled recurrence: forward step at t = i, backward step at
    # t = L-1-i.  The two chains are independent, so the scheduler can overlap
    # one direction's MXU/EUP latency under the other's.
    # (On v7x the two directions could run on separate TensorCores; not done
    #  here to keep a single-core kernel that is also optimal on v5e/v6e.)
    for i in range(L):
        tf = i
        tb = L - 1 - i

        hf_new = gru_step(gif[tf:tf + 1, :], hf, whh_f, bhh_f)
        hf = jnp.where(mask[tf] > 0.0, hf_new, hf)          # packed-seq gate
        scf_ref[tf] = jnp.sum(hf * wlin, axis=1, keepdims=True)   # (B, 1)

        hb_new = gru_step(gib[tb:tb + 1, :], hb, whh_b, bhh_b)
        hb = jnp.where(mask[tb] > 0.0, hb_new, hb)          # packed-seq gate
        scb_ref[tb] = jnp.sum(hb * wlin, axis=1, keepdims=True)   # (B, 1)

    # score_t = wlin . (h_fwd_t + h_bwd_t) / 2 ; mask-fill -10000 ; softmax(/0.1).
    scores = (scf_ref[...] + scb_ref[...]) * 0.5                        # (L, B, 1)
    scores = jnp.where(mask > 0.0, scores, -10000.0)
    s = scores * 10.0                                                   # == scores / 0.1
    s_max = jnp.max(s, axis=0, keepdims=True)                           # (1, B, 1)
    e = jnp.exp(s - s_max)
    denom = jnp.sum(e, axis=0, keepdims=True)                           # (1, B, 1)
    w = e * pl.reciprocal(denom, approx=True)                           # (L, B, 1)
    weights_ref[...] = w

    # masked_fill(mask==0, 0) on sorted features is reproduced by multiplying
    # the pooling weights with the 0/1 mask before the weighted sum.
    pooled_ref[...] = jnp.sum(sf_ref[...] * (w * mask), axis=0)         # (B, D)


# ----------------------------------------------------------------------------
# Wrapper (fully jittable: static padded length L = K, no host sync)
# ----------------------------------------------------------------------------
def gpo_forward(features, lengths, params):
    """features: (B, K, D) float32;  lengths: (B,) int32 (all >= 1).

    Returns (pooled_features (B, D), pool_weights (B, K, 1)).
    The reference truncates to max(lengths); here we keep the static length K
    and rely on the mask — padded positions get ~0 weight and 0 contribution,
    so pooled features match (and shapes match whenever max(lengths) == K).
    """
    B, K, D = features.shape
    L = K
    H = D_HIDDEN

    pe = positional_encoding_1d(D_PE, L)                                # (L, P)
    mask_bl = (jnp.arange(L)[None, :] < lengths[:, None]).astype(jnp.float32)  # (B, L)
    mask_lb1 = jnp.transpose(mask_bl)[:, :, None]                       # (L, B, 1)

    # Feature side: mask-fill -10000, per-channel descending sort.
    # TODO(synk): the per-channel descending sort is done in plain JAX
    # (jnp.sort); a Pallas sorting network was not implemented.
    feat_m = jnp.where(mask_bl[:, :, None] > 0.0, features, -10000.0)
    sorted_f = jnp.flip(jnp.sort(feat_m, axis=1), axis=1)               # (B, L, D)
    sorted_f_t = jnp.transpose(sorted_f, (1, 0, 2))                     # (L, B, D)

    vmem = pl.BlockSpec(memory_space=pltpu.MemorySpace.VMEM)

    pooled, weights_lb1 = pl.pallas_call(
        gpo_kernel,
        out_shape=(
            jax.ShapeDtypeStruct((B, D), jnp.float32),
            jax.ShapeDtypeStruct((L, B, 1), jnp.float32),
        ),
        in_specs=[vmem] * 12,
        out_specs=(vmem, vmem),
        scratch_shapes=[
            pltpu.VMEM((L, B, 1), jnp.float32),
            pltpu.VMEM((L, B, 1), jnp.float32),
        ],
    )(
        pe, mask_lb1, sorted_f_t,
        params["wih_f"], params["whh_f"], params["bih_f"], params["bhh_f"],
        params["wih_b"], params["whh_b"], params["bih_b"], params["bhh_b"],
        params["wlin"],
    )

    pool_weights = jnp.transpose(weights_lb1, (1, 0, 2))                # (B, L, 1)
    return pooled, pool_weights


if __name__ == "__main__":
    key = jax.random.PRNGKey(0)
    k_feat, k_param = jax.random.split(key)

    B, K, D = 4, 8, 32
    features = jax.random.normal(k_feat, (B, K, D), jnp.float32)
    lengths = jnp.array([8, 5, 7, 3], jnp.int32)   # all >= 1 (softmax assumes this)

    params = init_params(k_param, D_PE, D_HIDDEN)

    fwd = jax.jit(gpo_forward)
    pooled, pool_w = fwd(features, lengths, params)
    jax.block_until_ready((pooled, pool_w))

    assert pooled.shape == (B, D)
    assert pool_w.shape == (B, K, 1)
    print("KERNEL_OK")
</pallas_src>

<mosaic_0001>
module attributes {stable_mosaic.version = 11 : i64} {
  func.func @gpo_kernel(%arg0: memref<8x16xf32, #tpu.memory_space<vmem>>, %arg1: memref<8x4x1xf32, #tpu.memory_space<vmem>>, %arg2: memref<8x4x32xf32, #tpu.memory_space<vmem>>, %arg3: memref<16x96xf32, #tpu.memory_space<vmem>>, %arg4: memref<32x96xf32, #tpu.memory_space<vmem>>, %arg5: memref<1x96xf32, #tpu.memory_space<vmem>>, %arg6: memref<1x96xf32, #tpu.memory_space<vmem>>, %arg7: memref<16x96xf32, #tpu.memory_space<vmem>>, %arg8: memref<32x96xf32, #tpu.memory_space<vmem>>, %arg9: memref<1x96xf32, #tpu.memory_space<vmem>>, %arg10: memref<1x96xf32, #tpu.memory_space<vmem>>, %arg11: memref<1x32xf32, #tpu.memory_space<vmem>>, %arg12: memref<4x32xf32, #tpu.memory_space<vmem>>, %arg13: memref<8x4x1xf32, #tpu.memory_space<vmem>>, %arg14: memref<8x4x1xf32, #tpu.memory_space<vmem>>, %arg15: memref<8x4x1xf32, #tpu.memory_space<vmem>>) attributes {dimension_semantics = [], scalar_prefetch = 0 : i64, scratch_operands = 2 : i64, tpu.core_type = #tpu.core_type<tc>} {
    %c0 = arith.constant 0 : index
    %c0_0 = arith.constant 0 : index
    %0 = vector.load %arg0[%c0, %c0_0] : memref<8x16xf32, #tpu.memory_space<vmem>>, vector<8x16xf32>
    %c0_1 = arith.constant 0 : index
    %c0_2 = arith.constant 0 : index
    %1 = vector.load %arg3[%c0_1, %c0_2] : memref<16x96xf32, #tpu.memory_space<vmem>>, vector<16x96xf32>
    %cst = arith.constant dense<0.000000e+00> : vector<8x96xf32>
    %2 = tpu.matmul %0, %1, %cst {dimension_numbers = #tpu.dot_dimension_numbers<[1], [0], [0], [1], [0, 0, 1, 1], [], []>} : vector<8x16xf32>, vector<16x96xf32>, vector<8x96xf32> -> vector<8x96xf32>
    %c0_3 = arith.constant 0 : index
    %c0_4 = arith.constant 0 : index
    %3 = vector.load %arg5[%c0_3, %c0_4] : memref<1x96xf32, #tpu.memory_space<vmem>>, vector<1x96xf32>
    %4 = vector.broadcast %3 : vector<1x96xf32> to vector<8x96xf32>
    %5 = arith.addf %2, %4 : vector<8x96xf32>
    %c0_5 = arith.constant 0 : index
    %c0_6 = arith.constant 0 : index
    %6 = vector.load %arg7[%c0_5, %c0_6] : memref<16x96xf32, #tpu.memory_space<vmem>>, vector<16x96xf32>
    %cst_7 = arith.constant dense<0.000000e+00> : vector<8x96xf32>
    %7 = tpu.matmul %0, %6, %cst_7 {dimension_numbers = #tpu.dot_dimension_numbers<[1], [0], [0], [1], [0, 0, 1, 1], [], []>} : vector<8x16xf32>, vector<16x96xf32>, vector<8x96xf32> -> vector<8x96xf32>
    %c0_8 = arith.constant 0 : index
    %c0_9 = arith.constant 0 : index
    %8 = vector.load %arg9[%c0_8, %c0_9] : memref<1x96xf32, #tpu.memory_space<vmem>>, vector<1x96xf32>
    %9 = vector.broadcast %8 : vector<1x96xf32> to vector<8x96xf32>
    %10 = arith.addf %7, %9 : vector<8x96xf32>
    %c0_10 = arith.constant 0 : index
    %c0_11 = arith.constant 0 : index
    %11 = vector.load %arg4[%c0_10, %c0_11] : memref<32x96xf32, #tpu.memory_space<vmem>>, vector<32x96xf32>
    %c0_12 = arith.constant 0 : index
    %c0_13 = arith.constant 0 : index
    %12 = vector.load %arg6[%c0_12, %c0_13] : memref<1x96xf32, #tpu.memory_space<vmem>>, vector<1x96xf32>
    %c0_14 = arith.constant 0 : index
    %c0_15 = arith.constant 0 : index
    %13 = vector.load %arg8[%c0_14, %c0_15] : memref<32x96xf32, #tpu.memory_space<vmem>>, vector<32x96xf32>
    %c0_16 = arith.constant 0 : index
    %c0_17 = arith.constant 0 : index
    %14 = vector.load %arg10[%c0_16, %c0_17] : memref<1x96xf32, #tpu.memory_space<vmem>>, vector<1x96xf32>
    %c0_18 = arith.constant 0 : index
    %c0_19 = arith.constant 0 : index
    %15 = vector.load %arg11[%c0_18, %c0_19] : memref<1x32xf32, #tpu.memory_space<vmem>>, vector<1x32xf32>
    %c0_20 = arith.constant 0 : index
    %c0_21 = arith.constant 0 : index
    %c0_22 = arith.constant 0 : index
    %16 = vector.load %arg1[%c0_20, %c0_21, %c0_22] : memref<8x4x1xf32, #tpu.memory_space<vmem>>, vector<8x4x1xf32>
    %cst_23 = arith.constant 0.000000e+00 : f32
    %17 = vector.broadcast %cst_23 : f32 to vector<4x32xf32>
    %cst_24 = arith.constant 0.000000e+00 : f32
    %18 = vector.broadcast %cst_24 : f32 to vector<4x32xf32>
    %19 = vector.extract_strided_slice %5 {offsets = [0, 0], sizes = [1, 96], strides = [1, 1]} : vector<8x96xf32> to vector<1x96xf32>
    %cst_25 = arith.constant dense<0.000000e+00> : vector<4x96xf32>
    %20 = tpu.matmul %17, %11, %cst_25 {dimension_numbers = #tpu.dot_dimension_numbers<[1], [0], [0], [1], [0, 0, 1, 1], [], []>} : vector<4x32xf32>, vector<32x96xf32>, vector<4x96xf32> -> vector<4x96xf32>
    %21 = vector.broadcast %12 : vector<1x96xf32> to vector<4x96xf32>
    %22 = arith.addf %20, %21 : vector<4x96xf32>
    %23 = vector.extract_strided_slice %19 {offsets = [0, 0], sizes = [1, 32], strides = [1, 1]} : vector<1x96xf32> to vector<1x32xf32>
    %24 = vector.extract_strided_slice %22 {offsets = [0, 0], sizes = [4, 32], strides = [1, 1]} : vector<4x96xf32> to vector<4x32xf32>
    %25 = vector.broadcast %23 : vector<1x32xf32> to vector<4x32xf32>
    %26 = arith.addf %25, %24 : vector<4x32xf32>
    %27 = arith.negf %26 : vector<4x32xf32>
    %28 = math.exp %27 : vector<4x32xf32>
    %cst_26 = arith.constant 1.000000e+00 : f32
    %29 = vector.broadcast %cst_26 : f32 to vector<4x32xf32>
    %30 = arith.addf %29, %28 : vector<4x32xf32>
    %31 = arith.divf %29, %30 : vector<4x32xf32>
    %32 = vector.extract_strided_slice %19 {offsets = [0, 32], sizes = [1, 32], strides = [1, 1]} : vector<1x96xf32> to vector<1x32xf32>
    %33 = vector.extract_strided_slice %22 {offsets = [0, 32], sizes = [4, 32], strides = [1, 1]} : vector<4x96xf32> to vector<4x32xf32>
    %34 = vector.broadcast %32 : vector<1x32xf32> to vector<4x32xf32>
    %35 = arith.addf %34, %33 : vector<4x32xf32>
    %36 = arith.negf %35 : vector<4x32xf32>
    %37 = math.exp %36 : vector<4x32xf32>
    %cst_27 = arith.constant 1.000000e+00 : f32
    %38 = vector.broadcast %cst_27 : f32 to vector<4x32xf32>
    %39 = arith.addf %38, %37 : vector<4x32xf32>
    %40 = arith.divf %38, %39 : vector<4x32xf32>
    %41 = vector.extract_strided_slice %19 {offsets = [0, 64], sizes = [1, 32], strides = [1, 1]} : vector<1x96xf32> to vector<1x32xf32>
    %42 = vector.extract_strided_slice %22 {offsets = [0, 64], sizes = [4, 32], strides = [1, 1]} : vector<4x96xf32> to vector<4x32xf32>
    %43 = arith.mulf %31, %42 : vector<4x32xf32>
    %44 = vector.broadcast %41 : vector<1x32xf32> to vector<4x32xf32>
    %45 = arith.addf %44, %43 : vector<4x32xf32>
    %46 = math.tanh %45 : vector<4x32xf32>
    %cst_28 = arith.constant 1.000000e+00 : f32
    %47 = vector.broadcast %cst_28 : f32 to vector<4x32xf32>
    %48 = arith.subf %47, %40 : vector<4x32xf32>
    %49 = arith.mulf %48, %46 : vector<4x32xf32>
    %50 = arith.mulf %40, %17 : vector<4x32xf32>
    %51 = arith.addf %49, %50 : vector<4x32xf32>
    %52 = vector.extract_strided_slice %16 {offsets = [0, 0, 0], sizes = [1, 4, 1], strides = [1, 1, 1]} : vector<8x4x1xf32> to vector<1x4x1xf32>
    %53 = vector.shape_cast %52 : vector<1x4x1xf32> to vector<4x1xf32>
    %cst_29 = arith.constant 0.000000e+00 : f32
    %54 = vector.broadcast %cst_29 : f32 to vector<4x1xf32>
    %55 = arith.cmpf ogt, %53, %54 : vector<4x1xf32>
    %56 = vector.shape_cast %55 : vector<4x1xi1> to vector<4x1xi1>
    %57 = vector.broadcast %56 : vector<4x1xi1> to vector<4x32xi1>
    %58 = arith.select %57, %51, %17 : vector<4x32xi1>, vector<4x32xf32>
    %59 = vector.broadcast %15 : vector<1x32xf32> to vector<4x32xf32>
    %60 = arith.mulf %58, %59 : vector<4x32xf32>
    %cst_30 = arith.constant dense<0.000000e+00> : vector<4xf32>
    %61 = vector.multi_reduction <add>, %60, %cst_30 [1] : vector<4x32xf32> to vector<4xf32>
    %62 = vector.shape_cast %61 : vector<4xf32> to vector<4x1xf32>
    %c0_31 = arith.constant 0 : index
    %c0_32 = arith.constant 0 : index
    %c0_33 = arith.constant 0 : index
    %63 = vector.load %arg14[%c0_31, %c0_32, %c0_33] : memref<8x4x1xf32, #tpu.memory_space<vmem>>, vector<1x4x1xf32>
    %64 = vector.shape_cast %63 : vector<1x4x1xf32> to vector<4x1xf32>
    %65 = vector.shape_cast %62 : vector<4x1xf32> to vector<1x4x1xf32>
    tpu.vector_store %arg14[%c0_31, %c0_32, %c0_33], %65 {strides = array<i32>} : memref<8x4x1xf32, #tpu.memory_space<vmem>>, vector<1x4x1xf32>,
    %66 = vector.extract_strided_slice %10 {offsets = [7, 0], sizes = [1, 96], strides = [1, 1]} : vector<8x96xf32> to vector<1x96xf32>
    %cst_34 = arith.constant dense<0.000000e+00> : vector<4x96xf32>
    %67 = tpu.matmul %18, %13, %cst_34 {dimension_numbers = #tpu.dot_dimension_numbers<[1], [0], [0], [1], [0, 0, 1, 1], [], []>} : vector<4x32xf32>, vector<32x96xf32>, vector<4x96xf32> -> vector<4x96xf32>
    %68 = vector.broadcast %14 : vector<1x96xf32> to vector<4x96xf32>
    %69 = arith.addf %67, %68 : vector<4x96xf32>
    %70 = vector.extract_strided_slice %66 {offsets = [0, 0], sizes = [1, 32], strides = [1, 1]} : vector<1x96xf32> to vector<1x32xf32>
    %71 = vector.extract_strided_slice %69 {offsets = [0, 0], sizes = [4, 32], strides = [1, 1]} : vector<4x96xf32> to vector<4x32xf32>
    %72 = vector.broadcast %70 : vector<1x32xf32> to vector<4x32xf32>
    %73 = arith.addf %72, %71 : vector<4x32xf32>
    %74 = arith.negf %73 : vector<4x32xf32>
    %75 = math.exp %74 : vector<4x32xf32>
    %cst_35 = arith.constant 1.000000e+00 : f32
    %76 = vector.broadcast %cst_35 : f32 to vector<4x32xf32>
    %77 = arith.addf %76, %75 : vector<4x32xf32>
    %78 = arith.divf %76, %77 : vector<4x32xf32>
    %79 = vector.extract_strided_slice %66 {offsets = [0, 32], sizes = [1, 32], strides = [1, 1]} : vector<1x96xf32> to vector<1x32xf32>
    %80 = vector.extract_strided_slice %69 {offsets = [0, 32], sizes = [4, 32], strides = [1, 1]} : vector<4x96xf32> to vector<4x32xf32>
    %81 = vector.broadcast %79 : vector<1x32xf32> to vector<4x32xf32>
    %82 = arith.addf %81, %80 : vector<4x32xf32>
    %83 = arith.negf %82 : vector<4x32xf32>
    %84 = math.exp %83 : vector<4x32xf32>
    %cst_36 = arith.constant 1.000000e+00 : f32
    %85 = vector.broadcast %cst_36 : f32 to vector<4x32xf32>
    %86 = arith.addf %85, %84 : vector<4x32xf32>
    %87 = arith.divf %85, %86 : vector<4x32xf32>
    %88 = vector.extract_strided_slice %66 {offsets = [0, 64], sizes = [1, 32], strides = [1, 1]} : vector<1x96xf32> to vector<1x32xf32>
    %89 = vector.extract_strided_slice %69 {offsets = [0, 64], sizes = [4, 32], strides = [1, 1]} : vector<4x96xf32> to vector<4x32xf32>
    %90 = arith.mulf %78, %89 : vector<4x32xf32>
    %91 = vector.broadcast %88 : vector<1x32xf32> to vector<4x32xf32>
    %92 = arith.addf %91, %90 : vector<4x32xf32>
    %93 = math.tanh %92 : vector<4x32xf32>
    %cst_37 = arith.constant 1.000000e+00 : f32
    %94 = vector.broadcast %cst_37 : f32 to vector<4x32xf32>
    %95 = arith.subf %94, %87 : vector<4x32xf32>
    %96 = arith.mulf %95, %93 : vector<4x32xf32>
    %97 = arith.mulf %87, %18 : vector<4x32xf32>
    %98 = arith.addf %96, %97 : vector<4x32xf32>
    %99 = vector.extract_strided_slice %16 {offsets = [7, 0, 0], sizes = [1, 4, 1], strides = [1, 1, 1]} : vector<8x4x1xf32> to vector<1x4x1xf32>
    %100 = vector.shape_cast %99 : vector<1x4x1xf32> to vector<4x1xf32>
    %cst_38 = arith.constant 0.000000e+00 : f32
    %101 = vector.broadcast %cst_38 : f32 to vector<4x1xf32>
    %102 = arith.cmpf ogt, %100, %101 : vector<4x1xf32>
    %103 = vector.shape_cast %102 : vector<4x1xi1> to vector<4x1xi1>
    %104 = vector.broadcast %103 : vector<4x1xi1> to vector<4x32xi1>
    %105 = arith.select %104, %98, %18 : vector<4x32xi1>, vector<4x32xf32>
    %106 = vector.broadcast %15 : vector<1x32xf32> to vector<4x32xf32>
    %107 = arith.mulf %105, %106 : vector<4x32xf32>
    %cst_39 = arith.constant dense<0.000000e+00> : vector<4xf32>
    %108 = vector.multi_reduction <add>, %107, %cst_39 [1] : vector<4x32xf32> to vector<4xf32>
    %109 = vector.shape_cast %108 : vector<4xf32> to vector<4x1xf32>
    %c7 = arith.constant 7 : index
    %c0_40 = arith.constant 0 : index
    %c0_41 = arith.constant 0 : index
    %110 = vector.load %arg15[%c7, %c0_40, %c0_41] : memref<8x4x1xf32, #tpu.memory_space<vmem>>, vector<1x4x1xf32>
    %111 = vector.shape_cast %110 : vector<1x4x1xf32> to vector<4x1xf32>
    %112 = vector.shape_cast %109 : vector<4x1xf32> to vector<1x4x1xf32>
    tpu.vector_store %arg15[%c7, %c0_40, %c0_41], %112 {strides = array<i32>} : memref<8x4x1xf32, #tpu.memory_space<vmem>>, vector<1x4x1xf32>,
    %113 = vector.extract_strided_slice %5 {offsets = [1, 0], sizes = [1, 96], strides = [1, 1]} : vector<8x96xf32> to vector<1x96xf32>
    %cst_42 = arith.constant dense<0.000000e+00> : vector<4x96xf32>
    %114 = tpu.matmul %58, %11, %cst_42 {dimension_numbers = #tpu.dot_dimension_numbers<[1], [0], [0], [1], [0, 0, 1, 1], [], []>} : vector<4x32xf32>, vector<32x96xf32>, vector<4x96xf32> -> vector<4x96xf32>
    %115 = vector.broadcast %12 : vector<1x96xf32> to vector<4x96xf32>
    %116 = arith.addf %114, %115 : vector<4x96xf32>
    %117 = vector.extract_strided_slice %113 {offsets = [0, 0], sizes = [1, 32], strides = [1, 1]} : vector<1x96xf32> to vector<1x32xf32>
    %118 = vector.extract_strided_slice %116 {offsets = [0, 0], sizes = [4, 32], strides = [1, 1]} : vector<4x96xf32> to vector<4x32xf32>
    %119 = vector.broadcast %117 : vector<1x32xf32> to vector<4x32xf32>
    %120 = arith.addf %119, %118 : vector<4x32xf32>
    %121 = arith.negf %120 : vector<4x32xf32>
    %122 = math.exp %121 : vector<4x32xf32>
    %cst_43 = arith.constant 1.000000e+00 : f32
    %123 = vector.broadcast %cst_43 : f32 to vector<4x32xf32>
    %124 = arith.addf %123, %122 : vector<4x32xf32>
    %125 = arith.divf %123, %124 : vector<4x32xf32>
    %126 = vector.extract_strided_slice %113 {offsets = [0, 32], sizes = [1, 32], strides = [1, 1]} : vector<1x96xf32> to vector<1x32xf32>
    %127 = vector.extract_strided_slice %116 {offsets = [0, 32], sizes = [4, 32], strides = [1, 1]} : vector<4x96xf32> to vector<4x32xf32>
    %128 = vector.broadcast %126 : vector<1x32xf32> to vector<4x32xf32>
    %129 = arith.addf %128, %127 : vector<4x32xf32>
    %130 = arith.negf %129 : vector<4x32xf32>
    %131 = math.exp %130 : vector<4x32xf32>
    %cst_44 = arith.constant 1.000000e+00 : f32
    %132 = vector.broadcast %cst_44 : f32 to vector<4x32xf32>
    %133 = arith.addf %132, %131 : vector<4x32xf32>
    %134 = arith.divf %132, %133 : vector<4x32xf32>
    %135 = vector.extract_strided_slice %113 {offsets = [0, 64], sizes = [1, 32], strides = [1, 1]} : vector<1x96xf32> to vector<1x32xf32>
    %136 = vector.extract_strided_slice %116 {offsets = [0, 64], sizes = [4, 32], strides = [1, 1]} : vector<4x96xf32> to vector<4x32xf32>
    %137 = arith.mulf %125, %136 : vector<4x32xf32>
    %138 = vector.broadcast %135 : vector<1x32xf32> to vector<4x32xf32>
    %139 = arith.addf %138, %137 : vector<4x32xf32>
    %140 = math.tanh %139 : vector<4x32xf32>
    %cst_45 = arith.constant 1.000000e+00 : f32
    %141 = vector.broadcast %cst_45 : f32 to vector<4x32xf32>
    %142 = arith.subf %141, %134 : vector<4x32xf32>
    %143 = arith.mulf %142, %140 : vector<4x32xf32>
    %144 = arith.mulf %134, %58 : vector<4x32xf32>
    %145 = arith.addf %143, %144 : vector<4x32xf32>
    %146 = vector.extract_strided_slice %16 {offsets = [1, 0, 0], sizes = [1, 4, 1], strides = [1, 1, 1]} : vector<8x4x1xf32> to vector<1x4x1xf32>
    %147 = vector.shape_cast %146 : vector<1x4x1xf32> to vector<4x1xf32>
    %cst_46 = arith.constant 0.000000e+00 : f32
    %148 = vector.broadcast %cst_46 : f32 to vector<4x1xf32>
    %149 = arith.cmpf ogt, %147, %148 : vector<4x1xf32>
    %150 = vector.shape_cast %149 : vector<4x1xi1> to vector<4x1xi1>
    %151 = vector.broadcast %150 : vector<4x1xi1> to vector<4x32xi1>
    %152 = arith.select %151, %145, %58 : vector<4x32xi1>, vector<4x32xf32>
    %153 = vector.broadcast %15 : vector<1x32xf32> to vector<4x32xf32>
    %154 = arith.mulf %152, %153 : vector<4x32xf32>
    %cst_47 = arith.constant dense<0.000000e+00> : vector<4xf32>
    %155 = vector.multi_reduction <add>, %154, %cst_47 [1] : vector<4x32xf32> to vector<4xf32>
    %156 = vector.shape_cast %155 : vector<4xf32> to vector<4x1xf32>
    %c1 = arith.constant 1 : index
    %c0_48 = arith.constant 0 : index
    %c0_49 = arith.constant 0 : index
    %157 = vector.load %arg14[%c1, %c0_48, %c0_49] : memref<8x4x1xf32, #tpu.memory_space<vmem>>, vector<1x4x1xf32>
    %158 = vector.shape_cast %157 : vector<1x4x1xf32> to vector<4x1xf32>
    %159 = vector.shape_cast %156 : vector<4x1xf32> to vector<1x4x1xf32>
    tpu.vector_store %arg14[%c1, %c0_48, %c0_49], %159 {strides = array<i32>} : memref<8x4x1xf32, #tpu.memory_space<vmem>>, vector<1x4x1xf32>,
    %160 = vector.extract_strided_slice %10 {offsets = [6, 0], sizes = [1, 96], strides = [1, 1]} : vector<8x96xf32> to vector<1x96xf32>
    %cst_50 = arith.constant dense<0.000000e+00> : vector<4x96xf32>
    %161 = tpu.matmul %105, %13, %cst_50 {dimension_numbers = #tpu.dot_dimension_numbers<[1], [0], [0], [1], [0, 0, 1, 1], [], []>} : vector<4x32xf32>, vector<32x96xf32>, vector<4x96xf32> -> vector<4x96xf32>
    %162 = vector.broadcast %14 : vector<1x96xf32> to vector<4x96xf32>
    %163 = arith.addf %161, %162 : vector<4x96xf32>
    %164 = vector.extract_strided_slice %160 {offsets = [0, 0], sizes = [1, 32], strides = [1, 1]} : vector<1x96xf32> to vector<1x32xf32>
    %165 = vector.extract_strided_slice %163 {offsets = [0, 0], sizes = [4, 32], strides = [1, 1]} : vector<4x96xf32> to vector<4x32xf32>
    %166 = vector.broadcast %164 : vector<1x32xf32> to vector<4x32xf32>
    %167 = arith.addf %166, %165 : vector<4x32xf32>
    %168 = arith.negf %167 : vector<4x32xf32>
    %169 = math.exp %168 : vector<4x32xf32>
    %cst_51 = arith.constant 1.000000e+00 : f32
    %170 = vector.broadcast %cst_51 : f32 to vector<4x32xf32>
    %171 = arith.addf %170, %169 : vector<4x32xf32>
    %172 = arith.divf %170, %171 : vector<4x32xf32>
    %173 = vector.extract_strided_slice %160 {offsets = [0, 32], sizes = [1, 32], strides = [1, 1]} : vector<1x96xf32> to vector<1x32xf32>
    %174 = vector.extract_strided_slice %163 {offsets = [0, 32], sizes = [4, 32], strides = [1, 1]} : vector<4x96xf32> to vector<4x32xf32>
    %175 = vector.broadcast %173 : vector<1x32xf32> to vector<4x32xf32>
    %176 = arith.addf %175, %174 : vector<4x32xf32>
    %177 = arith.negf %176 : vector<4x32xf32>
    %178 = math.exp %177 : vector<4x32xf32>
    %cst_52 = arith.constant 1.000000e+00 : f32
    %179 = vector.broadcast %cst_52 : f32 to vector<4x32xf32>
    %180 = arith.addf %179, %178 : vector<4x32xf32>
    %181 = arith.divf %179, %180 : vector<4x32xf32>
    %182 = vector.extract_strided_slice %160 {offsets = [0, 64], sizes = [1, 32], strides = [1, 1]} : vector<1x96xf32> to vector<1x32xf32>
    %183 = vector.extract_strided_slice %163 {offsets = [0, 64], sizes = [4, 32], strides = [1, 1]} : vector<4x96xf32> to vector<4x32xf32>
    %184 = arith.mulf %172, %183 : vector<4x32xf32>
    %185 = vector.broadcast %182 : vector<1x32xf32> to vector<4x32xf32>
    %186 = arith.addf %185, %184 : vector<4x32xf32>
    %187 = math.tanh %186 : vector<4x32xf32>
    %cst_53 = arith.constant 1.000000e+00 : f32
    %188 = vector.broadcast %cst_53 : f32 to vector<4x32xf32>
    %189 = arith.subf %188, %181 : vector<4x32xf32>
    %190 = arith.mulf %189, %187 : vector<4x32xf32>
    %191 = arith.mulf %181, %105 : vector<4x32xf32>
    %192 = arith.addf %190, %191 : vector<4x32xf32>
    %193 = vector.extract_strided_slice %16 {offsets = [6, 0, 0], sizes = [1, 4, 1], strides = [1, 1, 1]} : vector<8x4x1xf32> to vector<1x4x1xf32>
    %194 = vector.shape_cast %193 : vector<1x4x1xf32> to vector<4x1xf32>
    %cst_54 = arith.constant 0.000000e+00 : f32
    %195 = vector.broadcast %cst_54 : f32 to vector<4x1xf32>
    %196 = arith.cmpf ogt, %194, %195 : vector<4x1xf32>
    %197 = vector.shape_cast %196 : vector<4x1xi1> to vector<4x1xi1>
    %198 = vector.broadcast %197 : vector<4x1xi1> to vector<4x32xi1>
    %199 = arith.select %198, %192, %105 : vector<4x32xi1>, vector<4x32xf32>
    %200 = vector.broadcast %15 : vector<1x32xf32> to vector<4x32xf32>
    %201 = arith.mulf %199, %200 : vector<4x32xf32>
    %cst_55 = arith.constant dense<0.000000e+00> : vector<4xf32>
    %202 = vector.multi_reduction <add>, %201, %cst_55 [1] : vector<4x32xf32> to vector<4xf32>
    %203 = vector.shape_cast %202 : vector<4xf32> to vector<4x1xf32>
    %c6 = arith.constant 6 : index
    %c0_56 = arith.constant 0 : index
    %c0_57 = arith.constant 0 : index
    %204 = vector.load %arg15[%c6, %c0_56, %c0_57] : memref<8x4x1xf32, #tpu.memory_space<vmem>>, vector<1x4x1xf32>
    %205 = vector.shape_cast %204 : vector<1x4x1xf32> to vector<4x1xf32>
    %206 = vector.shape_cast %203 : vector<4x1xf32> to vector<1x4x1xf32>
    tpu.vector_store %arg15[%c6, %c0_56, %c0_57], %206 {strides = array<i32>} : memref<8x4x1xf32, #tpu.memory_space<vmem>>, vector<1x4x1xf32>,
    %207 = vector.extract_strided_slice %5 {offsets = [2, 0], sizes = [1, 96], strides = [1, 1]} : vector<8x96xf32> to vector<1x96xf32>
    %cst_58 = arith.constant dense<0.000000e+00> : vector<4x96xf32>
    %208 = tpu.matmul %152, %11, %cst_58 {dimension_numbers = #tpu.dot_dimension_numbers<[1], [0], [0], [1], [0, 0, 1, 1], [], []>} : vector<4x32xf32>, vector<32x96xf32>, vector<4x96xf32> -> vector<4x96xf32>
    %209 = vector.broadcast %12 : vector<1x96xf32> to vector<4x96xf32>
    %210 = arith.addf %208, %209 : vector<4x96xf32>
    %211 = vector.extract_strided_slice %207 {offsets = [0, 0], sizes = [1, 32], strides = [1, 1]} : vector<1x96xf32> to vector<1x32xf32>
    %212 = vector.extract_strided_slice %210 {offsets = [0, 0], sizes = [4, 32], strides = [1, 1]} : vector<4x96xf32> to vector<4x32xf32>
    %213 = vector.broadcast %211 : vector<1x32xf32> to vector<4x32xf32>
    %214 = arith.addf %213, %212 : vector<4x32xf32>
    %215 = arith.negf %214 : vector<4x32xf32>
    %216 = math.exp %215 : vector<4x32xf32>
    %cst_59 = arith.constant 1.000000e+00 : f32
    %217 = vector.broadcast %cst_59 : f32 to vector<4x32xf32>
    %218 = arith.addf %217, %216 : vector<4x32xf32>
    %219 = arith.divf %217, %218 : vector<4x32xf32>
    %220 = vector.extract_strided_slice %207 {offsets = [0, 32], sizes = [1, 32], strides = [1, 1]} : vector<1x96xf32> to vector<1x32xf32>
    %221 = vector.extract_strided_slice %210 {offsets = [0, 32], sizes = [4, 32], strides = [1, 1]} : vector<4x96xf32> to vector<4x32xf32>
    %222 = vector.broadcast %220 : vector<1x32xf32> to vector<4x32xf32>
    %223 = arith.addf %222, %221 : vector<4x32xf32>
    %224 = arith.negf %223 : vector<4x32xf32>
    %225 = math.exp %224 : vector<4x32xf32>
    %cst_60 = arith.constant 1.000000e+00 : f32
    %226 = vector.broadcast %cst_60 : f32 to vector<4x32xf32>
    %227 = arith.addf %226, %225 : vector<4x32xf32>
    %228 = arith.divf %226, %227 : vector<4x32xf32>
    %229 = vector.extract_strided_slice %207 {offsets = [0, 64], sizes = [1, 32], strides = [1, 1]} : vector<1x96xf32> to vector<1x32xf32>
    %230 = vector.extract_strided_slice %210 {offsets = [0, 64], sizes = [4, 32], strides = [1, 1]} : vector<4x96xf32> to vector<4x32xf32>
    %231 = arith.mulf %219, %230 : vector<4x32xf32>
    %232 = vector.broadcast %229 : vector<1x32xf32> to vector<4x32xf32>
    %233 = arith.addf %232, %231 : vector<4x32xf32>
    %234 = math.tanh %233 : vector<4x32xf32>
    %cst_61 = arith.constant 1.000000e+00 : f32
    %235 = vector.broadcast %cst_61 : f32 to vector<4x32xf32>
    %236 = arith.subf %235, %228 : vector<4x32xf32>
    %237 = arith.mulf %236, %234 : vector<4x32xf32>
    %238 = arith.mulf %228, %152 : vector<4x32xf32>
    %239 = arith.addf %237, %238 : vector<4x32xf32>
    %240 = vector.extract_strided_slice %16 {offsets = [2, 0, 0], sizes = [1, 4, 1], strides = [1, 1, 1]} : vector<8x4x1xf32> to vector<1x4x1xf32>
    %241 = vector.shape_cast %240 : vector<1x4x1xf32> to vector<4x1xf32>
    %cst_62 = arith.constant 0.000000e+00 : f32
    %242 = vector.broadcast %cst_62 : f32 to vector<4x1xf32>
    %243 = arith.cmpf ogt, %241, %242 : vector<4x1xf32>
    %244 = vector.shape_cast %243 : vector<4x1xi1> to vector<4x1xi1>
    %245 = vector.broadcast %244 : vector<4x1xi1> to vector<4x32xi1>
    %246 = arith.select %245, %239, %152 : vector<4x32xi1>, vector<4x32xf32>
    %247 = vector.broadcast %15 : vector<1x32xf32> to vector<4x32xf32>
    %248 = arith.mulf %246, %247 : vector<4x32xf32>
    %cst_63 = arith.constant dense<0.000000e+00> : vector<4xf32>
    %249 = vector.multi_reduction <add>, %248, %cst_63 [1] : vector<4x32xf32> to vector<4xf32>
    %250 = vector.shape_cast %249 : vector<4xf32> to vector<4x1xf32>
    %c2 = arith.constant 2 : index
    %c0_64 = arith.constant 0 : index
    %c0_65 = arith.constant 0 : index
    %251 = vector.load %arg14[%c2, %c0_64, %c0_65] : memref<8x4x1xf32, #tpu.memory_space<vmem>>, vector<1x4x1xf32>
    %252 = vector.shape_cast %251 : vector<1x4x1xf32> to vector<4x1xf32>
    %253 = vector.shape_cast %250 : vector<4x1xf32> to vector<1x4x1xf32>
    tpu.vector_store %arg14[%c2, %c0_64, %c0_65], %253 {strides = array<i32>} : memref<8x4x1xf32, #tpu.memory_space<vmem>>, vector<1x4x1xf32>,
    %254 = vector.extract_strided_slice %10 {offsets = [5, 0], sizes = [1, 96], strides = [1, 1]} : vector<8x96xf32> to vector<1x96xf32>
    %cst_66 = arith.constant dense<0.000000e+00> : vector<4x96xf32>
    %255 = tpu.matmul %199, %13, %cst_66 {dimension_numbers = #tpu.dot_dimension_numbers<[1], [0], [0], [1], [0, 0, 1, 1], [], []>} : vector<4x32xf32>, vector<32x96xf32>, vector<4x96xf32> -> vector<4x96xf32>
    %256 = vector.broadcast %14 : vector<1x96xf32> to vector<4x96xf32>
    %257 = arith.addf %255, %256 : vector<4x96xf32>
    %258 = vector.extract_strided_slice %254 {offsets = [0, 0], sizes = [1, 32], strides = [1, 1]} : vector<1x96xf32> to vector<1x32xf32>
    %259 = vector.extract_strided_slice %257 {offsets = [0, 0], sizes = [4, 32], strides = [1, 1]} : vector<4x96xf32> to vector<4x32xf32>
    %260 = vector.broadcast %258 : vector<1x32xf32> to vector<4x32xf32>
    %261 = arith.addf %260, %259 : vector<4x32xf32>
    %262 = arith.negf %261 : vector<4x32xf32>
    %263 = math.exp %262 : vector<4x32xf32>
    %cst_67 = arith.constant 1.000000e+00 : f32
    %264 = vector.broadcast %cst_67 : f32 to vector<4x32xf32>
    %265 = arith.addf %264, %263 : vector<4x32xf32>
    %266 = arith.divf %264, %265 : vector<4x32xf32>
    %267 = vector.extract_strided_slice %254 {offsets = [0, 32], sizes = [1, 32], strides = [1, 1]} : vector<1x96xf32> to vector<1x32xf32>
    %268 = vector.extract_strided_slice %257 {offsets = [0, 32], sizes = [4, 32], strides = [1, 1]} : vector<4x96xf32> to vector<4x32xf32>
    %269 = vector.broadcast %267 : vector<1x32xf32> to vector<4x32xf32>
    %270 = arith.addf %269, %268 : vector<4x32xf32>
    %271 = arith.negf %270 : vector<4x32xf32>
    %272 = math.exp %271 : vector<4x32xf32>
    %cst_68 = arith.constant 1.000000e+00 : f32
    %273 = vector.broadcast %cst_68 : f32 to vector<4x32xf32>
    %274 = arith.addf %273, %272 : vector<4x32xf32>
    %275 = arith.divf %273, %274 : vector<4x32xf32>
    %276 = vector.extract_strided_slice %254 {offsets = [0, 64], sizes = [1, 32], strides = [1, 1]} : vector<1x96xf32> to vector<1x32xf32>
    %277 = vector.extract_strided_slice %257 {offsets = [0, 64], sizes = [4, 32], strides = [1, 1]} : vector<4x96xf32> to vector<4x32xf32>
    %278 = arith.mulf %266, %277 : vector<4x32xf32>
    %279 = vector.broadcast %276 : vector<1x32xf32> to vector<4x32xf32>
    %280 = arith.addf %279, %278 : vector<4x32xf32>
    %281 = math.tanh %280 : vector<4x32xf32>
    %cst_69 = arith.constant 1.000000e+00 : f32
    %282 = vector.broadcast %cst_69 : f32 to vector<4x32xf32>
    %283 = arith.subf %282, %275 : vector<4x32xf32>
    %284 = arith.mulf %283, %281 : vector<4x32xf32>
    %285 = arith.mulf %275, %199 : vector<4x32xf32>
    %286 = arith.addf %284, %285 : vector<4x32xf32>
    %287 = vector.extract_strided_slice %16 {offsets = [5, 0, 0], sizes = [1, 4, 1], strides = [1, 1, 1]} : vector<8x4x1xf32> to vector<1x4x1xf32>
    %288 = vector.shape_cast %287 : vector<1x4x1xf32> to vector<4x1xf32>
    %cst_70 = arith.constant 0.000000e+00 : f32
    %289 = vector.broadcast %cst_70 : f32 to vector<4x1xf32>
    %290 = arith.cmpf ogt, %288, %289 : vector<4x1xf32>
    %291 = vector.shape_cast %290 : vector<4x1xi1> to vector<4x1xi1>
    %292 = vector.broadcast %291 : vector<4x1xi1> to vector<4x32xi1>
    %293 = arith.select %292, %286, %199 : vector<4x32xi1>, vector<4x32xf32>
    %294 = vector.broadcast %15 : vector<1x32xf32> to vector<4x32xf32>
    %295 = arith.mulf %293, %294 : vector<4x32xf32>
    %cst_71 = arith.constant dense<0.000000e+00> : vector<4xf32>
    %296 = vector.multi_reduction <add>, %295, %cst_71 [1] : vector<4x32xf32> to vector<4xf32>
    %297 = vector.shape_cast %296 : vector<4xf32> to vector<4x1xf32>
    %c5 = arith.constant 5 : index
    %c0_72 = arith.constant 0 : index
    %c0_73 = arith.constant 0 : index
    %298 = vector.load %arg15[%c5, %c0_72, %c0_73] : memref<8x4x1xf32, #tpu.memory_space<vmem>>, vector<1x4x1xf32>
    %299 = vector.shape_cast %298 : vector<1x4x1xf32> to vector<4x1xf32>
    %300 = vector.shape_cast %297 : vector<4x1xf32> to vector<1x4x1xf32>
    tpu.vector_store %arg15[%c5, %c0_72, %c0_73], %300 {strides = array<i32>} : memref<8x4x1xf32, #tpu.memory_space<vmem>>, vector<1x4x1xf32>,
    %301 = vector.extract_strided_slice %5 {offsets = [3, 0], sizes = [1, 96], strides = [1, 1]} : vector<8x96xf32> to vector<1x96xf32>
    %cst_74 = arith.constant dense<0.000000e+00> : vector<4x96xf32>
    %302 = tpu.matmul %246, %11, %cst_74 {dimension_numbers = #tpu.dot_dimension_numbers<[1], [0], [0], [1], [0, 0, 1, 1], [], []>} : vector<4x32xf32>, vector<32x96xf32>, vector<4x96xf32> -> vector<4x96xf32>
    %303 = vector.broadcast %12 : vector<1x96xf32> to vector<4x96xf32>
    %304 = arith.addf %302, %303 : vector<4x96xf32>
    %305 = vector.extract_strided_slice %301 {offsets = [0, 0], sizes = [1, 32], strides = [1, 1]} : vector<1x96xf32> to vector<1x32xf32>
    %306 = vector.extract_strided_slice %304 {offsets = [0, 0], sizes = [4, 32], strides = [1, 1]} : vector<4x96xf32> to vector<4x32xf32>
    %307 = vector.broadcast %305 : vector<1x32xf32> to vector<4x32xf32>
    %308 = arith.addf %307, %306 : vector<4x32xf32>
    %309 = arith.negf %308 : vector<4x32xf32>
    %310 = math.exp %309 : vector<4x32xf32>
    %cst_75 = arith.constant 1.000000e+00 : f32
    %311 = vector.broadcast %cst_75 : f32 to vector<4x32xf32>
    %312 = arith.addf %311, %310 : vector<4x32xf32>
    %313 = arith.divf %311, %312 : vector<4x32xf32>
    %314 = vector.extract_strided_slice %301 {offsets = [0, 32], sizes = [1, 32], strides = [1, 1]} : vector<1x96xf32> to vector<1x32xf32>
    %315 = vector.extract_strided_slice %304 {offsets = [0, 32], sizes = [4, 32], strides = [1, 1]} : vector<4x96xf32> to vector<4x32xf32>
    %316 = vector.broadcast %314 : vector<1x32xf32> to vector<4x32xf32>
    %317 = arith.addf %316, %315 : vector<4x32xf32>
    %318 = arith.negf %317 : vector<4x32xf32>
    %319 = math.exp %318 : vector<4x32xf32>
    %cst_76 = arith.constant 1.000000e+00 : f32
    %320 = vector.broadcast %cst_76 : f32 to vector<4x32xf32>
    %321 = arith.addf %320, %319 : vector<4x32xf32>
    %322 = arith.divf %320, %321 : vector<4x32xf32>
    %323 = vector.extract_strided_slice %301 {offsets = [0, 64], sizes = [1, 32], strides = [1, 1]} : vector<1x96xf32> to vector<1x32xf32>
    %324 = vector.extract_strided_slice %304 {offsets = [0, 64], sizes = [4, 32], strides = [1, 1]} : vector<4x96xf32> to vector<4x32xf32>
    %325 = arith.mulf %313, %324 : vector<4x32xf32>
    %326 = vector.broadcast %323 : vector<1x32xf32> to vector<4x32xf32>
    %327 = arith.addf %326, %325 : vector<4x32xf32>
    %328 = math.tanh %327 : vector<4x32xf32>
    %cst_77 = arith.constant 1.000000e+00 : f32
    %329 = vector.broadcast %cst_77 : f32 to vector<4x32xf32>
    %330 = arith.subf %329, %322 : vector<4x32xf32>
    %331 = arith.mulf %330, %328 : vector<4x32xf32>
    %332 = arith.mulf %322, %246 : vector<4x32xf32>
    %333 = arith.addf %331, %332 : vector<4x32xf32>
    %334 = vector.extract_strided_slice %16 {offsets = [3, 0, 0], sizes = [1, 4, 1], strides = [1, 1, 1]} : vector<8x4x1xf32> to vector<1x4x1xf32>
    %335 = vector.shape_cast %334 : vector<1x4x1xf32> to vector<4x1xf32>
    %cst_78 = arith.constant 0.000000e+00 : f32
    %336 = vector.broadcast %cst_78 : f32 to vector<4x1xf32>
    %337 = arith.cmpf ogt, %335, %336 : vector<4x1xf32>
    %338 = vector.shape_cast %337 : vector<4x1xi1> to vector<4x1xi1>
    %339 = vector.broadcast %338 : vector<4x1xi1> to vector<4x32xi1>
    %340 = arith.select %339, %333, %246 : vector<4x32xi1>, vector<4x32xf32>
    %341 = vector.broadcast %15 : vector<1x32xf32> to vector<4x32xf32>
    %342 = arith.mulf %340, %341 : vector<4x32xf32>
    %cst_79 = arith.constant dense<0.000000e+00> : vector<4xf32>
    %343 = vector.multi_reduction <add>, %342, %cst_79 [1] : vector<4x32xf32> to vector<4xf32>
    %344 = vector.shape_cast %343 : vector<4xf32> to vector<4x1xf32>
    %c3 = arith.constant 3 : index
    %c0_80 = arith.constant 0 : index
    %c0_81 = arith.constant 0 : index
    %345 = vector.load %arg14[%c3, %c0_80, %c0_81] : memref<8x4x1xf32, #tpu.memory_space<vmem>>, vector<1x4x1xf32>
    %346 = vector.shape_cast %345 : vector<1x4x1xf32> to vector<4x1xf32>
    %347 = vector.shape_cast %344 : vector<4x1xf32> to vector<1x4x1xf32>
    tpu.vector_store %arg14[%c3, %c0_80, %c0_81], %347 {strides = array<i32>} : memref<8x4x1xf32, #tpu.memory_space<vmem>>, vector<1x4x1xf32>,
    %348 = vector.extract_strided_slice %10 {offsets = [4, 0], sizes = [1, 96], strides = [1, 1]} : vector<8x96xf32> to vector<1x96xf32>
    %cst_82 = arith.constant dense<0.000000e+00> : vector<4x96xf32>
    %349 = tpu.matmul %293, %13, %cst_82 {dimension_numbers = #tpu.dot_dimension_numbers<[1], [0], [0], [1], [0, 0, 1, 1], [], []>} : vector<4x32xf32>, vector<32x96xf32>, vector<4x96xf32> -> vector<4x96xf32>
    %350 = vector.broadcast %14 : vector<1x96xf32> to vector<4x96xf32>
    %351 = arith.addf %349, %350 : vector<4x96xf32>
    %352 = vector.extract_strided_slice %348 {offsets = [0, 0], sizes = [1, 32], strides = [1, 1]} : vector<1x96xf32> to vector<1x32xf32>
    %353 = vector.extract_strided_slice %351 {offsets = [0, 0], sizes = [4, 32], strides = [1, 1]} : vector<4x96xf32> to vector<4x32xf32>
    %354 = vector.broadcast %352 : vector<1x32xf32> to vector<4x32xf32>
    %355 = arith.addf %354, %353 : vector<4x32xf32>
    %356 = arith.negf %355 : vector<4x32xf32>
    %357 = math.exp %356 : vector<4x32xf32>
    %cst_83 = arith.constant 1.000000e+00 : f32
    %358 = vector.broadcast %cst_83 : f32 to vector<4x32xf32>
    %359 = arith.addf %358, %357 : vector<4x32xf32>
    %360 = arith.divf %358, %359 : vector<4x32xf32>
    %361 = vector.extract_strided_slice %348 {offsets = [0, 32], sizes = [1, 32], strides = [1, 1]} : vector<1x96xf32> to vector<1x32xf32>
    %362 = vector.extract_strided_slice %351 {offsets = [0, 32], sizes = [4, 32], strides = [1, 1]} : vector<4x96xf32> to vector<4x32xf32>
    %363 = vector.broadcast %361 : vector<1x32xf32> to vector<4x32xf32>
    %364 = arith.addf %363, %362 : vector<4x32xf32>
    %365 = arith.negf %364 : vector<4x32xf32>
    %366 = math.exp %365 : vector<4x32xf32>
    %cst_84 = arith.constant 1.000000e+00 : f32
    %367 = vector.broadcast %cst_84 : f32 to vector<4x32xf32>
    %368 = arith.addf %367, %366 : vector<4x32xf32>
    %369 = arith.divf %367, %368 : vector<4x32xf32>
    %370 = vector.extract_strided_slice %348 {offsets = [0, 64], sizes = [1, 32], strides = [1, 1]} : vector<1x96xf32> to vector<1x32xf32>
    %371 = vector.extract_strided_slice %351 {offsets = [0, 64], sizes = [4, 32], strides = [1, 1]} : vector<4x96xf32> to vector<4x32xf32>
    %372 = arith.mulf %360, %371 : vector<4x32xf32>
    %373 = vector.broadcast %370 : vector<1x32xf32> to vector<4x32xf32>
    %374 = arith.addf %373, %372 : vector<4x32xf32>
    %375 = math.tanh %374 : vector<4x32xf32>
    %cst_85 = arith.constant 1.000000e+00 : f32
    %376 = vector.broadcast %cst_85 : f32 to vector<4x32xf32>
    %377 = arith.subf %376, %369 : vector<4x32xf32>
    %378 = arith.mulf %377, %375 : vector<4x32xf32>
    %379 = arith.mulf %369, %293 : vector<4x32xf32>
    %380 = arith.addf %378, %379 : vector<4x32xf32>
    %381 = vector.extract_strided_slice %16 {offsets = [4, 0, 0], sizes = [1, 4, 1], strides = [1, 1, 1]} : vector<8x4x1xf32> to vector<1x4x1xf32>
    %382 = vector.shape_cast %381 : vector<1x4x1xf32> to vector<4x1xf32>
    %cst_86 = arith.constant 0.000000e+00 : f32
    %383 = vector.broadcast %cst_86 : f32 to vector<4x1xf32>
    %384 = arith.cmpf ogt, %382, %383 : vector<4x1xf32>
    %385 = vector.shape_cast %384 : vector<4x1xi1> to vector<4x1xi1>
    %386 = vector.broadcast %385 : vector<4x1xi1> to vector<4x32xi1>
    %387 = arith.select %386, %380, %293 : vector<4x32xi1>, vector<4x32xf32>
    %388 = vector.broadcast %15 : vector<1x32xf32> to vector<4x32xf32>
    %389 = arith.mulf %387, %388 : vector<4x32xf32>
    %cst_87 = arith.constant dense<0.000000e+00> : vector<4xf32>
    %390 = vector.multi_reduction <add>, %389, %cst_87 [1] : vector<4x32xf32> to vector<4xf32>
    %391 = vector.shape_cast %390 : vector<4xf32> to vector<4x1xf32>
    %c4 = arith.constant 4 : index
    %c0_88 = arith.constant 0 : index
    %c0_89 = arith.constant 0 : index
    %392 = vector.load %arg15[%c4, %c0_88, %c0_89] : memref<8x4x1xf32, #tpu.memory_space<vmem>>, vector<1x4x1xf32>
    %393 = vector.shape_cast %392 : vector<1x4x1xf32> to vector<4x1xf32>
    %394 = vector.shape_cast %391 : vector<4x1xf32> to vector<1x4x1xf32>
    tpu.vector_store %arg15[%c4, %c0_88, %c0_89], %394 {strides = array<i32>} : memref<8x4x1xf32, #tpu.memory_space<vmem>>, vector<1x4x1xf32>,
    %395 = vector.extract_strided_slice %5 {offsets = [4, 0], sizes = [1, 96], strides = [1, 1]} : vector<8x96xf32> to vector<1x96xf32>
    %cst_90 = arith.constant dense<0.000000e+00> : vector<4x96xf32>
    %396 = tpu.matmul %340, %11, %cst_90 {dimension_numbers = #tpu.dot_dimension_numbers<[1], [0], [0], [1], [0, 0, 1, 1], [], []>} : vector<4x32xf32>, vector<32x96xf32>, vector<4x96xf32> -> vector<4x96xf32>
    %397 = vector.broadcast %12 : vector<1x96xf32> to vector<4x96xf32>
    %398 = arith.addf %396, %397 : vector<4x96xf32>
    %399 = vector.extract_strided_slice %395 {offsets = [0, 0], sizes = [1, 32], strides = [1, 1]} : vector<1x96xf32> to vector<1x32xf32>
    %400 = vector.extract_strided_slice %398 {offsets = [0, 0], sizes = [4, 32], strides = [1, 1]} : vector<4x96xf32> to vector<4x32xf32>
    %401 = vector.broadcast %399 : vector<1x32xf32> to vector<4x32xf32>
    %402 = arith.addf %401, %400 : vector<4x32xf32>
    %403 = arith.negf %402 : vector<4x32xf32>
    %404 = math.exp %403 : vector<4x32xf32>
    %cst_91 = arith.constant 1.000000e+00 : f32
    %405 = vector.broadcast %cst_91 : f32 to vector<4x32xf32>
    %406 = arith.addf %405, %404 : vector<4x32xf32>
    %407 = arith.divf %405, %406 : vector<4x32xf32>
    %408 = vector.extract_strided_slice %395 {offsets = [0, 32], sizes = [1, 32], strides = [1, 1]} : vector<1x96xf32> to vector<1x32xf32>
    %409 = vector.extract_strided_slice %398 {offsets = [0, 32], sizes = [4, 32], strides = [1, 1]} : vector<4x96xf32> to vector<4x32xf32>
    %410 = vector.broadcast %408 : vector<1x32xf32> to vector<4x32xf32>
    %411 = arith.addf %410, %409 : vector<4x32xf32>
    %412 = arith.negf %411 : vector<4x32xf32>
    %413 = math.exp %412 : vector<4x32xf32>
    %cst_92 = arith.constant 1.000000e+00 : f32
    %414 = vector.broadcast %cst_92 : f32 to vector<4x32xf32>
    %415 = arith.addf %414, %413 : vector<4x32xf32>
    %416 = arith.divf %414, %415 : vector<4x32xf32>
    %417 = vector.extract_strided_slice %395 {offsets = [0, 64], sizes = [1, 32], strides = [1, 1]} : vector<1x96xf32> to vector<1x32xf32>
    %418 = vector.extract_strided_slice %398 {offsets = [0, 64], sizes = [4, 32], strides = [1, 1]} : vector<4x96xf32> to vector<4x32xf32>
    %419 = arith.mulf %407, %418 : vector<4x32xf32>
    %420 = vector.broadcast %417 : vector<1x32xf32> to vector<4x32xf32>
    %421 = arith.addf %420, %419 : vector<4x32xf32>
    %422 = math.tanh %421 : vector<4x32xf32>
    %cst_93 = arith.constant 1.000000e+00 : f32
    %423 = vector.broadcast %cst_93 : f32 to vector<4x32xf32>
    %424 = arith.subf %423, %416 : vector<4x32xf32>
    %425 = arith.mulf %424, %422 : vector<4x32xf32>
    %426 = arith.mulf %416, %340 : vector<4x32xf32>
    %427 = arith.addf %425, %426 : vector<4x32xf32>
    %428 = vector.extract_strided_slice %16 {offsets = [4, 0, 0], sizes = [1, 4, 1], strides = [1, 1, 1]} : vector<8x4x1xf32> to vector<1x4x1xf32>
    %429 = vector.shape_cast %428 : vector<1x4x1xf32> to vector<4x1xf32>
    %cst_94 = arith.constant 0.000000e+00 : f32
    %430 = vector.broadcast %cst_94 : f32 to vector<4x1xf32>
    %431 = arith.cmpf ogt, %429, %430 : vector<4x1xf32>
    %432 = vector.shape_cast %431 : vector<4x1xi1> to vector<4x1xi1>
    %433 = vector.broadcast %432 : vector<4x1xi1> to vector<4x32xi1>
    %434 = arith.select %433, %427, %340 : vector<4x32xi1>, vector<4x32xf32>
    %435 = vector.broadcast %15 : vector<1x32xf32> to vector<4x32xf32>
    %436 = arith.mulf %434, %435 : vector<4x32xf32>
    %cst_95 = arith.constant dense<0.000000e+00> : vector<4xf32>
    %437 = vector.multi_reduction <add>, %436, %cst_95 [1] : vector<4x32xf32> to vector<4xf32>
    %438 = vector.shape_cast %437 : vector<4xf32> to vector<4x1xf32>
    %c4_96 = arith.constant 4 : index
    %c0_97 = arith.constant 0 : index
    %c0_98 = arith.constant 0 : index
    %439 = vector.load %arg14[%c4_96, %c0_97, %c0_98] : memref<8x4x1xf32, #tpu.memory_space<vmem>>, vector<1x4x1xf32>
    %440 = vector.shape_cast %439 : vector<1x4x1xf32> to vector<4x1xf32>
    %441 = vector.shape_cast %438 : vector<4x1xf32> to vector<1x4x1xf32>
    tpu.vector_store %arg14[%c4_96, %c0_97, %c0_98], %441 {strides = array<i32>} : memref<8x4x1xf32, #tpu.memory_space<vmem>>, vector<1x4x1xf32>,
    %442 = vector.extract_strided_slice %10 {offsets = [3, 0], sizes = [1, 96], strides = [1, 1]} : vector<8x96xf32> to vector<1x96xf32>
    %cst_99 = arith.constant dense<0.000000e+00> : vector<4x96xf32>
    %443 = tpu.matmul %387, %13, %cst_99 {dimension_numbers = #tpu.dot_dimension_numbers<[1], [0], [0], [1], [0, 0, 1, 1], [], []>} : vector<4x32xf32>, vector<32x96xf32>, vector<4x96xf32> -> vector<4x96xf32>
    %444 = vector.broadcast %14 : vector<1x96xf32> to vector<4x96xf32>
    %445 = arith.addf %443, %444 : vector<4x96xf32>
    %446 = vector.extract_strided_slice %442 {offsets = [0, 0], sizes = [1, 32], strides = [1, 1]} : vector<1x96xf32> to vector<1x32xf32>
    %447 = vector.extract_strided_slice %445 {offsets = [0, 0], sizes = [4, 32], strides = [1, 1]} : vector<4x96xf32> to vector<4x32xf32>
    %448 = vector.broadcast %446 : vector<1x32xf32> to vector<4x32xf32>
    %449 = arith.addf %448, %447 : vector<4x32xf32>
    %450 = arith.negf %449 : vector<4x32xf32>
    %451 = math.exp %450 : vector<4x32xf32>
    %cst_100 = arith.constant 1.000000e+00 : f32
    %452 = vector.broadcast %cst_100 : f32 to vector<4x32xf32>
    %453 = arith.addf %452, %451 : vector<4x32xf32>
    %454 = arith.divf %452, %453 : vector<4x32xf32>
    %455 = vector.extract_strided_slice %442 {offsets = [0, 32], sizes = [1, 32], strides = [1, 1]} : vector<1x96xf32> to vector<1x32xf32>
    %456 = vector.extract_strided_slice %445 {offsets = [0, 32], sizes = [4, 32], strides = [1, 1]} : vector<4x96xf32> to vector<4x32xf32>
    %457 = vector.broadcast %455 : vector<1x32xf32> to vector<4x32xf32>
    %458 = arith.addf %457, %456 : vector<4x32xf32>
    %459 = arith.negf %458 : vector<4x32xf32>
    %460 = math.exp %459 : vector<4x32xf32>
    %cst_101 = arith.constant 1.000000e+00 : f32
    %461 = vector.broadcast %cst_101 : f32 to vector<4x32xf32>
    %462 = arith.addf %461, %460 : vector<4x32xf32>
    %463 = arith.divf %461, %462 : vector<4x32xf32>
    %464 = vector.extract_strided_slice %442 {offsets = [0, 64], sizes = [1, 32], strides = [1, 1]} : vector<1x96xf32> to vector<1x32xf32>
    %465 = vector.extract_strided_slice %445 {offsets = [0, 64], sizes = [4, 32], strides = [1, 1]} : vector<4x96xf32> to vector<4x32xf32>
    %466 = arith.mulf %454, %465 : vector<4x32xf32>
    %467 = vector.broadcast %464 : vector<1x32xf32> to vector<4x32xf32>
    %468 = arith.addf %467, %466 : vector<4x32xf32>
    %469 = math.tanh %468 : vector<4x32xf32>
    %cst_102 = arith.constant 1.000000e+00 : f32
    %470 = vector.broadcast %cst_102 : f32 to vector<4x32xf32>
    %471 = arith.subf %470, %463 : vector<4x32xf32>
    %472 = arith.mulf %471, %469 : vector<4x32xf32>
    %473 = arith.mulf %463, %387 : vector<4x32xf32>
    %474 = arith.addf %472, %473 : vector<4x32xf32>
    %475 = vector.extract_strided_slice %16 {offsets = [3, 0, 0], sizes = [1, 4, 1], strides = [1, 1, 1]} : vector<8x4x1xf32> to vector<1x4x1xf32>
    %476 = vector.shape_cast %475 : vector<1x4x1xf32> to vector<4x1xf32>
    %cst_103 = arith.constant 0.000000e+00 : f32
    %477 = vector.broadcast %cst_103 : f32 to vector<4x1xf32>
    %478 = arith.cmpf ogt, %476, %477 : vector<4x1xf32>
    %479 = vector.shape_cast %478 : vector<4x1xi1> to vector<4x1xi1>
    %480 = vector.broadcast %479 : vector<4x1xi1> to vector<4x32xi1>
    %481 = arith.select %480, %474, %387 : vector<4x32xi1>, vector<4x32xf32>
    %482 = vector.broadcast %15 : vector<1x32xf32> to vector<4x32xf32>
    %483 = arith.mulf %481, %482 : vector<4x32xf32>
    %cst_104 = arith.constant dense<0.000000e+00> : vector<4xf32>
    %484 = vector.multi_reduction <add>, %483, %cst_104 [1] : vector<4x32xf32> to vector<4xf32>
    %485 = vector.shape_cast %484 : vector<4xf32> to vector<4x1xf32>
    %c3_105 = arith.constant 3 : index
    %c0_106 = arith.constant 0 : index
    %c0_107 = arith.constant 0 : index
    %486 = vector.load %arg15[%c3_105, %c0_106, %c0_107] : memref<8x4x1xf32, #tpu.memory_space<vmem>>, vector<1x4x1xf32>
    %487 = vector.shape_cast %486 : vector<1x4x1xf32> to vector<4x1xf32>
    %488 = vector.shape_cast %485 : vector<4x1xf32> to vector<1x4x1xf32>
    tpu.vector_store %arg15[%c3_105, %c0_106, %c0_107], %488 {strides = array<i32>} : memref<8x4x1xf32, #tpu.memory_space<vmem>>, vector<1x4x1xf32>,
    %489 = vector.extract_strided_slice %5 {offsets = [5, 0], sizes = [1, 96], strides = [1, 1]} : vector<8x96xf32> to vector<1x96xf32>
    %cst_108 = arith.constant dense<0.000000e+00> : vector<4x96xf32>
    %490 = tpu.matmul %434, %11, %cst_108 {dimension_numbers = #tpu.dot_dimension_numbers<[1], [0], [0], [1], [0, 0, 1, 1], [], []>} : vector<4x32xf32>, vector<32x96xf32>, vector<4x96xf32> -> vector<4x96xf32>
    %491 = vector.broadcast %12 : vector<1x96xf32> to vector<4x96xf32>
    %492 = arith.addf %490, %491 : vector<4x96xf32>
    %493 = vector.extract_strided_slice %489 {offsets = [0, 0], sizes = [1, 32], strides = [1, 1]} : vector<1x96xf32> to vector<1x32xf32>
    %494 = vector.extract_strided_slice %492 {offsets = [0, 0], sizes = [4, 32], strides = [1, 1]} : vector<4x96xf32> to vector<4x32xf32>
    %495 = vector.broadcast %493 : vector<1x32xf32> to vector<4x32xf32>
    %496 = arith.addf %495, %494 : vector<4x32xf32>
    %497 = arith.negf %496 : vector<4x32xf32>
    %498 = math.exp %497 : vector<4x32xf32>
    %cst_109 = arith.constant 1.000000e+00 : f32
    %499 = vector.broadcast %cst_109 : f32 to vector<4x32xf32>
    %500 = arith.addf %499, %498 : vector<4x32xf32>
    %501 = arith.divf %499, %500 : vector<4x32xf32>
    %502 = vector.extract_strided_slice %489 {offsets = [0, 32], sizes = [1, 32], strides = [1, 1]} : vector<1x96xf32> to vector<1x32xf32>
    %503 = vector.extract_strided_slice %492 {offsets = [0, 32], sizes = [4, 32], strides = [1, 1]} : vector<4x96xf32> to vector<4x32xf32>
    %504 = vector.broadcast %502 : vector<1x32xf32> to vector<4x32xf32>
    %505 = arith.addf %504, %503 : vector<4x32xf32>
    %506 = arith.negf %505 : vector<4x32xf32>
    %507 = math.exp %506 : vector<4x32xf32>
    %cst_110 = arith.constant 1.000000e+00 : f32
    %508 = vector.broadcast %cst_110 : f32 to vector<4x32xf32>
    %509 = arith.addf %508, %507 : vector<4x32xf32>
    %510 = arith.divf %508, %509 : vector<4x32xf32>
    %511 = vector.extract_strided_slice %489 {offsets = [0, 64], sizes = [1, 32], strides = [1, 1]} : vector<1x96xf32> to vector<1x32xf32>
    %512 = vector.extract_strided_slice %492 {offsets = [0, 64], sizes = [4, 32], strides = [1, 1]} : vector<4x96xf32> to vector<4x32xf32>
    %513 = arith.mulf %501, %512 : vector<4x32xf32>
    %514 = vector.broadcast %511 : vector<1x32xf32> to vector<4x32xf32>
    %515 = arith.addf %514, %513 : vector<4x32xf32>
    %516 = math.tanh %515 : vector<4x32xf32>
    %cst_111 = arith.constant 1.000000e+00 : f32
    %517 = vector.broadcast %cst_111 : f32 to vector<4x32xf32>
    %518 = arith.subf %517, %510 : vector<4x32xf32>
    %519 = arith.mulf %518, %516 : vector<4x32xf32>
    %520 = arith.mulf %510, %434 : vector<4x32xf32>
    %521 = arith.addf %519, %520 : vector<4x32xf32>
    %522 = vector.extract_strided_slice %16 {offsets = [5, 0, 0], sizes = [1, 4, 1], strides = [1, 1, 1]} : vector<8x4x1xf32> to vector<1x4x1xf32>
    %523 = vector.shape_cast %522 : vector<1x4x1xf32> to vector<4x1xf32>
    %cst_112 = arith.constant 0.000000e+00 : f32
    %524 = vector.broadcast %cst_112 : f32 to vector<4x1xf32>
    %525 = arith.cmpf ogt, %523, %524 : vector<4x1xf32>
    %526 = vector.shape_cast %525 : vector<4x1xi1> to vector<4x1xi1>
    %527 = vector.broadcast %526 : vector<4x1xi1> to vector<4x32xi1>
    %528 = arith.select %527, %521, %434 : vector<4x32xi1>, vector<4x32xf32>
    %529 = vector.broadcast %15 : vector<1x32xf32> to vector<4x32xf32>
    %530 = arith.mulf %528, %529 : vector<4x32xf32>
    %cst_113 = arith.constant dense<0.000000e+00> : vector<4xf32>
    %531 = vector.multi_reduction <add>, %530, %cst_113 [1] : vector<4x32xf32> to vector<4xf32>
    %532 = vector.shape_cast %531 : vector<4xf32> to vector<4x1xf32>
    %c5_114 = arith.constant 5 : index
    %c0_115 = arith.constant 0 : index
    %c0_116 = arith.constant 0 : index
    %533 = vector.load %arg14[%c5_114, %c0_115, %c0_116] : memref<8x4x1xf32, #tpu.memory_space<vmem>>, vector<1x4x1xf32>
    %534 = vector.shape_cast %533 : vector<1x4x1xf32> to vector<4x1xf32>
    %535 = vector.shape_cast %532 : vector<4x1xf32> to vector<1x4x1xf32>
    tpu.vector_store %arg14[%c5_114, %c0_115, %c0_116], %535 {strides = array<i32>} : memref<8x4x1xf32, #tpu.memory_space<vmem>>, vector<1x4x1xf32>,
    %536 = vector.extract_strided_slice %10 {offsets = [2, 0], sizes = [1, 96], strides = [1, 1]} : vector<8x96xf32> to vector<1x96xf32>
    %cst_117 = arith.constant dense<0.000000e+00> : vector<4x96xf32>
    %537 = tpu.matmul %481, %13, %cst_117 {dimension_numbers = #tpu.dot_dimension_numbers<[1], [0], [0], [1], [0, 0, 1, 1], [], []>} : vector<4x32xf32>, vector<32x96xf32>, vector<4x96xf32> -> vector<4x96xf32>
    %538 = vector.broadcast %14 : vector<1x96xf32> to vector<4x96xf32>
    %539 = arith.addf %537, %538 : vector<4x96xf32>
    %540 = vector.extract_strided_slice %536 {offsets = [0, 0], sizes = [1, 32], strides = [1, 1]} : vector<1x96xf32> to vector<1x32xf32>
    %541 = vector.extract_strided_slice %539 {offsets = [0, 0], sizes = [4, 32], strides = [1, 1]} : vector<4x96xf32> to vector<4x32xf32>
    %542 = vector.broadcast %540 : vector<1x32xf32> to vector<4x32xf32>
    %543 = arith.addf %542, %541 : vector<4x32xf32>
    %544 = arith.negf %543 : vector<4x32xf32>
    %545 = math.exp %544 : vector<4x32xf32>
    %cst_118 = arith.constant 1.000000e+00 : f32
    %546 = vector.broadcast %cst_118 : f32 to vector<4x32xf32>
    %547 = arith.addf %546, %545 : vector<4x32xf32>
    %548 = arith.divf %546, %547 : vector<4x32xf32>
    %549 = vector.extract_strided_slice %536 {offsets = [0, 32], sizes = [1, 32], strides = [1, 1]} : vector<1x96xf32> to vector<1x32xf32>
    %550 = vector.extract_strided_slice %539 {offsets = [0, 32], sizes = [4, 32], strides = [1, 1]} : vector<4x96xf32> to vector<4x32xf32>
    %551 = vector.broadcast %549 : vector<1x32xf32> to vector<4x32xf32>
    %552 = arith.addf %551, %550 : vector<4x32xf32>
    %553 = arith.negf %552 : vector<4x32xf32>
    %554 = math.exp %553 : vector<4x32xf32>
    %cst_119 = arith.constant 1.000000e+00 : f32
    %555 = vector.broadcast %cst_119 : f32 to vector<4x32xf32>
    %556 = arith.addf %555, %554 : vector<4x32xf32>
    %557 = arith.divf %555, %556 : vector<4x32xf32>
    %558 = vector.extract_strided_slice %536 {offsets = [0, 64], sizes = [1, 32], strides = [1, 1]} : vector<1x96xf32> to vector<1x32xf32>
    %559 = vector.extract_strided_slice %539 {offsets = [0, 64], sizes = [4, 32], strides = [1, 1]} : vector<4x96xf32> to vector<4x32xf32>
    %560 = arith.mulf %548, %559 : vector<4x32xf32>
    %561 = vector.broadcast %558 : vector<1x32xf32> to vector<4x32xf32>
    %562 = arith.addf %561, %560 : vector<4x32xf32>
    %563 = math.tanh %562 : vector<4x32xf32>
    %cst_120 = arith.constant 1.000000e+00 : f32
    %564 = vector.broadcast %cst_120 : f32 to vector<4x32xf32>
    %565 = arith.subf %564, %557 : vector<4x32xf32>
    %566 = arith.mulf %565, %563 : vector<4x32xf32>
    %567 = arith.mulf %557, %481 : vector<4x32xf32>
    %568 = arith.addf %566, %567 : vector<4x32xf32>
    %569 = vector.extract_strided_slice %16 {offsets = [2, 0, 0], sizes = [1, 4, 1], strides = [1, 1, 1]} : vector<8x4x1xf32> to vector<1x4x1xf32>
    %570 = vector.shape_cast %569 : vector<1x4x1xf32> to vector<4x1xf32>
    %cst_121 = arith.constant 0.000000e+00 : f32
    %571 = vector.broadcast %cst_121 : f32 to vector<4x1xf32>
    %572 = arith.cmpf ogt, %570, %571 : vector<4x1xf32>
    %573 = vector.shape_cast %572 : vector<4x1xi1> to vector<4x1xi1>
    %574 = vector.broadcast %573 : vector<4x1xi1> to vector<4x32xi1>
    %575 = arith.select %574, %568, %481 : vector<4x32xi1>, vector<4x32xf32>
    %576 = vector.broadcast %15 : vector<1x32xf32> to vector<4x32xf32>
    %577 = arith.mulf %575, %576 : vector<4x32xf32>
    %cst_122 = arith.constant dense<0.000000e+00> : vector<4xf32>
    %578 = vector.multi_reduction <add>, %577, %cst_122 [1] : vector<4x32xf32> to vector<4xf32>
    %579 = vector.shape_cast %578 : vector<4xf32> to vector<4x1xf32>
    %c2_123 = arith.constant 2 : index
    %c0_124 = arith.constant 0 : index
    %c0_125 = arith.constant 0 : index
    %580 = vector.load %arg15[%c2_123, %c0_124, %c0_125] : memref<8x4x1xf32, #tpu.memory_space<vmem>>, vector<1x4x1xf32>
    %581 = vector.shape_cast %580 : vector<1x4x1xf32> to vector<4x1xf32>
    %582 = vector.shape_cast %579 : vector<4x1xf32> to vector<1x4x1xf32>
    tpu.vector_store %arg15[%c2_123, %c0_124, %c0_125], %582 {strides = array<i32>} : memref<8x4x1xf32, #tpu.memory_space<vmem>>, vector<1x4x1xf32>,
    %583 = vector.extract_strided_slice %5 {offsets = [6, 0], sizes = [1, 96], strides = [1, 1]} : vector<8x96xf32> to vector<1x96xf32>
    %cst_126 = arith.constant dense<0.000000e+00> : vector<4x96xf32>
    %584 = tpu.matmul %528, %11, %cst_126 {dimension_numbers = #tpu.dot_dimension_numbers<[1], [0], [0], [1], [0, 0, 1, 1], [], []>} : vector<4x32xf32>, vector<32x96xf32>, vector<4x96xf32> -> vector<4x96xf32>
    %585 = vector.broadcast %12 : vector<1x96xf32> to vector<4x96xf32>
    %586 = arith.addf %584, %585 : vector<4x96xf32>
    %587 = vector.extract_strided_slice %583 {offsets = [0, 0], sizes = [1, 32], strides = [1, 1]} : vector<1x96xf32> to vector<1x32xf32>
    %588 = vector.extract_strided_slice %586 {offsets = [0, 0], sizes = [4, 32], strides = [1, 1]} : vector<4x96xf32> to vector<4x32xf32>
    %589 = vector.broadcast %587 : vector<1x32xf32> to vector<4x32xf32>
    %590 = arith.addf %589, %588 : vector<4x32xf32>
    %591 = arith.negf %590 : vector<4x32xf32>
    %592 = math.exp %591 : vector<4x32xf32>
    %cst_127 = arith.constant 1.000000e+00 : f32
    %593 = vector.broadcast %cst_127 : f32 to vector<4x32xf32>
    %594 = arith.addf %593, %592 : vector<4x32xf32>
    %595 = arith.divf %593, %594 : vector<4x32xf32>
    %596 = vector.extract_strided_slice %583 {offsets = [0, 32], sizes = [1, 32], strides = [1, 1]} : vector<1x96xf32> to vector<1x32xf32>
    %597 = vector.extract_strided_slice %586 {offsets = [0, 32], sizes = [4, 32], strides = [1, 1]} : vector<4x96xf32> to vector<4x32xf32>
    %598 = vector.broadcast %596 : vector<1x32xf32> to vector<4x32xf32>
    %599 = arith.addf %598, %597 : vector<4x32xf32>
    %600 = arith.negf %599 : vector<4x32xf32>
    %601 = math.exp %600 : vector<4x32xf32>
    %cst_128 = arith.constant 1.000000e+00 : f32
    %602 = vector.broadcast %cst_128 : f32 to vector<4x32xf32>
    %603 = arith.addf %602, %601 : vector<4x32xf32>
    %604 = arith.divf %602, %603 : vector<4x32xf32>
    %605 = vector.extract_strided_slice %583 {offsets = [0, 64], sizes = [1, 32], strides = [1, 1]} : vector<1x96xf32> to vector<1x32xf32>
    %606 = vector.extract_strided_slice %586 {offsets = [0, 64], sizes = [4, 32], strides = [1, 1]} : vector<4x96xf32> to vector<4x32xf32>
    %607 = arith.mulf %595, %606 : vector<4x32xf32>
    %608 = vector.broadcast %605 : vector<1x32xf32> to vector<4x32xf32>
    %609 = arith.addf %608, %607 : vector<4x32xf32>
    %610 = math.tanh %609 : vector<4x32xf32>
    %cst_129 = arith.constant 1.000000e+00 : f32
    %611 = vector.broadcast %cst_129 : f32 to vector<4x32xf32>
    %612 = arith.subf %611, %604 : vector<4x32xf32>
    %613 = arith.mulf %612, %610 : vector<4x32xf32>
    %614 = arith.mulf %604, %528 : vector<4x32xf32>
    %615 = arith.addf %613, %614 : vector<4x32xf32>
    %616 = vector.extract_strided_slice %16 {offsets = [6, 0, 0], sizes = [1, 4, 1], strides = [1, 1, 1]} : vector<8x4x1xf32> to vector<1x4x1xf32>
    %617 = vector.shape_cast %616 : vector<1x4x1xf32> to vector<4x1xf32>
    %cst_130 = arith.constant 0.000000e+00 : f32
    %618 = vector.broadcast %cst_130 : f32 to vector<4x1xf32>
    %619 = arith.cmpf ogt, %617, %618 : vector<4x1xf32>
    %620 = vector.shape_cast %619 : vector<4x1xi1> to vector<4x1xi1>
    %621 = vector.broadcast %620 : vector<4x1xi1> to vector<4x32xi1>
    %622 = arith.select %621, %615, %528 : vector<4x32xi1>, vector<4x32xf32>
    %623 = vector.broadcast %15 : vector<1x32xf32> to vector<4x32xf32>
    %624 = arith.mulf %622, %623 : vector<4x32xf32>
    %cst_131 = arith.constant dense<0.000000e+00> : vector<4xf32>
    %625 = vector.multi_reduction <add>, %624, %cst_131 [1] : vector<4x32xf32> to vector<4xf32>
    %626 = vector.shape_cast %625 : vector<4xf32> to vector<4x1xf32>
    %c6_132 = arith.constant 6 : index
    %c0_133 = arith.constant 0 : index
    %c0_134 = arith.constant 0 : index
    %627 = vector.load %arg14[%c6_132, %c0_133, %c0_134] : memref<8x4x1xf32, #tpu.memory_space<vmem>>, vector<1x4x1xf32>
    %628 = vector.shape_cast %627 : vector<1x4x1xf32> to vector<4x1xf32>
    %629 = vector.shape_cast %626 : vector<4x1xf32> to vector<1x4x1xf32>
    tpu.vector_store %arg14[%c6_132, %c0_133, %c0_134], %629 {strides = array<i32>} : memref<8x4x1xf32, #tpu.memory_space<vmem>>, vector<1x4x1xf32>,
    %630 = vector.extract_strided_slice %10 {offsets = [1, 0], sizes = [1, 96], strides = [1, 1]} : vector<8x96xf32> to vector<1x96xf32>
    %cst_135 = arith.constant dense<0.000000e+00> : vector<4x96xf32>
    %631 = tpu.matmul %575, %13, %cst_135 {dimension_numbers = #tpu.dot_dimension_numbers<[1], [0], [0], [1], [0, 0, 1, 1], [], []>} : vector<4x32xf32>, vector<32x96xf32>, vector<4x96xf32> -> vector<4x96xf32>
    %632 = vector.broadcast %14 : vector<1x96xf32> to vector<4x96xf32>
    %633 = arith.addf %631, %632 : vector<4x96xf32>
    %634 = vector.extract_strided_slice %630 {offsets = [0, 0], sizes = [1, 32], strides = [1, 1]} : vector<1x96xf32> to vector<1x32xf32>
    %635 = vector.extract_strided_slice %633 {offsets = [0, 0], sizes = [4, 32], strides = [1, 1]} : vector<4x96xf32> to vector<4x32xf32>
    %636 = vector.broadcast %634 : vector<1x32xf32> to vector<4x32xf32>
    %637 = arith.addf %636, %635 : vector<4x32xf32>
    %638 = arith.negf %637 : vector<4x32xf32>
    %639 = math.exp %638 : vector<4x32xf32>
    %cst_136 = arith.constant 1.000000e+00 : f32
    %640 = vector.broadcast %cst_136 : f32 to vector<4x32xf32>
    %641 = arith.addf %640, %639 : vector<4x32xf32>
    %642 = arith.divf %640, %641 : vector<4x32xf32>
    %643 = vector.extract_strided_slice %630 {offsets = [0, 32], sizes = [1, 32], strides = [1, 1]} : vector<1x96xf32> to vector<1x32xf32>
    %644 = vector.extract_strided_slice %633 {offsets = [0, 32], sizes = [4, 32], strides = [1, 1]} : vector<4x96xf32> to vector<4x32xf32>
    %645 = vector.broadcast %643 : vector<1x32xf32> to vector<4x32xf32>
    %646 = arith.addf %645, %644 : vector<4x32xf32>
    %647 = arith.negf %646 : vector<4x32xf32>
    %648 = math.exp %647 : vector<4x32xf32>
    %cst_137 = arith.constant 1.000000e+00 : f32
    %649 = vector.broadcast %cst_137 : f32 to vector<4x32xf32>
    %650 = arith.addf %649, %648 : vector<4x32xf32>
    %651 = arith.divf %649, %650 : vector<4x32xf32>
    %652 = vector.extract_strided_slice %630 {offsets = [0, 64], sizes = [1, 32], strides = [1, 1]} : vector<1x96xf32> to vector<1x32xf32>
    %653 = vector.extract_strided_slice %633 {offsets = [0, 64], sizes = [4, 32], strides = [1, 1]} : vector<4x96xf32> to vector<4x32xf32>
    %654 = arith.mulf %642, %653 : vector<4x32xf32>
    %655 = vector.broadcast %652 : vector<1x32xf32> to vector<4x32xf32>
    %656 = arith.addf %655, %654 : vector<4x32xf32>
    %657 = math.tanh %656 : vector<4x32xf32>
    %cst_138 = arith.constant 1.000000e+00 : f32
    %658 = vector.broadcast %cst_138 : f32 to vector<4x32xf32>
    %659 = arith.subf %658, %651 : vector<4x32xf32>
    %660 = arith.mulf %659, %657 : vector<4x32xf32>
    %661 = arith.mulf %651, %575 : vector<4x32xf32>
    %662 = arith.addf %660, %661 : vector<4x32xf32>
    %663 = vector.extract_strided_slice %16 {offsets = [1, 0, 0], sizes = [1, 4, 1], strides = [1, 1, 1]} : vector<8x4x1xf32> to vector<1x4x1xf32>
    %664 = vector.shape_cast %663 : vector<1x4x1xf32> to vector<4x1xf32>
    %cst_139 = arith.constant 0.000000e+00 : f32
    %665 = vector.broadcast %cst_139 : f32 to vector<4x1xf32>
    %666 = arith.cmpf ogt, %664, %665 : vector<4x1xf32>
    %667 = vector.shape_cast %666 : vector<4x1xi1> to vector<4x1xi1>
    %668 = vector.broadcast %667 : vector<4x1xi1> to vector<4x32xi1>
    %669 = arith.select %668, %662, %575 : vector<4x32xi1>, vector<4x32xf32>
    %670 = vector.broadcast %15 : vector<1x32xf32> to vector<4x32xf32>
    %671 = arith.mulf %669, %670 : vector<4x32xf32>
    %cst_140 = arith.constant dense<0.000000e+00> : vector<4xf32>
    %672 = vector.multi_reduction <add>, %671, %cst_140 [1] : vector<4x32xf32> to vector<4xf32>
    %673 = vector.shape_cast %672 : vector<4xf32> to vector<4x1xf32>
    %c1_141 = arith.constant 1 : index
    %c0_142 = arith.constant 0 : index
    %c0_143 = arith.constant 0 : index
    %674 = vector.load %arg15[%c1_141, %c0_142, %c0_143] : memref<8x4x1xf32, #tpu.memory_space<vmem>>, vector<1x4x1xf32>
    %675 = vector.shape_cast %674 : vector<1x4x1xf32> to vector<4x1xf32>
    %676 = vector.shape_cast %673 : vector<4x1xf32> to vector<1x4x1xf32>
    tpu.vector_store %arg15[%c1_141, %c0_142, %c0_143], %676 {strides = array<i32>} : memref<8x4x1xf32, #tpu.memory_space<vmem>>, vector<1x4x1xf32>,
    %677 = vector.extract_strided_slice %5 {offsets = [7, 0], sizes = [1, 96], strides = [1, 1]} : vector<8x96xf32> to vector<1x96xf32>
    %cst_144 = arith.constant dense<0.000000e+00> : vector<4x96xf32>
    %678 = tpu.matmul %622, %11, %cst_144 {dimension_numbers = #tpu.dot_dimension_numbers<[1], [0], [0], [1], [0, 0, 1, 1], [], []>} : vector<4x32xf32>, vector<32x96xf32>, vector<4x96xf32> -> vector<4x96xf32>
    %679 = vector.broadcast %12 : vector<1x96xf32> to vector<4x96xf32>
    %680 = arith.addf %678, %679 : vector<4x96xf32>
    %681 = vector.extract_strided_slice %677 {offsets = [0, 0], sizes = [1, 32], strides = [1, 1]} : vector<1x96xf32> to vector<1x32xf32>
    %682 = vector.extract_strided_slice %680 {offsets = [0, 0], sizes = [4, 32], strides = [1, 1]} : vector<4x96xf32> to vector<4x32xf32>
    %683 = vector.broadcast %681 : vector<1x32xf32> to vector<4x32xf32>
    %684 = arith.addf %683, %682 : vector<4x32xf32>
    %685 = arith.negf %684 : vector<4x32xf32>
    %686 = math.exp %685 : vector<4x32xf32>
    %cst_145 = arith.constant 1.000000e+00 : f32
    %687 = vector.broadcast %cst_145 : f32 to vector<4x32xf32>
    %688 = arith.addf %687, %686 : vector<4x32xf32>
    %689 = arith.divf %687, %688 : vector<4x32xf32>
    %690 = vector.extract_strided_slice %677 {offsets = [0, 32], sizes = [1, 32], strides = [1, 1]} : vector<1x96xf32> to vector<1x32xf32>
    %691 = vector.extract_strided_slice %680 {offsets = [0, 32], sizes = [4, 32], strides = [1, 1]} : vector<4x96xf32> to vector<4x32xf32>
    %692 = vector.broadcast %690 : vector<1x32xf32> to vector<4x32xf32>
    %693 = arith.addf %692, %691 : vector<4x32xf32>
    %694 = arith.negf %693 : vector<4x32xf32>
    %695 = math.exp %694 : vector<4x32xf32>
    %cst_146 = arith.constant 1.000000e+00 : f32
    %696 = vector.broadcast %cst_146 : f32 to vector<4x32xf32>
    %697 = arith.addf %696, %695 : vector<4x32xf32>
    %698 = arith.divf %696, %697 : vector<4x32xf32>
    %699 = vector.extract_strided_slice %677 {offsets = [0, 64], sizes = [1, 32], strides = [1, 1]} : vector<1x96xf32> to vector<1x32xf32>
    %700 = vector.extract_strided_slice %680 {offsets = [0, 64], sizes = [4, 32], strides = [1, 1]} : vector<4x96xf32> to vector<4x32xf32>
    %701 = arith.mulf %689, %700 : vector<4x32xf32>
    %702 = vector.broadcast %699 : vector<1x32xf32> to vector<4x32xf32>
    %703 = arith.addf %702, %701 : vector<4x32xf32>
    %704 = math.tanh %703 : vector<4x32xf32>
    %cst_147 = arith.constant 1.000000e+00 : f32
    %705 = vector.broadcast %cst_147 : f32 to vector<4x32xf32>
    %706 = arith.subf %705, %698 : vector<4x32xf32>
    %707 = arith.mulf %706, %704 : vector<4x32xf32>
    %708 = arith.mulf %698, %622 : vector<4x32xf32>
    %709 = arith.addf %707, %708 : vector<4x32xf32>
    %710 = vector.extract_strided_slice %16 {offsets = [7, 0, 0], sizes = [1, 4, 1], strides = [1, 1, 1]} : vector<8x4x1xf32> to vector<1x4x1xf32>
    %711 = vector.shape_cast %710 : vector<1x4x1xf32> to vector<4x1xf32>
    %cst_148 = arith.constant 0.000000e+00 : f32
    %712 = vector.broadcast %cst_148 : f32 to vector<4x1xf32>
    %713 = arith.cmpf ogt, %711, %712 : vector<4x1xf32>
    %714 = vector.shape_cast %713 : vector<4x1xi1> to vector<4x1xi1>
    %715 = vector.broadcast %714 : vector<4x1xi1> to vector<4x32xi1>
    %716 = arith.select %715, %709, %622 : vector<4x32xi1>, vector<4x32xf32>
    %717 = vector.broadcast %15 : vector<1x32xf32> to vector<4x32xf32>
    %718 = arith.mulf %716, %717 : vector<4x32xf32>
    %cst_149 = arith.constant dense<0.000000e+00> : vector<4xf32>
    %719 = vector.multi_reduction <add>, %718, %cst_149 [1] : vector<4x32xf32> to vector<4xf32>
    %720 = vector.shape_cast %719 : vector<4xf32> to vector<4x1xf32>
    %c7_150 = arith.constant 7 : index
    %c0_151 = arith.constant 0 : index
    %c0_152 = arith.constant 0 : index
    %721 = vector.load %arg14[%c7_150, %c0_151, %c0_152] : memref<8x4x1xf32, #tpu.memory_space<vmem>>, vector<1x4x1xf32>
    %722 = vector.shape_cast %721 : vector<1x4x1xf32> to vector<4x1xf32>
    %723 = vector.shape_cast %720 : vector<4x1xf32> to vector<1x4x1xf32>
    tpu.vector_store %arg14[%c7_150, %c0_151, %c0_152], %723 {strides = array<i32>} : memref<8x4x1xf32, #tpu.memory_space<vmem>>, vector<1x4x1xf32>,
    %724 = vector.extract_strided_slice %10 {offsets = [0, 0], sizes = [1, 96], strides = [1, 1]} : vector<8x96xf32> to vector<1x96xf32>
    %cst_153 = arith.constant dense<0.000000e+00> : vector<4x96xf32>
    %725 = tpu.matmul %669, %13, %cst_153 {dimension_numbers = #tpu.dot_dimension_numbers<[1], [0], [0], [1], [0, 0, 1, 1], [], []>} : vector<4x32xf32>, vector<32x96xf32>, vector<4x96xf32> -> vector<4x96xf32>
    %726 = vector.broadcast %14 : vector<1x96xf32> to vector<4x96xf32>
    %727 = arith.addf %725, %726 : vector<4x96xf32>
    %728 = vector.extract_strided_slice %724 {offsets = [0, 0], sizes = [1, 32], strides = [1, 1]} : vector<1x96xf32> to vector<1x32xf32>
    %729 = vector.extract_strided_slice %727 {offsets = [0, 0], sizes = [4, 32], strides = [1, 1]} : vector<4x96xf32> to vector<4x32xf32>
    %730 = vector.broadcast %728 : vector<1x32xf32> to vector<4x32xf32>
    %731 = arith.addf %730, %729 : vector<4x32xf32>
    %732 = arith.negf %731 : vector<4x32xf32>
    %733 = math.exp %732 : vector<4x32xf32>
    %cst_154 = arith.constant 1.000000e+00 : f32
    %734 = vector.broadcast %cst_154 : f32 to vector<4x32xf32>
    %735 = arith.addf %734, %733 : vector<4x32xf32>
    %736 = arith.divf %734, %735 : vector<4x32xf32>
    %737 = vector.extract_strided_slice %724 {offsets = [0, 32], sizes = [1, 32], strides = [1, 1]} : vector<1x96xf32> to vector<1x32xf32>
    %738 = vector.extract_strided_slice %727 {offsets = [0, 32], sizes = [4, 32], strides = [1, 1]} : vector<4x96xf32> to vector<4x32xf32>
    %739 = vector.broadcast %737 : vector<1x32xf32> to vector<4x32xf32>
    %740 = arith.addf %739, %738 : vector<4x32xf32>
    %741 = arith.negf %740 : vector<4x32xf32>
    %742 = math.exp %741 : vector<4x32xf32>
    %cst_155 = arith.constant 1.000000e+00 : f32
    %743 = vector.broadcast %cst_155 : f32 to vector<4x32xf32>
    %744 = arith.addf %743, %742 : vector<4x32xf32>
    %745 = arith.divf %743, %744 : vector<4x32xf32>
    %746 = vector.extract_strided_slice %724 {offsets = [0, 64], sizes = [1, 32], strides = [1, 1]} : vector<1x96xf32> to vector<1x32xf32>
    %747 = vector.extract_strided_slice %727 {offsets = [0, 64], sizes = [4, 32], strides = [1, 1]} : vector<4x96xf32> to vector<4x32xf32>
    %748 = arith.mulf %736, %747 : vector<4x32xf32>
    %749 = vector.broadcast %746 : vector<1x32xf32> to vector<4x32xf32>
    %750 = arith.addf %749, %748 : vector<4x32xf32>
    %751 = math.tanh %750 : vector<4x32xf32>
    %cst_156 = arith.constant 1.000000e+00 : f32
    %752 = vector.broadcast %cst_156 : f32 to vector<4x32xf32>
    %753 = arith.subf %752, %745 : vector<4x32xf32>
    %754 = arith.mulf %753, %751 : vector<4x32xf32>
    %755 = arith.mulf %745, %669 : vector<4x32xf32>
    %756 = arith.addf %754, %755 : vector<4x32xf32>
    %757 = vector.extract_strided_slice %16 {offsets = [0, 0, 0], sizes = [1, 4, 1], strides = [1, 1, 1]} : vector<8x4x1xf32> to vector<1x4x1xf32>
    %758 = vector.shape_cast %757 : vector<1x4x1xf32> to vector<4x1xf32>
    %cst_157 = arith.constant 0.000000e+00 : f32
    %759 = vector.broadcast %cst_157 : f32 to vector<4x1xf32>
    %760 = arith.cmpf ogt, %758, %759 : vector<4x1xf32>
    %761 = vector.shape_cast %760 : vector<4x1xi1> to vector<4x1xi1>
    %762 = vector.broadcast %761 : vector<4x1xi1> to vector<4x32xi1>
    %763 = arith.select %762, %756, %669 : vector<4x32xi1>, vector<4x32xf32>
    %764 = vector.broadcast %15 : vector<1x32xf32> to vector<4x32xf32>
    %765 = arith.mulf %763, %764 : vector<4x32xf32>
    %cst_158 = arith.constant dense<0.000000e+00> : vector<4xf32>
    %766 = vector.multi_reduction <add>, %765, %cst_158 [1] : vector<4x32xf32> to vector<4xf32>
    %767 = vector.shape_cast %766 : vector<4xf32> to vector<4x1xf32>
    %c0_159 = arith.constant 0 : index
    %c0_160 = arith.constant 0 : index
    %c0_161 = arith.constant 0 : index
    %768 = vector.load %arg15[%c0_159, %c0_160, %c0_161] : memref<8x4x1xf32, #tpu.memory_space<vmem>>, vector<1x4x1xf32>
    %769 = vector.shape_cast %768 : vector<1x4x1xf32> to vector<4x1xf32>
    %770 = vector.shape_cast %767 : vector<4x1xf32> to vector<1x4x1xf32>
    tpu.vector_store %arg15[%c0_159, %c0_160, %c0_161], %770 {strides = array<i32>} : memref<8x4x1xf32, #tpu.memory_space<vmem>>, vector<1x4x1xf32>,
    %c0_162 = arith.constant 0 : index
    %c0_163 = arith.constant 0 : index
    %c0_164 = arith.constant 0 : index
    %771 = vector.load %arg14[%c0_162, %c0_163, %c0_164] : memref<8x4x1xf32, #tpu.memory_space<vmem>>, vector<8x4x1xf32>
    %c0_165 = arith.constant 0 : index
    %c0_166 = arith.constant 0 : index
    %c0_167 = arith.constant 0 : index
    %772 = vector.load %arg15[%c0_165, %c0_166, %c0_167] : memref<8x4x1xf32, #tpu.memory_space<vmem>>, vector<8x4x1xf32>
    %773 = arith.addf %771, %772 : vector<8x4x1xf32>
    %cst_168 = arith.constant 5.000000e-01 : f32
    %774 = vector.broadcast %cst_168 : f32 to vector<8x4x1xf32>
    %775 = arith.mulf %773, %774 : vector<8x4x1xf32>
    %cst_169 = arith.constant 0.000000e+00 : f32
    %776 = vector.broadcast %cst_169 : f32 to vector<8x4x1xf32>
    %777 = arith.cmpf ogt, %16, %776 : vector<8x4x1xf32>
    %cst_170 = arith.constant -1.000000e+04 : f32
    %778 = vector.broadcast %cst_170 : f32 to vector<8x4x1xf32>
    %779 = arith.select %777, %775, %778 : vector<8x4x1xi1>, vector<8x4x1xf32>
    %cst_171 = arith.constant 1.000000e+01 : f32
    %780 = vector.broadcast %cst_171 : f32 to vector<8x4x1xf32>
    %781 = arith.mulf %779, %780 : vector<8x4x1xf32>
    %cst_172 = arith.constant dense<0xFF800000> : vector<4x1xf32>
    %782 = vector.multi_reduction <maximumf>, %781, %cst_172 [0] : vector<8x4x1xf32> to vector<4x1xf32>
    %783 = vector.shape_cast %782 : vector<4x1xf32> to vector<1x4x1xf32>
    %784 = vector.broadcast %783 : vector<1x4x1xf32> to vector<8x4x1xf32>
    %785 = arith.subf %781, %784 : vector<8x4x1xf32>
    %786 = math.exp %785 : vector<8x4x1xf32>
    %cst_173 = arith.constant dense<0.000000e+00> : vector<4x1xf32>
    %787 = vector.multi_reduction <add>, %786, %cst_173 [0] : vector<8x4x1xf32> to vector<4x1xf32>
    %788 = vector.shape_cast %787 : vector<4x1xf32> to vector<1x4x1xf32>
    %789 = tpu.reciprocal %788 {approx = true} : vector<1x4x1xf32> -> vector<1x4x1xf32>
    %790 = vector.broadcast %789 : vector<1x4x1xf32> to vector<8x4x1xf32>
    %791 = arith.mulf %786, %790 : vector<8x4x1xf32>
    %c0_174 = arith.constant 0 : index
    %c0_175 = arith.constant 0 : index
    %c0_176 = arith.constant 0 : index
    %792 = vector.load %arg13[%c0_174, %c0_175, %c0_176] : memref<8x4x1xf32, #tpu.memory_space<vmem>>, vector<8x4x1xf32>
    tpu.vector_store %arg13[%c0_174, %c0_175, %c0_176], %791 {strides = array<i32>} : memref<8x4x1xf32, #tpu.memory_space<vmem>>, vector<8x4x1xf32>,
    %c0_177 = arith.constant 0 : index
    %c0_178 = arith.constant 0 : index
    %c0_179 = arith.constant 0 : index
    %793 = vector.load %arg2[%c0_177, %c0_178, %c0_179] : memref<8x4x32xf32, #tpu.memory_space<vmem>>, vector<8x4x32xf32>
    %794 = arith.mulf %791, %16 : vector<8x4x1xf32>
    %795 = vector.broadcast %794 : vector<8x4x1xf32> to vector<8x4x32xf32>
    %796 = arith.mulf %793, %795 : vector<8x4x32xf32>
    %cst_180 = arith.constant dense<0.000000e+00> : vector<4x32xf32>
    %797 = vector.multi_reduction <add>, %796, %cst_180 [0] : vector<8x4x32xf32> to vector<4x32xf32>
    %c0_181 = arith.constant 0 : index
    %c0_182 = arith.constant 0 : index
    %798 = vector.load %arg12[%c0_181, %c0_182] : memref<4x32xf32, #tpu.memory_space<vmem>>, vector<4x32xf32>
    tpu.vector_store %arg12[%c0_181, %c0_182], %797 {strides = array<i32>} : memref<4x32xf32, #tpu.memory_space<vmem>>, vector<4x32xf32>,
    return
  }
}

</mosaic_0001>

<bundles_post_ra>
// kernel: gpo_forward.1
= control target key start
LH: loop header
LB: loop body
LE: loop exit
PB: predicated region body
PF: predicated region fallthrough
CT: control target
= control target key end

     0   :  { %v2934_v3 = vmov 0.0|0.0   ;;  %vm2935_vm0 = vmmov 0   ;;  %v2936_v8 = vmov 0.0   ;;  %vm54_vm1 = vcmask 130048   ;;  %s3752_s0 = inlined_call_operand.vmem [shape: f32[8,16], index: 0, kind: input, shape index: {}]   ;;  %s3753_s1 = inlined_call_operand.vmem [shape: f32[8,4,1], index: 1, kind: input, shape index: {}]   ;;  %s3754_s2 = inlined_call_operand.vmem [shape: f32[8,4,32], index: 2, kind: input, shape index: {}]   ;;  %s3755_s3 = inlined_call_operand.vmem [shape: f32[16,96], index: 3, kind: input, shape index: {}]   ;;  %s3756_s4 = inlined_call_operand.vmem [shape: f32[32,96], index: 4, kind: input, shape index: {}]   ;;  %s3757_s5 = inlined_call_operand.vmem [shape: f32[1,96], index: 5, kind: input, shape index: {}]   ;;  %s3758_s6 = inlined_call_operand.vmem [shape: f32[1,96], index: 6, kind: input, shape index: {}]   ;;  %s3759_s7 = inlined_call_operand.vmem [shape: f32[16,96], index: 7, kind: input, shape index: {}]   ;;  %s3760_s8 = inlined_call_operand.vmem [shape: f32[32,96], index: 8, kind: input, shape index: {}]   ;;  %s3761_s9 = inlined_call_operand.vmem [shape: f32[1,96], index: 9, kind: input, shape index: {}]   ;;  %s3762_s10 = inlined_call_operand.vmem [shape: f32[1,96], index: 10, kind: input, shape index: {}]   ;;  %s3763_s11 = inlined_call_operand.vmem [shape: f32[1,32], index: 11, kind: input, shape index: {}]   ;;  %s3764_s12 = inlined_call_operand.hbm [shape: f32[4,32], index: 12, kind: output, shape index: {0}]   ;;  %s3765_s13 = inlined_call_operand.vmem [shape: f32[8,4,1], index: 13, kind: output, shape index: {1}]  }
   0x1   :  { %v45_v0 = vld [vmem:[%s3755_s3] sm:$0xff]  ;;  %v46_v1 = vld [vmem:[%s3755_s3 + $0x8] sm:$0xff]  ;;  %2674 = vmatprep.subr.bf16.mxu0 %v2934_v3  ;;  %2677 = vmatprep.subr.bf16.mxu1 %v2934_v3  ;;  %v209_v15 = vld [vmem:[%s3756_s4 + $0x10] sm:$0xff] }
   0x2   :  { %v128_v2 = vld [vmem:[%s3759_s7] sm:$0xff]  ;;  %v2675_v4 = vpack.c.bf16 %v46_v1, %v45_v0  ;;  %v129_v5 = vld [vmem:[%s3759_s7 + $0x8] sm:$0xff]  ;;  %2488 = vmatprep.mubr.msk.f32.mxu0 %vm2935_vm0, %v2936_v8  ;;  %2495 = vmatprep.mubr.msk.f32.mxu1 %vm2935_vm0, %v2936_v8  ;;  %v210_v16 = vld [vmem:[%s3756_s4 + $0x18] sm:$0xff] }
   0x3   :  { %v207_v6 = vld [vmem:[%s3756_s4] sm:$0xff]  ;;  %v2678_v7 = vpack.c.bf16 %v129_v5, %v128_v2  ;;  %v208_v9 = vld [vmem:[%s3756_s4 + $0x8] sm:$0xff] }
   0x4   :  { %v212_v10 = vld [vmem:[%s3760_s8] sm:$0xff]  ;;  %v213_v11 = vld [vmem:[%s3760_s8 + $0x8] sm:$0xff]  ;;  %2676 = vmatpush3.bf16.msra.mxu0 %v2675_v4  ;;  %v3045_v13 = vpack.c.bf16 %v208_v9, %v207_v6 }
   0x5   :  { %v44_v12 = vld [vmem:[%s3752_s0] sm:$0xff]  ;;  %2679 = vmatpush3.bf16.msra.mxu1 %v2678_v7  ;;  %2680 = vmatprep.subr.bf16.mxu0 %v2934_v3  ;;  %v3048_v14 = vpack.c.bf16 %v213_v11, %v212_v10 }
   0x6   :  { %19 = vsyncpa [#allocation5], 0  ;;  %2686 = vmatprep.subr.bf16.mxu1 %v2934_v3  ;;  %v214_v17 = vld [vmem:[%s3760_s8 + $0x10] sm:$0xff]  ;;  %v215_v18 = vld [vmem:[%s3760_s8 + $0x18] sm:$0xff]  ;;  %v3064_v19 = vpack.c.bf16 %v210_v16, %v209_v15  ;;  %v306_v21 = vlaneseq  ;;  %v2937_v44 = vmov 0   ;;  %s2938_s3 = smov 64  }
   0x7   :  { %2489 = vmatmul.mubr.msk.f32.vlgmr.msra.gmra.mrb[0].mxu0 %vm54_vm1, %v44_v12  ;;  %v3068_v20 = vpack.c.bf16 %v215_v18, %v214_v17  ;;  %v2361_v23 = vld [vmem:[%s3757_s5] ss:$0 sm:$0xff]  ;;  %2785 = vset.pattern.permute.xlu1 %v2937_v44  ;;  %v3155_v17 = vld [vmem:[%s3753_s1 + $0x1c] sm:$0xf]  ;;  %s2939_s21 = smov 96   ;;  %vm232_vm6 = vcmask 261120  }
   0x8   :  { %2496 = vmatmul.mubr.msk.f32.vlgmr.msra.gmra.mrb[0].mxu1 %vm54_vm1, %v44_v12  ;;  %2682 = vmatpush3.bf16.msra.mxu0 %v3045_v13  ;;  %v307_v22 = vshrl.u32 %v306_v21, 7  ;;  %v2363_v24 = vld [vmem:[%s3761_s9] ss:$0 sm:$0xff]  ;;  %vm468_vm3 = vcmp.gt.f32.partialorder %v3155_v17, 0.0  ;;  %s2940_s5 = smov 32   ;;  %s2941_s8 = smov [#allocation4]  }
   0x9   :  { %2688 = vmatpush3.bf16.msra.mxu1 %v3048_v14  ;;  %2683 = vmatprep.subr.bf16.mxu0 %v2934_v3  ;;  %v3120_v48 = vld [vmem:[%s3758_s6] ss:$0 sm:$0xff]  ;;  %s2349_s14 = sshll.u32 %s2941_s8, 4  ;;  %s2350_s14 = int_to_ptr.vmem [resolvable:$true] %s2349_s14 }
   0xa   :  { %2689 = vmatprep.subr.bf16.mxu1 %v2934_v3  ;;  %2506 = vmatprep.mubr.msk.f32.mxu0 %vm2935_vm0, %v2936_v8  ;;  %v562_v25 = vsub.s32 1, %v307_v22  ;;  %v806_v26 = vsub.s32 2, %v307_v22  ;;  %v1050_v27 = vsub.s32 3, %v307_v22  ;;  %v1172_v32 = vsub.s32 4, %v307_v22  ;;  %v3138_v59 = vld [vmem:[%s3762_s10] ss:$0 sm:$0xff]  ;;  %p2915_p1 = scmp.lt.s32.totalorder %s2350_s14, %s2350_s14 }
   0xb   :  { %2517 = vmatprep.mubr.msk.f32.mxu1 %vm2935_vm0, %v2936_v8  ;;  %v684_v35 = vsub.s32 6, %v307_v22  ;;  %v928_v36 = vsub.s32 5, %v307_v22  ;;  %v440_v37 = vsub.s32 7, %v307_v22  ;;  %v308_v43 = vsub.s32 0, %v307_v22  ;;  %2784 = vset.pattern.permute.xlu0 %v2937_v44  ;;  %v3146_v9 = vld [vmem:[%s3753_s1] sm:$0xf] }
   0xc   :  { %2685 = vmatpush3.bf16.msra.mxu0 %v3064_v19  ;;  %vm3766_vm2 = vcmp.gt.f32.partialorder %v3146_v9, 0.0  ;;  %s2910_s15 = scalar_lea.vmem %s2350_s14, 64 }
   0xd   :  { %2691 = vmatpush3.bf16.msra.mxu1 %v3068_v20  ;;  %2692 = vmatprep.subr.bf16.mxu0 %v2934_v3  ;;  %v337_v11 = vsel %vm3766_vm2, 1, %v2937_v44  ;;  %p2911_p0 = scmp.ne.s32.totalorder %s2350_s14, %s2910_s15  ;;  %p2916_p2 = scmp.lt.s32.totalorder %s2910_s15, %s2910_s15 }
   0xe   :  { %2698 = vmatprep.subr.bf16.mxu1 %v2934_v3 }
   0xf   :  { %2507 = vmatmul.mubr.f32.vlgmr.msra.gmra.mrb[2].mxu0 %v2936_v8  ;;  %p2917_p3 = por %p2916_p2, %p2915_p1 }
  0x10   :  { %2518 = vmatmul.mubr.f32.vlgmr.msra.gmra.mrb[2].mxu1 %v2936_v8  ;;  %2694 = vmatpush3.bf16.msra.mxu0 %v3045_v13 }
  0x11   :  { %2695 = vmatprep.subr.bf16.mxu0 %v2934_v3  ;;  %2700 = vmatpush3.bf16.msra.mxu1 %v3048_v14  ;;  %p2918_p4 = pnand %p2917_p3, %p2911_p0 }
  0x12   :  { %2528 = vmatprep.mubr.msk.f32.mxu0 %vm2935_vm0, %v2936_v8  ;;  %2701 = vmatprep.subr.bf16.mxu1 %v2934_v3 }
  0x13   :  { %2539 = vmatprep.mubr.msk.f32.mxu1 %vm2935_vm0, %v2936_v8 }
  0x14   :  { %2697 = vmatpush3.bf16.msra.mxu0 %v3064_v19 }
  0x15   :  { %2703 = vmatpush3.bf16.msra.mxu1 %v3068_v20  ;;  %2704 = vmatprep.subr.bf16.mxu0 %v2934_v3 }
  0x16   :  { %2710 = vmatprep.subr.bf16.mxu1 %v2934_v3 }
  0xda   :  { %v124_v28 = vpop.f32.mrb[0].mxu0 }
  0xdb   :  { %v125_v29 = vadd.f32 %v2361_v23, %v124_v28  ;;  %v2490_v30 = vpop.f32.mrb[1].mxu0  ;;  %v203_v31 = vpop.f32.mrb[0].mxu1  ;;  %v469_v23 = vsel %vm468_vm3, 1, %v2937_v44 }
  0xdc   :  { %v204_v33 = vadd.f32 %v2363_v24, %v203_v31  ;;  %v2497_v34 = vpop.f32.mrb[1].mxu1 }
  0xdd   :  { %v3099_v38 = vrot.slane %v125_v29, %v562_v25  ;;  %v3101_v39 = vrot.slane %v125_v29, %v806_v26  ;;  %v3103_v40 = vrot.slane %v125_v29, %v1050_v27  ;;  %v3113_v46 = vrot.slane %v125_v29, %v1172_v32 }
  0xde   :  { %v3105_v41 = vrot.slane %v204_v33, %v684_v35  ;;  %v3107_v42 = vrot.slane %v204_v33, %v928_v36  ;;  %v3111_v45 = vrot.slane %v204_v33, %v1172_v32  ;;  %v3115_v47 = vrot.slane %v204_v33, %v1050_v27 }
  0xdf   :  { %v3122_v49 = vrot.slane %v125_v29, %v928_v36  ;;  %v3124_v50 = vrot.slane %v204_v33, %v806_v26  ;;  %v3126_v51 = vrot.slane %v125_v29, %v684_v35  ;;  %v3128_v52 = vrot.slane %v204_v33, %v562_v25 }
  0xe0   :  { %v3130_v53 = vrot.slane %v125_v29, %v440_v37  ;;  %v3132_v54 = vrot.slane %v204_v33, %v308_v43  ;;  %v309_v62 = vrot.slane %v125_v29, %v308_v43  ;;  %v441_v0 = vrot.slane %v204_v33, %v440_v37 }
  0xe2   :  { %v302_v55 = vpop.f32.mrb[2].mxu0 }
  0xe3   :  { %v303_v56 = vadd.f32 %v3120_v48, %v302_v55  ;;  %v434_v57 = vpop.f32.mrb[2].mxu1  ;;  %v2508_v58 = vpop.f32.mrb[3].mxu0 }
  0xe4   :  { %v2519_v60 = vpop.f32.mrb[3].mxu1  ;;  %v435_v61 = vadd.f32 %v3138_v59, %v434_v57 }
  0xe5   :  { %318 = vrot.lane.b32.xlu0 %v303_v56, %s2938_s3  ;;  %v310_v63 = vadd.f32 %v309_v62, %v303_v56 }
  0xe6   :  { %v442_v2 = vadd.f32 %v441_v0, %v435_v61 }
  0xe7   :  { %v2366_v1 = vmul.f32 -1.442695, %v310_v63 }
  0xe8   :  { %v2369_v4 = vmul.f32 -1.442695, %v442_v2 }
  0xe9   :  { %450 = vrot.lane.b32.xlu0 %v435_v61, %s2938_s3  ;;  %2786 = vpow2.f32 %v2366_v1 }
  0xea   :  { %2788 = vpow2.f32 %v2369_v4 }
  0xed   :  { %339 = vperm.xlu0 %2784, %v337_v11  }
  0xf3   :  { %v2787_v5 = vpop.eup %2786 }
  0xf4   :  { %v314_v6 = vadd.f32 1.0, %v2787_v5  ;;  %v2789_v7 = vpop.eup %2788 }
  0xf5   :  { %v446_v10 = vadd.f32 1.0, %v2789_v7 }
  0xf6   :  { %2790 = vrcp.f32 %v314_v6 }
  0xf7   :  { %2792 = vrcp.f32 %v446_v10 }
 0x100   :  { %v2791_v12 = vpop.eup %2790 }
 0x101   :  { %v2793_v18 = vpop.eup %2792  ;;  %v328_v32 = vsub.f32 1.0, %v2791_v12  ;;  %v334_v34 = vmul.f32 0.0, %v2791_v12 }
 0x102   :  { %v460_v37 = vsub.f32 1.0, %v2793_v18  ;;  %v466_v55 = vmul.f32 0.0, %v2793_v18 }
 0x157   :  { %v319_v15 = vpop.permute.xlu0 %318 }
 0x158   :  { %v321_v16 = vmul.f32 %v2791_v12, %v319_v15 }
 0x15a   :  { %323 = vrot.lane.b32.xlu1 %v321_v16, %s2938_s3 }
 0x15b   :  { %v451_v21 = vpop.permute.xlu0 %450 }
 0x15c   :  { %v453_v22 = vmul.f32 %v2793_v18, %v451_v21  ;;  %v3206_v21 = vld [vmem:[%s3753_s1 + $0x4] sm:$0xf] }
 0x15d   :  { %vm590_vm7 = vcmp.gt.f32.partialorder %v3206_v21, 0.0 }
 0x15e   :  { %455 = vrot.lane.b32.xlu1 %v453_v22, %s2938_s3 }
 0x162   :  { %471 = vperm.xlu1 %2785, %v469_v23  }
 0x16c   :  { %v3167_v31 = vpop.permute.xlu0 %339 }
 0x16d   :  { %vm341_vm4 = vcmp.eq.s32.totalorder %v3167_v31, 1 }
 0x1cc   :  { %v324_v24 = vpop.permute.xlu1 %323 }
 0x1cd   :  { %v326_v25 = vadd.f32 %v324_v24, %v309_v62 }
 0x1cf   :  { %2794 = vtanh.f32 %v326_v25  ;;  %v3212_v25 = vld [vmem:[%s3753_s1 + $0x18] sm:$0xf] }
 0x1d0   :  { %v456_v26 = vpop.permute.xlu1 %455  ;;  %vm712_vm8 = vcmp.gt.f32.partialorder %v3212_v25, 0.0 }
 0x1d1   :  { %v458_v27 = vadd.f32 %v456_v26, %v441_v0 }
 0x1d3   :  { %2796 = vtanh.f32 %v458_v27 }
 0x1d9   :  { %v2795_v28 = vpop.eup %2794 }
 0x1da   :  { %330 = vrot.lane.b32.xlu1 %v2795_v28, %s2939_s21  ;;  %v591_v28 = vsel %vm590_vm7, 1, %v2937_v44 }
 0x1dd   :  { %v2797_v29 = vpop.eup %2796 }
 0x1de   :  { %462 = vrot.lane.b32.xlu0 %v2797_v29, %s2939_s21 }
 0x1e1   :  { %v3165_v30 = vpop.permute.xlu1 %471 }
 0x1e2   :  { %vm473_vm5 = vcmp.eq.s32.totalorder %v3165_v30, 1 }
 0x24c   :  { %v331_v33 = vpop.permute.xlu1 %330 }
 0x24d   :  { %v333_v35 = vmul.f32 %v331_v33, %v328_v32  ;;  %v713_v32 = vsel %vm712_vm8, 1, %v2937_v44 }
 0x24f   :  { %v335_v36 = vadd.f32 %v334_v34, %v333_v35 }
 0x250   :  { %v463_v43 = vpop.permute.xlu0 %462 }
 0x251   :  { %v465_v56 = vmul.f32 %v463_v43, %v460_v37  ;;  %v3172_v57 = vsel %vm341_vm4, %v335_v36, 0.0 }
 0x252   :  { %486 = vrot.lane.b32.xlu1 %v3172_v57, %s2939_s21 }
 0x253   :  { %v467_v58 = vadd.f32 %v466_v55, %v465_v56 }
 0x255   :  { %v3179_v60 = vsel %vm473_vm5, %v467_v58, 0.0 }
 0x256   :  { %608 = vrot.lane.b32.xlu0 %v3179_v60, %s2939_s21 }
 0x2c4   :  { %v487_v61 = vpop.permute.xlu1 %486 }
 0x2c5   :  { %2529 = vmatmul.mubr.msk.f32.vlgmr.msra.gmra.mrb[4].mxu0 %vm232_vm6, %v487_v61 }
 0x2c6   :  { %2706 = vmatpush3.bf16.msra.mxu0 %v3045_v13  ;;  %2550 = vmatprep.mubr.msk.f32.mxu0 %vm2935_vm0, %v2936_v8 }
 0x2c7   :  { %2707 = vmatprep.subr.bf16.mxu0 %v2934_v3 }
 0x2c8   :  { %v609_v62 = vpop.permute.xlu0 %608 }
 0x2c9   :  { %2540 = vmatmul.mubr.msk.f32.vlgmr.msra.gmra.mrb[4].mxu1 %vm232_vm6, %v609_v62 }
 0x2ca   :  { %2709 = vmatpush3.bf16.msra.mxu0 %v3064_v19  ;;  %2712 = vmatpush3.bf16.msra.mxu1 %v3048_v14 }
 0x2cb   :  { %2713 = vmatprep.subr.bf16.mxu1 %v2934_v3  ;;  %2561 = vmatprep.mubr.msk.f32.mxu1 %vm2935_vm0, %v2936_v8 }
 0x2cc   :  { %2716 = vmatprep.subr.bf16.mxu0 %v2934_v3 }
 0x2ce   :  { %2715 = vmatpush3.bf16.msra.mxu1 %v3068_v20 }
 0x2cf   :  { %2722 = vmatprep.subr.bf16.mxu1 %v2934_v3 }
 0x398   :  { %v556_v63 = vpop.f32.mrb[4].mxu0 }
 0x399   :  { %v557_v0 = vadd.f32 %v3120_v48, %v556_v63  ;;  %v2530_v1 = vpop.f32.mrb[5].mxu0 }
 0x39b   :  { %572 = vrot.lane.b32.xlu1 %v557_v0, %s2938_s3  ;;  %v564_v6 = vadd.f32 %v3099_v38, %v557_v0 }
 0x39c   :  { %v678_v2 = vpop.f32.mrb[4].mxu1 }
 0x39d   :  { %v679_v4 = vadd.f32 %v3138_v59, %v678_v2  ;;  %v2541_v5 = vpop.f32.mrb[5].mxu1  ;;  %v2371_v7 = vmul.f32 -1.442695, %v564_v6 }
 0x39f   :  { %694 = vrot.lane.b32.xlu0 %v679_v4, %s2938_s3  ;;  %v686_v10 = vadd.f32 %v3105_v41, %v679_v4  ;;  %2798 = vpow2.f32 %v2371_v7 }
 0x3a1   :  { %v2373_v11 = vmul.f32 -1.442695, %v686_v10 }
 0x3a3   :  { %2800 = vpow2.f32 %v2373_v11 }
 0x3a9   :  { %v2799_v12 = vpop.eup %2798 }
 0x3aa   :  { %v568_v15 = vadd.f32 1.0, %v2799_v12 }
 0x3ac   :  { %2802 = vrcp.f32 %v568_v15 }
 0x3ad   :  { %v2801_v16 = vpop.eup %2800 }
 0x3ae   :  { %v690_v18 = vadd.f32 1.0, %v2801_v16 }
 0x3b0   :  { %2804 = vrcp.f32 %v690_v18 }
 0x3b6   :  { %v2803_v22 = vpop.eup %2802 }
 0x3b7   :  { %v582_v56 = vsub.f32 1.0, %v2803_v22  ;;  %v588_v62 = vmul.f32 %v2803_v22, %v3172_v57 }
 0x3ba   :  { %v2805_v26 = vpop.eup %2804 }
 0x3bb   :  { %v704_v0 = vsub.f32 1.0, %v2805_v26  ;;  %v710_v1 = vmul.f32 %v2805_v26, %v3179_v60 }
 0x40d   :  { %v573_v23 = vpop.permute.xlu1 %572 }
 0x40e   :  { %v575_v24 = vmul.f32 %v2803_v22, %v573_v23 }
 0x410   :  { %577 = vrot.lane.b32.xlu1 %v575_v24, %s2938_s3 }
 0x411   :  { %v695_v27 = vpop.permute.xlu0 %694 }
 0x412   :  { %v697_v29 = vmul.f32 %v2805_v26, %v695_v27 }
 0x414   :  { %699 = vrot.lane.b32.xlu0 %v697_v29, %s2938_s3  ;;  %593 = vperm.xlu1 %2785, %v591_v28  }
 0x418   :  { %715 = vperm.xlu0 %2784, %v713_v32  }
 0x482   :  { %v578_v33 = vpop.permute.xlu1 %577 }
 0x483   :  { %v580_v34 = vadd.f32 %v578_v33, %v3099_v38 }
 0x485   :  { %2806 = vtanh.f32 %v580_v34  ;;  %v3272_v34 = vld [vmem:[%s3753_s1 + $0x8] sm:$0xf] }
 0x486   :  { %v700_v35 = vpop.permute.xlu0 %699  ;;  %vm834_vm11 = vcmp.gt.f32.partialorder %v3272_v34, 0.0 }
 0x487   :  { %v702_v36 = vadd.f32 %v700_v35, %v3105_v41 }
 0x489   :  { %2808 = vtanh.f32 %v702_v36 }
 0x48f   :  { %v2807_v37 = vpop.eup %2806 }
 0x490   :  { %584 = vrot.lane.b32.xlu1 %v2807_v37, %s2939_s21 }
 0x493   :  { %v2809_v43 = vpop.eup %2808  ;;  %v3227_v55 = vpop.permute.xlu1 %593 }
 0x494   :  { %706 = vrot.lane.b32.xlu0 %v2809_v43, %s2939_s21  ;;  %vm595_vm9 = vcmp.eq.s32.totalorder %v3227_v55, 1  ;;  %v3278_v43 = vld [vmem:[%s3753_s1 + $0x14] sm:$0xf] }
 0x495   :  { %vm3767_vm12 = vcmp.gt.f32.partialorder %v3278_v43, 0.0 }
 0x497   :  { %v3229_v58 = vpop.permute.xlu0 %715 }
 0x498   :  { %vm717_vm10 = vcmp.eq.s32.totalorder %v3229_v58, 1 }
 0x502   :  { %v585_v61 = vpop.permute.xlu1 %584 }
 0x503   :  { %v587_v38 = vmul.f32 %v585_v61, %v582_v56 }
 0x505   :  { %v589_v63 = vadd.f32 %v588_v62, %v587_v38  ;;  %v835_v62 = vsel %vm834_vm11, 1, %v2937_v44 }
 0x506   :  { %v707_v41 = vpop.permute.xlu0 %706 }
 0x507   :  { %v709_v2 = vmul.f32 %v707_v41, %v704_v0  ;;  %v3237_v4 = vsel %vm595_vm9, %v589_v63, %v3172_v57  ;;  %v957_v63 = vsel %vm3767_vm12, 1, %v2937_v44 }
 0x508   :  { %730 = vrot.lane.b32.xlu1 %v3237_v4, %s2939_s21 }
 0x509   :  { %v711_v5 = vadd.f32 %v710_v1, %v709_v2 }
 0x50b   :  { %v3245_v6 = vsel %vm717_vm10, %v711_v5, %v3179_v60 }
 0x50c   :  { %852 = vrot.lane.b32.xlu0 %v3245_v6, %s2939_s21 }
 0x57a   :  { %v731_v7 = vpop.permute.xlu1 %730 }
 0x57b   :  { %2551 = vmatmul.mubr.msk.f32.vlgmr.msra.gmra.mrb[6].mxu0 %vm232_vm6, %v731_v7 }
 0x57c   :  { %2718 = vmatpush3.bf16.msra.mxu0 %v3045_v13  ;;  %2572 = vmatprep.mubr.msk.f32.mxu0 %vm2935_vm0, %v2936_v8 }
 0x57d   :  { %2719 = vmatprep.subr.bf16.mxu0 %v2934_v3 }
 0x57e   :  { %v853_v10 = vpop.permute.xlu0 %852 }
 0x57f   :  { %2562 = vmatmul.mubr.msk.f32.vlgmr.msra.gmra.mrb[6].mxu1 %vm232_vm6, %v853_v10 }
 0x580   :  { %2721 = vmatpush3.bf16.msra.mxu0 %v3064_v19  ;;  %2724 = vmatpush3.bf16.msra.mxu1 %v3048_v14 }
 0x581   :  { %2725 = vmatprep.subr.bf16.mxu1 %v2934_v3  ;;  %2583 = vmatprep.mubr.msk.f32.mxu1 %vm2935_vm0, %v2936_v8 }
 0x582   :  { %2728 = vmatprep.subr.bf16.mxu0 %v2934_v3 }
 0x584   :  { %2727 = vmatpush3.bf16.msra.mxu1 %v3068_v20 }
 0x585   :  { %2734 = vmatprep.subr.bf16.mxu1 %v2934_v3 }
 0x64e   :  { %v800_v11 = vpop.f32.mrb[6].mxu0 }
 0x64f   :  { %v801_v12 = vadd.f32 %v3120_v48, %v800_v11  ;;  %v2552_v15 = vpop.f32.mrb[7].mxu0 }
 0x651   :  { %816 = vrot.lane.b32.xlu1 %v801_v12, %s2938_s3  ;;  %v808_v23 = vadd.f32 %v3101_v39, %v801_v12 }
 0x652   :  { %v922_v16 = vpop.f32.mrb[6].mxu1 }
 0x653   :  { %v923_v18 = vadd.f32 %v3138_v59, %v922_v16  ;;  %v2563_v22 = vpop.f32.mrb[7].mxu1  ;;  %v2375_v24 = vmul.f32 -1.442695, %v808_v23 }
 0x655   :  { %938 = vrot.lane.b32.xlu0 %v923_v18, %s2938_s3  ;;  %v930_v26 = vadd.f32 %v3107_v42, %v923_v18  ;;  %2810 = vpow2.f32 %v2375_v24 }
 0x657   :  { %v2377_v27 = vmul.f32 -1.442695, %v930_v26 }
 0x659   :  { %2812 = vpow2.f32 %v2377_v27 }
 0x65f   :  { %v2811_v28 = vpop.eup %2810 }
 0x660   :  { %v812_v29 = vadd.f32 1.0, %v2811_v28 }
 0x662   :  { %2814 = vrcp.f32 %v812_v29 }
 0x663   :  { %v2813_v32 = vpop.eup %2812 }
 0x664   :  { %v934_v33 = vadd.f32 1.0, %v2813_v32 }
 0x666   :  { %2816 = vrcp.f32 %v934_v33 }
 0x66c   :  { %v2815_v35 = vpop.eup %2814 }
 0x66d   :  { %v826_v11 = vsub.f32 1.0, %v2815_v35  ;;  %v832_v16 = vmul.f32 %v2815_v35, %v3237_v4 }
 0x670   :  { %v2817_v56 = vpop.eup %2816 }
 0x671   :  { %v948_v22 = vsub.f32 1.0, %v2817_v56  ;;  %v954_v23 = vmul.f32 %v2817_v56, %v3245_v6 }
 0x6c3   :  { %v817_v36 = vpop.permute.xlu1 %816 }
 0x6c4   :  { %v819_v37 = vmul.f32 %v2815_v35, %v817_v36 }
 0x6c6   :  { %821 = vrot.lane.b32.xlu1 %v819_v37, %s2938_s3 }
 0x6c7   :  { %v939_v61 = vpop.permute.xlu0 %938 }
 0x6c8   :  { %v941_v38 = vmul.f32 %v2817_v56, %v939_v61 }
 0x6ca   :  { %943 = vrot.lane.b32.xlu0 %v941_v38, %s2938_s3  ;;  %837 = vperm.xlu1 %2785, %v835_v62  }
 0x6ce   :  { %959 = vperm.xlu0 %2784, %v957_v63  }
 0x738   :  { %v822_v0 = vpop.permute.xlu1 %821 }
 0x739   :  { %v824_v41 = vadd.f32 %v822_v0, %v3101_v39 }
 0x73b   :  { %2818 = vtanh.f32 %v824_v41 }
 0x73c   :  { %v944_v1 = vpop.permute.xlu0 %943 }
 0x73d   :  { %v946_v2 = vadd.f32 %v944_v1, %v3107_v42 }
 0x73f   :  { %2820 = vtanh.f32 %v946_v2 }
 0x745   :  { %v2819_v5 = vpop.eup %2818 }
 0x746   :  { %828 = vrot.lane.b32.xlu1 %v2819_v5, %s2939_s21 }
 0x749   :  { %v2821_v7 = vpop.eup %2820  ;;  %v3293_v10 = vpop.permute.xlu1 %837 }
 0x74a   :  { %950 = vrot.lane.b32.xlu0 %v2821_v7, %s2939_s21  ;;  %vm839_vm13 = vcmp.eq.s32.totalorder %v3293_v10, 1  ;;  %v3338_v7 = vld [vmem:[%s3753_s1 + $0xc] sm:$0xf] }
 0x74b   :  { %vm1078_vm15 = vcmp.gt.f32.partialorder %v3338_v7, 0.0 }
 0x74d   :  { %v3295_v12 = vpop.permute.xlu0 %959 }
 0x74e   :  { %vm961_vm14 = vcmp.eq.s32.totalorder %v3295_v12, 1 }
 0x7b8   :  { %v829_v15 = vpop.permute.xlu1 %828 }
 0x7b9   :  { %v831_v39 = vmul.f32 %v829_v15, %v826_v11 }
 0x7bb   :  { %v833_v18 = vadd.f32 %v832_v16, %v831_v39  ;;  %v3344_v39 = vld [vmem:[%s3753_s1 + $0x10] sm:$0xf] }
 0x7bc   :  { %v951_v42 = vpop.permute.xlu0 %950  ;;  %vm1200_vm1 = vcmp.gt.f32.partialorder %v3344_v39, 0.0 }
 0x7bd   :  { %v953_v24 = vmul.f32 %v951_v42, %v948_v22  ;;  %v3303_v26 = vsel %vm839_vm13, %v833_v18, %v3237_v4  ;;  %v1079_v42 = vsel %vm1078_vm15, 1, %v2937_v44 }
 0x7be   :  { %974 = vrot.lane.b32.xlu1 %v3303_v26, %s2939_s21 }
 0x7bf   :  { %v955_v27 = vadd.f32 %v954_v23, %v953_v24  ;;  %v1201_v24 = vsel %vm1200_vm1, 1, %v2937_v44 }
 0x7c1   :  { %v3311_v28 = vsel %vm961_vm14, %v955_v27, %v3245_v6 }
 0x7c2   :  { %1096 = vrot.lane.b32.xlu0 %v3311_v28, %s2939_s21 }
 0x830   :  { %v975_v29 = vpop.permute.xlu1 %974 }
 0x831   :  { %2573 = vmatmul.mubr.msk.f32.vlgmr.msra.gmra.mrb[8].mxu0 %vm232_vm6, %v975_v29 }
 0x832   :  { %2730 = vmatpush3.bf16.msra.mxu0 %v3045_v13  ;;  %2594 = vmatprep.mubr.msk.f32.mxu0 %vm2935_vm0, %v2936_v8 }
 0x833   :  { %2731 = vmatprep.subr.bf16.mxu0 %v2934_v3 }
 0x834   :  { %v1097_v32 = vpop.permute.xlu0 %1096 }
 0x835   :  { %2584 = vmatmul.mubr.msk.f32.vlgmr.msra.gmra.mrb[8].mxu1 %vm232_vm6, %v1097_v32 }
 0x836   :  { %2733 = vmatpush3.bf16.msra.mxu0 %v3064_v19  ;;  %2736 = vmatpush3.bf16.msra.mxu1 %v3048_v14 }
 0x837   :  { %2737 = vmatprep.subr.bf16.mxu1 %v2934_v3  ;;  %2605 = vmatprep.mubr.msk.f32.mxu1 %vm2935_vm0, %v2936_v8 }
 0x838   :  { %2740 = vmatprep.subr.bf16.mxu0 %v2934_v3 }
 0x83a   :  { %2739 = vmatpush3.bf16.msra.mxu1 %v3068_v20 }
 0x83b   :  { %2746 = vmatprep.subr.bf16.mxu1 %v2934_v3 }
 0x904   :  { %v1044_v33 = vpop.f32.mrb[8].mxu0 }
 0x905   :  { %v1045_v35 = vadd.f32 %v3120_v48, %v1044_v33  ;;  %v2574_v36 = vpop.f32.mrb[9].mxu0 }
 0x907   :  { %1060 = vrot.lane.b32.xlu1 %v1045_v35, %s2938_s3  ;;  %v1052_v62 = vadd.f32 %v3103_v40, %v1045_v35 }
 0x908   :  { %v1166_v37 = vpop.f32.mrb[8].mxu1 }
 0x909   :  { %v1167_v56 = vadd.f32 %v3138_v59, %v1166_v37  ;;  %v2585_v61 = vpop.f32.mrb[9].mxu1  ;;  %v2379_v38 = vmul.f32 -1.442695, %v1052_v62 }
 0x90b   :  { %1182 = vrot.lane.b32.xlu0 %v1167_v56, %s2938_s3  ;;  %v1174_v63 = vadd.f32 %v3111_v45, %v1167_v56  ;;  %2822 = vpow2.f32 %v2379_v38 }
 0x90d   :  { %v2381_v0 = vmul.f32 -1.442695, %v1174_v63 }
 0x90f   :  { %2824 = vpow2.f32 %v2381_v0 }
 0x915   :  { %v2823_v41 = vpop.eup %2822 }
 0x916   :  { %v1056_v1 = vadd.f32 1.0, %v2823_v41 }
 0x918   :  { %2826 = vrcp.f32 %v1056_v1 }
 0x919   :  { %v2825_v2 = vpop.eup %2824 }
 0x91a   :  { %v1178_v5 = vadd.f32 1.0, %v2825_v2 }
 0x91c   :  { %2828 = vrcp.f32 %v1178_v5 }
 0x922   :  { %v2827_v11 = vpop.eup %2826 }
 0x923   :  { %v1070_v56 = vsub.f32 1.0, %v2827_v11  ;;  %v1076_v62 = vmul.f32 %v2827_v11, %v3303_v26 }
 0x926   :  { %v2829_v18 = vpop.eup %2828 }
 0x927   :  { %v1192_v63 = vsub.f32 1.0, %v2829_v18  ;;  %v1198_v0 = vmul.f32 %v2829_v18, %v3311_v28 }
 0x979   :  { %v1061_v15 = vpop.permute.xlu1 %1060 }
 0x97a   :  { %v1063_v16 = vmul.f32 %v2827_v11, %v1061_v15 }
 0x97c   :  { %1065 = vrot.lane.b32.xlu1 %v1063_v16, %s2938_s3 }
 0x97d   :  { %v1183_v22 = vpop.permute.xlu0 %1182 }
 0x97e   :  { %v1185_v23 = vmul.f32 %v2829_v18, %v1183_v22 }
 0x980   :  { %1187 = vrot.lane.b32.xlu0 %v1185_v23, %s2938_s3  ;;  %1081 = vperm.xlu1 %2785, %v1079_v42  }
 0x984   :  { %1203 = vperm.xlu0 %2784, %v1201_v24  }
 0x9ee   :  { %v1066_v27 = vpop.permute.xlu1 %1065 }
 0x9ef   :  { %v1068_v29 = vadd.f32 %v1066_v27, %v3103_v40 }
 0x9f1   :  { %2830 = vtanh.f32 %v1068_v29 }
 0x9f2   :  { %v1188_v32 = vpop.permute.xlu0 %1187 }
 0x9f3   :  { %v1190_v33 = vadd.f32 %v1188_v32, %v3111_v45 }
 0x9f5   :  { %2832 = vtanh.f32 %v1190_v33 }
 0x9fb   :  { %v2831_v35 = vpop.eup %2830 }
 0x9fc   :  { %1072 = vrot.lane.b32.xlu1 %v2831_v35, %s2939_s21 }
 0x9ff   :  { %v2833_v36 = vpop.eup %2832  ;;  %v3359_v37 = vpop.permute.xlu1 %1081 }
 0xa00   :  { %1194 = vrot.lane.b32.xlu0 %v2833_v36, %s2939_s21  ;;  %vm1083_vm2 = vcmp.eq.s32.totalorder %v3359_v37, 1 }
 0xa03   :  { %v3361_v61 = vpop.permute.xlu0 %1203 }
 0xa04   :  { %vm1205_vm12 = vcmp.eq.s32.totalorder %v3361_v61, 1 }
 0xa6e   :  { %v1073_v44 = vpop.permute.xlu1 %1072 }
 0xa6f   :  { %v1075_v40 = vmul.f32 %v1073_v44, %v1070_v56 }
 0xa71   :  { %v1077_v38 = vadd.f32 %v1076_v62, %v1075_v40 }
 0xa72   :  { %v1195_v45 = vpop.permute.xlu0 %1194 }
 0xa73   :  { %v1197_v41 = vmul.f32 %v1195_v45, %v1192_v63  ;;  %v3369_v1 = vsel %vm1083_vm2, %v1077_v38, %v3303_v26 }
 0xa74   :  { %1218 = vrot.lane.b32.xlu1 %v3369_v1, %s2939_s21 }
 0xa75   :  { %v1199_v2 = vadd.f32 %v1198_v0, %v1197_v41 }
 0xa77   :  { %v3377_v5 = vsel %vm1205_vm12, %v1199_v2, %v3311_v28 }
 0xa78   :  { %1334 = vrot.lane.b32.xlu0 %v3377_v5, %s2939_s21 }
 0xae6   :  { %v1219_v11 = vpop.permute.xlu1 %1218 }
 0xae7   :  { %2595 = vmatmul.mubr.msk.f32.vlgmr.msra.gmra.mrb[10].mxu0 %vm232_vm6, %v1219_v11 }
 0xae8   :  { %2742 = vmatpush3.bf16.msra.mxu0 %v3045_v13  ;;  %2616 = vmatprep.mubr.msk.f32.mxu0 %vm2935_vm0, %v2936_v8 }
 0xae9   :  { %2743 = vmatprep.subr.bf16.mxu0 %v2934_v3 }
 0xaea   :  { %v1335_v15 = vpop.permute.xlu0 %1334 }
 0xaeb   :  { %2606 = vmatmul.mubr.msk.f32.vlgmr.msra.gmra.mrb[10].mxu1 %vm232_vm6, %v1335_v15 }
 0xaec   :  { %2745 = vmatpush3.bf16.msra.mxu0 %v3064_v19  ;;  %2748 = vmatpush3.bf16.msra.mxu1 %v3048_v14 }
 0xaed   :  { %2749 = vmatprep.subr.bf16.mxu1 %v2934_v3  ;;  %2627 = vmatprep.mubr.msk.f32.mxu1 %vm2935_vm0, %v2936_v8 }
 0xaee   :  { %2752 = vmatprep.subr.bf16.mxu0 %v2934_v3 }
 0xaf0   :  { %2751 = vmatpush3.bf16.msra.mxu1 %v3068_v20 }
 0xaf1   :  { %2758 = vmatprep.subr.bf16.mxu1 %v2934_v3 }
 0xbba   :  { %v1288_v16 = vpop.f32.mrb[10].mxu0 }
 0xbbb   :  { %v1289_v18 = vadd.f32 %v3120_v48, %v1288_v16  ;;  %v2596_v22 = vpop.f32.mrb[11].mxu0 }
 0xbbd   :  { %1304 = vrot.lane.b32.xlu1 %v1289_v18, %s2938_s3  ;;  %v1296_v27 = vadd.f32 %v3113_v46, %v1289_v18 }
 0xbbe   :  { %v1404_v42 = vpop.f32.mrb[10].mxu1 }
 0xbbf   :  { %v1405_v23 = vadd.f32 %v3138_v59, %v1404_v42  ;;  %v2607_v24 = vpop.f32.mrb[11].mxu1  ;;  %v2383_v29 = vmul.f32 -1.442695, %v1296_v27 }
 0xbc1   :  { %1420 = vrot.lane.b32.xlu0 %v1405_v23, %s2938_s3  ;;  %v1412_v32 = vadd.f32 %v3115_v47, %v1405_v23  ;;  %2834 = vpow2.f32 %v2383_v29 }
 0xbc3   :  { %v2385_v33 = vmul.f32 -1.442695, %v1412_v32 }
 0xbc5   :  { %2836 = vpow2.f32 %v2385_v33 }
 0xbcb   :  { %v2835_v35 = vpop.eup %2834 }
 0xbcc   :  { %v1300_v36 = vadd.f32 1.0, %v2835_v35 }
 0xbce   :  { %2838 = vrcp.f32 %v1300_v36 }
 0xbcf   :  { %v2837_v56 = vpop.eup %2836 }
 0xbd0   :  { %v1416_v44 = vadd.f32 1.0, %v2837_v56 }
 0xbd2   :  { %2840 = vrcp.f32 %v1416_v44 }
 0xbd8   :  { %v2839_v62 = vpop.eup %2838 }
 0xbd9   :  { %v1314_v22 = vsub.f32 1.0, %v2839_v62  ;;  %v1320_v23 = vmul.f32 %v2839_v62, %v3369_v1 }
 0xbdc   :  { %v2841_v63 = vpop.eup %2840 }
 0xbdd   :  { %v1430_v29 = vsub.f32 1.0, %v2841_v63 }
 0xc2f   :  { %v1305_v40 = vpop.permute.xlu1 %1304 }
 0xc30   :  { %v1307_v38 = vmul.f32 %v2839_v62, %v1305_v40 }
 0xc32   :  { %1309 = vrot.lane.b32.xlu1 %v1307_v38, %s2938_s3 }
 0xc33   :  { %v1421_v45 = vpop.permute.xlu0 %1420 }
 0xc34   :  { %v1423_v0 = vmul.f32 %v2841_v63, %v1421_v45 }
 0xc36   :  { %1425 = vrot.lane.b32.xlu0 %v1423_v0, %s2938_s3 }
 0xca4   :  { %v1310_v41 = vpop.permute.xlu1 %1309 }
 0xca5   :  { %v1312_v2 = vadd.f32 %v1310_v41, %v3113_v46  ;;  %v1436_v46 = vmul.f32 %v2841_v63, %v3377_v5 }
 0xca7   :  { %2842 = vtanh.f32 %v1312_v2 }
 0xca8   :  { %v1426_v11 = vpop.permute.xlu0 %1425 }
 0xca9   :  { %v1428_v15 = vadd.f32 %v1426_v11, %v3115_v47 }
 0xcab   :  { %2844 = vtanh.f32 %v1428_v15 }
 0xcb1   :  { %v2843_v16 = vpop.eup %2842 }
 0xcb2   :  { %1316 = vrot.lane.b32.xlu1 %v2843_v16, %s2939_s21 }
 0xcb5   :  { %v2845_v18 = vpop.eup %2844 }
 0xcb6   :  { %1432 = vrot.lane.b32.xlu0 %v2845_v18, %s2939_s21 }
 0xd24   :  { %v1317_v42 = vpop.permute.xlu1 %1316 }
 0xd25   :  { %v1319_v24 = vmul.f32 %v1317_v42, %v1314_v22 }
 0xd27   :  { %v1321_v27 = vadd.f32 %v1320_v23, %v1319_v24 }
 0xd28   :  { %v1433_v32 = vpop.permute.xlu0 %1432 }
 0xd29   :  { %v1435_v33 = vmul.f32 %v1433_v32, %v1430_v29  ;;  %v3412_v47 = vsel %vm1205_vm12, %v1321_v27, %v3369_v1 }
 0xd2a   :  { %1450 = vrot.lane.b32.xlu1 %v3412_v47, %s2939_s21 }
 0xd2b   :  { %v1437_v35 = vadd.f32 %v1436_v46, %v1435_v33 }
 0xd2d   :  { %v3419_v36 = vsel %vm1083_vm2, %v1437_v35, %v3377_v5  ;;  %vm360_vm2 = vcmask 3072  }
 0xd2e   :  { %1566 = vrot.lane.b32.xlu0 %v3419_v36, %s2939_s21 }
 0xd9c   :  { %v1451_v56 = vpop.permute.xlu1 %1450 }
 0xd9d   :  { %2617 = vmatmul.mubr.msk.f32.vlgmr.msra.gmra.mrb[12].mxu0 %vm232_vm6, %v1451_v56 }
 0xd9e   :  { %2754 = vmatpush3.bf16.msra.mxu0 %v3045_v13  ;;  %2638 = vmatprep.mubr.msk.f32.mxu0 %vm2935_vm0, %v2936_v8 }
 0xd9f   :  { %2755 = vmatprep.subr.bf16.mxu0 %v2934_v3 }
 0xda0   :  { %v1567_v61 = vpop.permute.xlu0 %1566 }
 0xda1   :  { %2628 = vmatmul.mubr.msk.f32.vlgmr.msra.gmra.mrb[12].mxu1 %vm232_vm6, %v1567_v61 }
 0xda2   :  { %2757 = vmatpush3.bf16.msra.mxu0 %v3064_v19  ;;  %2760 = vmatpush3.bf16.msra.mxu1 %v3048_v14 }
 0xda3   :  { %2761 = vmatprep.subr.bf16.mxu1 %v2934_v3  ;;  %2649 = vmatprep.mubr.msk.f32.mxu1 %vm2935_vm0, %v2936_v8 }
 0xda4   :  { %2764 = vmatprep.subr.bf16.mxu0 %v2934_v3 }
 0xda6   :  { %2763 = vmatpush3.bf16.msra.mxu1 %v3068_v20 }
 0xda7   :  { %2770 = vmatprep.subr.bf16.mxu1 %v2934_v3 }
 0xe70   :  { %v1520_v37 = vpop.f32.mrb[12].mxu0 }
 0xe71   :  { %v1521_v44 = vadd.f32 %v3120_v48, %v1520_v37  ;;  %v2618_v62 = vpop.f32.mrb[13].mxu0 }
 0xe73   :  { %1536 = vrot.lane.b32.xlu1 %v1521_v44, %s2938_s3  ;;  %v1528_v45 = vadd.f32 %v3122_v49, %v1521_v44 }
 0xe74   :  { %v1636_v40 = vpop.f32.mrb[12].mxu1 }
 0xe75   :  { %v1637_v38 = vadd.f32 %v3138_v59, %v1636_v40  ;;  %v2629_v63 = vpop.f32.mrb[13].mxu1  ;;  %v2387_v0 = vmul.f32 -1.442695, %v1528_v45 }
 0xe77   :  { %1652 = vrot.lane.b32.xlu0 %v1637_v38, %s2938_s3  ;;  %v1644_v41 = vadd.f32 %v3124_v50, %v1637_v38  ;;  %2846 = vpow2.f32 %v2387_v0 }
 0xe79   :  { %v2389_v2 = vmul.f32 -1.442695, %v1644_v41 }
 0xe7b   :  { %2848 = vpow2.f32 %v2389_v2 }
 0xe81   :  { %v2847_v11 = vpop.eup %2846 }
 0xe82   :  { %v1532_v15 = vadd.f32 1.0, %v2847_v11 }
 0xe84   :  { %2850 = vrcp.f32 %v1532_v15 }
 0xe85   :  { %v2849_v16 = vpop.eup %2848 }
 0xe86   :  { %v1648_v18 = vadd.f32 1.0, %v2849_v16 }
 0xe88   :  { %2852 = vrcp.f32 %v1648_v18 }
 0xe8e   :  { %v2851_v22 = vpop.eup %2850 }
 0xe8f   :  { %v1546_v37 = vsub.f32 1.0, %v2851_v22  ;;  %v1552_v62 = vmul.f32 %v2851_v22, %v3412_v47 }
 0xe92   :  { %v2853_v24 = vpop.eup %2852 }
 0xe93   :  { %v1662_v63 = vsub.f32 1.0, %v2853_v24 }
 0xee5   :  { %v1537_v42 = vpop.permute.xlu1 %1536 }
 0xee6   :  { %v1539_v23 = vmul.f32 %v2851_v22, %v1537_v42 }
 0xee8   :  { %1541 = vrot.lane.b32.xlu1 %v1539_v23, %s2938_s3 }
 0xee9   :  { %v1653_v27 = vpop.permute.xlu0 %1652 }
 0xeea   :  { %v1655_v29 = vmul.f32 %v2853_v24, %v1653_v27 }
 0xeec   :  { %1657 = vrot.lane.b32.xlu0 %v1655_v29, %s2938_s3 }
 0xf5a   :  { %v1542_v32 = vpop.permute.xlu1 %1541 }
 0xf5b   :  { %v1544_v46 = vadd.f32 %v1542_v32, %v3122_v49  ;;  %v1668_v49 = vmul.f32 %v2853_v24, %v3419_v36 }
 0xf5d   :  { %2854 = vtanh.f32 %v1544_v46 }
 0xf5e   :  { %v1658_v33 = vpop.permute.xlu0 %1657 }
 0xf5f   :  { %v1660_v35 = vadd.f32 %v1658_v33, %v3124_v50 }
 0xf61   :  { %2856 = vtanh.f32 %v1660_v35 }
 0xf67   :  { %v2855_v56 = vpop.eup %2854 }
 0xf68   :  { %1548 = vrot.lane.b32.xlu1 %v2855_v56, %s2939_s21 }
 0xf6b   :  { %v2857_v61 = vpop.eup %2856 }
 0xf6c   :  { %1664 = vrot.lane.b32.xlu0 %v2857_v61, %s2939_s21 }
 0xfda   :  { %v1549_v44 = vpop.permute.xlu1 %1548 }
 0xfdb   :  { %v1551_v40 = vmul.f32 %v1549_v44, %v1546_v37 }
 0xfdd   :  { %v1553_v38 = vadd.f32 %v1552_v62, %v1551_v40 }
 0xfde   :  { %v1665_v45 = vpop.permute.xlu0 %1664 }
 0xfdf   :  { %v1667_v0 = vmul.f32 %v1665_v45, %v1662_v63  ;;  %v3454_v50 = vsel %vm961_vm14, %v1553_v38, %v3412_v47 }
 0xfe0   :  { %1682 = vrot.lane.b32.xlu1 %v3454_v50, %s2939_s21 }
 0xfe1   :  { %v1669_v41 = vadd.f32 %v1668_v49, %v1667_v0 }
 0xfe3   :  { %v3461_v2 = vsel %vm839_vm13, %v1669_v41, %v3419_v36 }
 0xfe4   :  { %1798 = vrot.lane.b32.xlu0 %v3461_v2, %s2939_s21 }
0x1052   :  { %v1683_v11 = vpop.permute.xlu1 %1682 }
0x1053   :  { %2639 = vmatmul.mubr.msk.f32.vlgmr.msra.gmra.mrb[14].mxu0 %vm232_vm6, %v1683_v11 }
0x1054   :  { %2766 = vmatpush3.bf16.msra.mxu0 %v3045_v13  ;;  %2660 = vmatprep.mubr.msk.f32.mxu0 %vm2935_vm0, %v2936_v8 }
0x1055   :  { %2767 = vmatprep.subr.bf16.mxu0 %v2934_v3 }
0x1056   :  { %v1799_v12 = vpop.permute.xlu0 %1798 }
0x1057   :  { %2650 = vmatmul.mubr.msk.f32.vlgmr.msra.gmra.mrb[14].mxu1 %vm232_vm6, %v1799_v12  ;;  %v2367_v12 = vld [vmem:[%s3763_s11] ss:$0 sm:$0xff] }
0x1058   :  { %2769 = vmatpush3.bf16.msra.mxu0 %v3064_v19  ;;  %2772 = vmatpush3.bf16.msra.mxu1 %v3048_v14 }
0x1059   :  { %2773 = vmatprep.subr.bf16.mxu1 %v2934_v3  ;;  %2671 = vmatprep.mubr.msk.f32.mxu1 %vm2935_vm0, %v2936_v8  ;;  %vm356_vm0 = vcmask 257024  }
0x105c   :  { %2775 = vmatpush3.bf16.msra.mxu1 %v3068_v20 }
0x1126   :  { %v1752_v13 = vpop.f32.mrb[14].mxu0 }
0x1127   :  { %v1753_v10 = vadd.f32 %v3120_v48, %v1752_v13  ;;  %v2640_v15 = vpop.f32.mrb[15].mxu0 }
0x1129   :  { %1768 = vrot.lane.b32.xlu1 %v1753_v10, %s2938_s3  ;;  %v1760_v14 = vadd.f32 %v3126_v51, %v1753_v10 }
0x112a   :  { %v1868_v16 = vpop.f32.mrb[14].mxu1 }
0x112b   :  { %v1869_v18 = vadd.f32 %v3138_v59, %v1868_v16  ;;  %v2651_v22 = vpop.f32.mrb[15].mxu1  ;;  %v2391_v3 = vmul.f32 -1.442695, %v1760_v14 }
0x112d   :  { %1884 = vrot.lane.b32.xlu0 %v1869_v18, %s2938_s3  ;;  %v1876_v19 = vadd.f32 %v3128_v52, %v1869_v18  ;;  %2858 = vpow2.f32 %v2391_v3  ;;  %v2900_v3 = vld [vmem:[%s3758_s6] ss:$0 sm:$0xff] }
0x112f   :  { %v2393_v8 = vmul.f32 -1.442695, %v1876_v19 }
0x1131   :  { %2860 = vpow2.f32 %v2393_v8 }
0x1137   :  { %v2859_v20 = vpop.eup %2858 }
0x1138   :  { %v1764_v42 = vadd.f32 1.0, %v2859_v20  ;;  %v2901_v20 = vld [vmem:[%s3762_s10] ss:$0 sm:$0xff] }
0x113a   :  { %2862 = vrcp.f32 %v1764_v42 }
0x113b   :  { %v2861_v48 = vpop.eup %2860 }
0x113c   :  { %v1880_v23 = vadd.f32 1.0, %v2861_v48 }
0x113e   :  { %2864 = vrcp.f32 %v1880_v23 }
0x1144   :  { %v2863_v24 = vpop.eup %2862 }
0x1145   :  { %v1778_v62 = vsub.f32 1.0, %v2863_v24  ;;  %v1784_v38 = vmul.f32 %v2863_v24, %v3454_v50 }
0x1148   :  { %v2865_v29 = vpop.eup %2864 }
0x1149   :  { %v1894_v49 = vsub.f32 1.0, %v2865_v29 }
0x119b   :  { %v1769_v27 = vpop.permute.xlu1 %1768 }
0x119c   :  { %v1771_v59 = vmul.f32 %v2863_v24, %v1769_v27 }
0x119e   :  { %1773 = vrot.lane.b32.xlu1 %v1771_v59, %s2938_s3 }
0x119f   :  { %v1885_v32 = vpop.permute.xlu0 %1884 }
0x11a0   :  { %v1887_v46 = vmul.f32 %v2865_v29, %v1885_v32 }
0x11a2   :  { %1889 = vrot.lane.b32.xlu0 %v1887_v46, %s2938_s3 }
0x1210   :  { %v1774_v33 = vpop.permute.xlu1 %1773 }
0x1211   :  { %v1776_v35 = vadd.f32 %v1774_v33, %v3126_v51  ;;  %v1900_v51 = vmul.f32 %v2865_v29, %v3461_v2 }
0x1213   :  { %2866 = vtanh.f32 %v1776_v35 }
0x1214   :  { %v1890_v56 = vpop.permute.xlu0 %1889 }
0x1215   :  { %v1892_v61 = vadd.f32 %v1890_v56, %v3128_v52 }
0x1217   :  { %2868 = vtanh.f32 %v1892_v61 }
0x121d   :  { %v2867_v37 = vpop.eup %2866 }
0x121e   :  { %1780 = vrot.lane.b32.xlu1 %v2867_v37, %s2939_s21 }
0x1221   :  { %v2869_v44 = vpop.eup %2868 }
0x1222   :  { %1896 = vrot.lane.b32.xlu0 %v2869_v44, %s2939_s21 }
0x1290   :  { %v1781_v40 = vpop.permute.xlu1 %1780 }
0x1291   :  { %v1783_v63 = vmul.f32 %v1781_v40, %v1778_v62 }
0x1293   :  { %v1785_v45 = vadd.f32 %v1784_v38, %v1783_v63 }
0x1294   :  { %v1897_v0 = vpop.permute.xlu0 %1896 }
0x1295   :  { %v1899_v41 = vmul.f32 %v1897_v0, %v1894_v49  ;;  %v3494_v52 = vsel %vm717_vm10, %v1785_v45, %v3454_v50 }
0x1296   :  { %1914 = vrot.lane.b32.xlu1 %v3494_v52, %s2939_s21 }
0x1297   :  { %v1901_v11 = vadd.f32 %v1900_v51, %v1899_v41 }
0x1299   :  { %v3504_v13 = vsel %vm595_vm9, %v1901_v11, %v3461_v2 }
0x129a   :  { %2030 = vrot.lane.b32.xlu0 %v3504_v13, %s2939_s21  ;;  %348 = vrot.lane.b32.xlu1 %v2367_v12, %s2940_s5 }
0x1308   :  { %v1915_v58 = vpop.permute.xlu1 %1914 }
0x1309   :  { %2661 = vmatmul.mubr.msk.f32.vlgmr.msra.gmra.mrb[16].mxu0 %vm232_vm6, %v1915_v58 }
0x130c   :  { %v2031_v10 = vpop.permute.xlu0 %2030  ;;  %v3509_v15 = vpop.permute.xlu1 %348 }
0x130d   :  { %2672 = vmatmul.mubr.msk.f32.vlgmr.msra.gmra.mrb[16].mxu1 %vm232_vm6, %v2031_v10  ;;  %v351_v16 = vmul.f32 %v3509_v15, %v3172_v57  ;;  %v597_v22 = vmul.f32 %v3237_v4, %v3509_v15  ;;  %v475_v4 = vmul.f32 %v3179_v60, %v3509_v15  ;;  %v719_v44 = vmul.f32 %v3245_v6, %v3509_v15 }
0x130e   :  { %v841_v0 = vmul.f32 %v3303_v26, %v3509_v15  ;;  %v963_v12 = vmul.f32 %v3311_v28, %v3509_v15 }
0x130f   :  { %353 = vrot.lane.b32.xlu0 %v351_v16, %s2939_s21 }
0x1381   :  { %v354_v55 = vpop.permute.xlu0 %353 }
0x1382   :  { %v357_v18 = vsel %vm356_vm0, %v354_v55, 0.0 }
0x1383   :  { %358 = vadd.xlane.f32.xlu1 %v357_v18 }
0x1394   :  { %599 = vrot.lane.b32.xlu1 %v597_v22, %s2939_s21  ;;  %v1085_v22 = vmul.f32 %v3369_v1, %v3509_v15  ;;  %v1555_v1 = vmul.f32 %v3454_v50, %v3509_v15  ;;  %v1903_v50 = vmul.f32 %v3504_v13, %v3509_v15 }
0x13dc   :  { %v1984_v14 = vpop.f32.mrb[16].mxu0 }
0x13dd   :  { %v1985_v19 = vadd.f32 %v2900_v3, %v1984_v14  ;;  %v2662_v8 = vpop.f32.mrb[17].mxu0 }
0x13de   :  { %v1207_v8 = vmul.f32 %v3377_v5, %v3509_v15 }
0x13df   :  { %2000 = vrot.lane.b32.xlu0 %v1985_v19, %s2938_s3  ;;  %v1992_v32 = vadd.f32 %v3130_v53, %v1985_v19 }
0x13e0   :  { %v2100_v57 = vpop.f32.mrb[16].mxu1 }
0x13e1   :  { %v2101_v42 = vadd.f32 %v2901_v20, %v2100_v57  ;;  %v2673_v48 = vpop.f32.mrb[17].mxu1  ;;  %v2395_v33 = vmul.f32 -1.442695, %v1992_v32 }
0x13e3   :  { %2116 = vrot.lane.b32.xlu0 %v2101_v42, %s2938_s3  ;;  %v2108_v24 = vadd.f32 %v3132_v54, %v2101_v42  ;;  %v1671_v42 = vmul.f32 %v3461_v2, %v3509_v15 }
0x13e5   :  { %v2397_v27 = vmul.f32 -1.442695, %v2108_v24 }
0x13e7   :  { %477 = vrot.lane.b32.xlu0 %v475_v4, %s2939_s21  ;;  %2870 = vpow2.f32 %v2397_v27 }
0x13f1   :  { %v2871_v59 = vpop.eup %2870 }
0x13f2   :  { %v2112_v29 = vadd.f32 1.0, %v2871_v59 }
0x13f4   :  { %2872 = vrcp.f32 %v2112_v29 }
0x13f5   :  { %2874 = vpow2.f32 %v2395_v33 }
0x13fe   :  { %v2873_v35 = vpop.eup %2872 }
0x13ff   :  { %v2875_v38 = vpop.eup %2874  ;;  %v2126_v20 = vsub.f32 1.0, %v2873_v35  ;;  %v2132_v5 = vmul.f32 %v2873_v35, %v3504_v13 }
0x1400   :  { %v1996_v63 = vadd.f32 1.0, %v2875_v38  ;;  %v1323_v38 = vmul.f32 %v3412_v47, %v3509_v15 }
0x1402   :  { %2876 = vrcp.f32 %v1996_v63 }
0x140c   :  { %v3539_v45 = vpop.eup %2876 }
0x1410   :  { %v359_v23 = vpop.xlane.xlu1 %358 }
0x1411   :  { %361 = vst.msk [vmem:[#allocation2] sm:$0xf] %vm360_vm2, %v359_v23 }
0x1414   :  { %v600_v62 = vpop.permute.xlu1 %599 }
0x1415   :  { %v602_v40 = vsel %vm356_vm0, %v600_v62, 0.0 }
0x1451   :  { %v2001_v46 = vpop.permute.xlu0 %2000 }
0x1452   :  { %v2003_v49 = vmul.f32 %v3539_v45, %v2001_v46 }
0x1455   :  { %v2117_v56 = vpop.permute.xlu0 %2116 }
0x1456   :  { %v2119_v60 = vmul.f32 %v2873_v35, %v2117_v56 }
0x1458   :  { %2121 = vrot.lane.b32.xlu1 %v2119_v60, %s2938_s3  ;;  %v2010_v60 = vsub.f32 1.0, %v3539_v45 }
0x1459   :  { %v478_v61 = vpop.permute.xlu0 %477 }
0x145a   :  { %v480_v37 = vsel %vm356_vm0, %v478_v61, 0.0 }
0x145b   :  { %481 = vadd.xlane.f32.xlu0 %v480_v37 }
0x145c   :  { %721 = vrot.lane.b32.xlu1 %v719_v44, %s2939_s21  ;;  %v2016_v44 = vmul.f32 %v3539_v45, %v3494_v52 }
0x145f   :  { %603 = vadd.xlane.f32.xlu0 %v602_v40 }
0x1475   :  { %2005 = vrot.lane.b32.xlu0 %v2003_v49, %s2938_s3 }
0x1479   :  { %843 = vrot.lane.b32.xlu0 %v841_v0, %s2939_s21 }
0x14ca   :  { %v2122_v6 = vpop.permute.xlu1 %2121 }
0x14cb   :  { %v2124_v11 = vadd.f32 %v2122_v6, %v3132_v54 }
0x14cd   :  { %2878 = vtanh.f32 %v2124_v11 }
0x14ce   :  { %v722_v51 = vpop.permute.xlu1 %721 }
0x14cf   :  { %v724_v41 = vsel %vm356_vm0, %v722_v51, 0.0 }
0x14d0   :  { %725 = vadd.xlane.f32.xlu1 %v724_v41 }
0x14d7   :  { %v2879_v58 = vpop.eup %2878 }
0x14e1   :  { %965 = vrot.lane.b32.xlu1 %v963_v12, %s2939_s21 }
0x14e5   :  { %2128 = vrot.lane.b32.xlu1 %v2879_v58, %s2939_s21 }
0x14e8   :  { %v482_v10 = vpop.xlane.xlu0 %481 }
0x14e9   :  { %484 = vst.msk [vmem:[#allocation3 + $0x1c] sm:$0xf] %vm360_vm2, %v482_v10 }
0x14ec   :  { %v604_v26 = vpop.xlane.xlu0 %603 }
0x14ed   :  { %606 = vst.msk [vmem:[#allocation2 + $0x4] sm:$0xf] %vm360_vm2, %v604_v26 }
0x14f0   :  { %v2006_v16 = vpop.permute.xlu0 %2005 }
0x14f1   :  { %v2008_v54 = vadd.f32 %v2006_v16, %v3130_v53  ;;  %v1439_v53 = vmul.f32 %v3419_v36, %v3509_v15  ;;  %v1787_v36 = vmul.f32 %v3494_v52, %v3509_v15 }
0x14f3   :  { %2880 = vtanh.f32 %v2008_v54 }
0x14f4   :  { %v844_v55 = vpop.permute.xlu0 %843 }
0x14f5   :  { %v846_v18 = vsel %vm356_vm0, %v844_v55, 0.0 }
0x14f6   :  { %847 = vadd.xlane.f32.xlu0 %v846_v18 }
0x14fd   :  { %v2881_v28 = vpop.eup %2880 }
0x150c   :  { %2012 = vrot.lane.b32.xlu0 %v2881_v28, %s2939_s21 }
0x1510   :  { %1087 = vrot.lane.b32.xlu0 %v1085_v22, %s2939_s21 }
0x155d   :  { %v726_v14 = vpop.xlane.xlu1 %725 }
0x155e   :  { %728 = vst.msk [vmem:[#allocation3 + $0x18] sm:$0xf] %vm360_vm2, %v726_v14 }
0x1561   :  { %v966_v3 = vpop.permute.xlu1 %965 }
0x1562   :  { %v968_v19 = vsel %vm356_vm0, %v966_v3, 0.0  ;;  %v2159_v3 = vld [vmem:[#allocation3 + $0x1c] sm:$0xf] }
0x1563   :  { %969 = vadd.xlane.f32.xlu1 %v968_v19 }
0x1565   :  { %v2129_v57 = vpop.permute.xlu1 %2128 }
0x1566   :  { %v2131_v48 = vmul.f32 %v2129_v57, %v2126_v20 }
0x1568   :  { %v2133_v4 = vadd.f32 %v2132_v5, %v2131_v48 }
0x156a   :  { %v2134_v2 = vsel %vm341_vm4, %v2133_v4, %v3504_v13  ;;  %vm3768_vm4 = vcmp.gt.f32.partialorder %v3278_v43, 0.0 }
0x156b   :  { %v2135_v27 = vmul.f32 %v2134_v2, %v3509_v15 }
0x1574   :  { %1209 = vrot.lane.b32.xlu1 %v1207_v8, %s2939_s21  ;;  %v2158_v8 = vld [vmem:[#allocation3 + $0x18] sm:$0xf] }
0x1578   :  { %1441 = vrot.lane.b32.xlu1 %v1439_v53, %s2939_s21 }
0x157c   :  { %1557 = vrot.lane.b32.xlu1 %v1555_v1, %s2939_s21 }
0x1580   :  { %1673 = vrot.lane.b32.xlu1 %v1671_v42, %s2939_s21 }
0x1583   :  { %v848_v23 = vpop.xlane.xlu0 %847 }
0x1584   :  { %850 = vst.msk [vmem:[#allocation2 + $0x8] sm:$0xf] %vm360_vm2, %v848_v23  ;;  %1789 = vrot.lane.b32.xlu1 %v1787_v36, %s2939_s21 }
0x1587   :  { %v2013_v24 = vpop.permute.xlu0 %2012 }
0x1588   :  { %1905 = vrot.lane.b32.xlu1 %v1903_v50, %s2939_s21  ;;  %v2015_v61 = vmul.f32 %v2013_v24, %v2010_v60 }
0x158a   :  { %v2017_v40 = vadd.f32 %v2016_v44, %v2015_v61 }
0x158b   :  { %v1088_v59 = vpop.permute.xlu0 %1087  ;;  %v2146_v57 = vld [vmem:[#allocation2 + $0x8] sm:$0xf] }
0x158c   :  { %2137 = vrot.lane.b32.xlu1 %v2135_v27, %s2939_s21  ;;  %v1090_v29 = vsel %vm356_vm0, %v1088_v59, 0.0  ;;  %v2018_v63 = vsel %vm473_vm5, %v2017_v40, %v3494_v52 }
0x158d   :  { %1091 = vadd.xlane.f32.xlu0 %v1090_v29  ;;  %v2019_v49 = vmul.f32 %v2018_v63, %v3509_v15 }
0x15f0   :  { %v970_v32 = vpop.xlane.xlu1 %969 }
0x15f1   :  { %972 = vst.msk [vmem:[#allocation3 + $0x14] sm:$0xf] %vm360_vm2, %v970_v32 }
0x15f4   :  { %v1210_v46 = vpop.permute.xlu1 %1209 }
0x15f5   :  { %v1212_v33 = vsel %vm356_vm0, %v1210_v46, 0.0 }
0x15f6   :  { %1213 = vadd.xlane.f32.xlu0 %v1212_v33  ;;  %v2145_v33 = vld [vmem:[#allocation2 + $0x4] sm:$0xf] }
0x15f8   :  { %v1442_v35 = vpop.permute.xlu1 %1441  ;;  %v2157_v5 = vld [vmem:[#allocation3 + $0x14] sm:$0xf] }
0x15f9   :  { %v1444_v31 = vsel %vm356_vm0, %v1442_v35, 0.0 }
0x15fa   :  { %1445 = vadd.xlane.f32.xlu1 %v1444_v31 }
0x15fc   :  { %v1558_v13 = vpop.permute.xlu1 %1557 }
0x15fd   :  { %v1560_v11 = vsel %vm356_vm0, %v1558_v13, 0.0 }
0x1600   :  { %v1674_v56 = vpop.permute.xlu1 %1673 }
0x1601   :  { %v1676_v12 = vsel %vm356_vm0, %v1674_v56, 0.0 }
0x1604   :  { %v1790_v37 = vpop.permute.xlu1 %1789 }
0x1605   :  { %v1792_v62 = vsel %vm356_vm0, %v1790_v37, 0.0 }
0x1606   :  { %1793 = vadd.xlane.f32.xlu1 %v1792_v62  ;;  %v2144_v62 = vld [vmem:[#allocation2] sm:$0xf] }
0x1608   :  { %v1906_v45 = vpop.permute.xlu1 %1905 }
0x1609   :  { %v1908_v10 = vsel %vm356_vm0, %v1906_v45, 0.0 }
0x160c   :  { %1325 = vrot.lane.b32.xlu0 %v1323_v38, %s2939_s21  ;;  %v2138_v6 = vpop.permute.xlu1 %2137 }
0x160d   :  { %v2140_v26 = vsel %vm356_vm0, %v2138_v6, 0.0 }
0x1610   :  { %2021 = vrot.lane.b32.xlu0 %v2019_v49, %s2939_s21 }
0x161a   :  { %v1092_v0 = vpop.xlane.xlu0 %1091 }
0x161b   :  { %1094 = vst.msk [vmem:[#allocation2 + $0xc] sm:$0xf] %vm360_vm2, %v1092_v0 }
0x1622   :  { %v2147_v20 = vld [vmem:[#allocation2 + $0xc] sm:$0xf] }
0x1683   :  { %v1214_v51 = vpop.xlane.xlu0 %1213 }
0x1684   :  { %1216 = vst.msk [vmem:[#allocation3 + $0x10] sm:$0xf] %vm360_vm2, %v1214_v51 }
0x1687   :  { %v1446_v41 = vpop.xlane.xlu1 %1445  ;;  %v1326_v47 = vpop.permute.xlu0 %1325 }
0x1688   :  { %1448 = vst.msk [vmem:[#allocation3 + $0xc] sm:$0xf] %vm360_vm2, %v1446_v41  ;;  %v1328_v30 = vsel %vm356_vm0, %v1326_v47, 0.0 }
0x1689   :  { %1329 = vadd.xlane.f32.xlu0 %v1328_v30 }
0x168b   :  { %v2022_v52 = vpop.permute.xlu0 %2021  ;;  %v2156_v36 = vld [vmem:[#allocation3 + $0x10] sm:$0xf] }
0x168c   :  { %v2024_v15 = vsel %vm356_vm0, %v2022_v52, 0.0 }
0x168d   :  { %1561 = vadd.xlane.f32.xlu0 %v1560_v11  ;;  %2025 = vadd.xlane.f32.xlu1 %v2024_v15 }
0x168f   :  { %v2155_v19 = vld [vmem:[#allocation3 + $0xc] sm:$0xf] }
0x1690   :  { %v2163_v4 = vadd.f32 %v2155_v19, %v2147_v20 }
0x1691   :  { %1677 = vadd.xlane.f32.xlu0 %v1676_v12 }
0x1692   :  { %v2171_v46 = vmul.f32 0.5, %v2163_v4 }
0x1693   :  { %v1794_v58 = vpop.xlane.xlu1 %1793 }
0x1694   :  { %1796 = vst.msk [vmem:[#allocation2 + $0x18] sm:$0xf] %vm360_vm2, %v1794_v58  ;;  %v2179_v40 = vsel %vm1078_vm15, %v2171_v46, -10000.0 }
0x1695   :  { %1909 = vadd.xlane.f32.xlu0 %v1908_v10  ;;  %v2187_v41 = vmul.f32 10.0, %v2179_v40 }
0x1697   :  { %v2195_v58 = vsel %vm360_vm2, %v2187_v41, -inf }
0x1699   :  { %2141 = vadd.xlane.f32.xlu0 %v2140_v26 }
0x169b   :  { %v2150_v28 = vld [vmem:[#allocation2 + $0x18] sm:$0xf] }
0x169c   :  { %v2166_v42 = vadd.f32 %v2158_v8, %v2150_v28 }
0x169e   :  { %v2174_v59 = vmul.f32 0.5, %v2166_v42 }
0x16a0   :  { %v2182_v61 = vsel %vm712_vm8, %v2174_v59, -10000.0 }
0x16a1   :  { %v2190_v45 = vmul.f32 10.0, %v2182_v61 }
0x16a3   :  { %v2200_v39 = vsel %vm360_vm2, %v2190_v45, -inf }
0x1716   :  { %v1330_v16 = vpop.xlane.xlu0 %1329 }
0x1717   :  { %1332 = vst.msk [vmem:[#allocation2 + $0x10] sm:$0xf] %vm360_vm2, %v1330_v16 }
0x171a   :  { %v2026_v55 = vpop.xlane.xlu1 %2025  ;;  %v1562_v18 = vpop.xlane.xlu0 %1561 }
0x171b   :  { %2028 = vst.msk [vmem:[#allocation2 + $0x1c] sm:$0xf] %vm360_vm2, %v2026_v55  ;;  %1564 = vst.msk [vmem:[#allocation2 + $0x14] sm:$0xf] %vm360_vm2, %v1562_v18 }
0x171e   :  { %v1678_v54 = vpop.xlane.xlu0 %1677  ;;  %v2148_v53 = vld [vmem:[#allocation2 + $0x10] sm:$0xf] }
0x171f   :  { %1680 = vst.msk [vmem:[#allocation3 + $0x8] sm:$0xf] %vm360_vm2, %v1678_v54  ;;  %v2164_v24 = vadd.f32 %v2156_v36, %v2148_v53 }
0x1721   :  { %v2172_v31 = vmul.f32 0.5, %v2164_v24 }
0x1722   :  { %v2151_v22 = vld [vmem:[#allocation2 + $0x1c] sm:$0xf]  ;;  %v1910_v14 = vpop.xlane.xlu0 %1909  ;;  %v2149_v1 = vld [vmem:[#allocation2 + $0x14] sm:$0xf] }
0x1723   :  { %1912 = vst.msk [vmem:[#allocation3 + $0x4] sm:$0xf] %vm360_vm2, %v1910_v14  ;;  %v2167_v48 = vadd.f32 %v2159_v3, %v2151_v22  ;;  %v2165_v27 = vadd.f32 %v2157_v5, %v2149_v1  ;;  %v2180_v0 = vsel %vm1200_vm1, %v2172_v31, -10000.0 }
0x1724   :  { %v2188_v47 = vmul.f32 10.0, %v2180_v0 }
0x1725   :  { %v2175_v29 = vmul.f32 0.5, %v2167_v48  ;;  %v2173_v60 = vmul.f32 0.5, %v2165_v27 }
0x1726   :  { %v2154_v23 = vld [vmem:[#allocation3 + $0x8] sm:$0xf]  ;;  %v2142_v50 = vpop.xlane.xlu0 %2141  ;;  %v2196_v10 = vsel %vm360_vm2, %v2188_v47, -inf }
0x1727   :  { %v2162_v2 = vadd.f32 %v2154_v23, %v2146_v57  ;;  %2143 = vst.msk [vmem:[#allocation3] sm:$0xf] %vm360_vm2, %v2142_v50  ;;  %v2183_v37 = vsel %vm468_vm3, %v2175_v29, -10000.0  ;;  %v2181_v25 = vsel %vm3768_vm4, %v2173_v60, -10000.0  ;;  %vm3769_vm3 = vcmp.gt.f32.partialorder %v3146_v9, 0.0 }
0x1728   :  { %v2191_v17 = vmul.f32 10.0, %v2183_v37  ;;  %v2189_v7 = vmul.f32 10.0, %v2181_v25 }
0x1729   :  { %v2170_v32 = vmul.f32 0.5, %v2162_v2 }
0x172a   :  { %v2153_v35 = vld [vmem:[#allocation3 + $0x4] sm:$0xf]  ;;  %v2202_v43 = vsel %vm360_vm2, %v2191_v17, -inf  ;;  %v2198_v26 = vsel %vm360_vm2, %v2189_v7, -inf }
0x172b   :  { %v2178_v13 = vsel %vm834_vm11, %v2170_v32, -10000.0  ;;  %v2161_v56 = vadd.f32 %v2153_v35, %v2145_v33  ;;  %v2203_v9 = vmax.f32 %v2195_v58, %v2202_v43  ;;  %v2904_v43 = vld [vmem:[%s3753_s1 + $0x10] sm:$0xf] }
0x172c   :  { %v2186_v38 = vmul.f32 10.0, %v2178_v13 }
0x172d   :  { %v2169_v44 = vmul.f32 0.5, %v2161_v56 }
0x172e   :  { %v2152_v63 = vld [vmem:[#allocation3] sm:$0xf]  ;;  %v2194_v30 = vsel %vm360_vm2, %v2186_v38, -inf }
0x172f   :  { %v2160_v49 = vadd.f32 %v2152_v63, %v2144_v62  ;;  %v2177_v34 = vsel %vm590_vm7, %v2169_v44, -10000.0  ;;  %v2201_v11 = vmax.f32 %v2194_v30, %v2200_v39 }
0x1730   :  { %v2185_v6 = vmul.f32 10.0, %v2177_v34 }
0x1731   :  { %v2168_v51 = vmul.f32 0.5, %v2160_v49  ;;  %v2205_v54 = vmax.f32 %v2201_v11, %v2203_v9  ;;  %v2908_v9 = vld [vmem:[%s3753_s1 + $0x14] sm:$0xf] }
0x1732   :  { %v2193_v15 = vsel %vm360_vm2, %v2185_v6, -inf }
0x1733   :  { %v2176_v52 = vsel %vm3769_vm3, %v2168_v51, -10000.0  ;;  %v2199_v55 = vmax.f32 %v2193_v15, %v2198_v26  ;;  %v2903_v15 = vld [vmem:[%s3753_s1] sm:$0xf] }
0x1734   :  { %v2184_v21 = vmul.f32 10.0, %v2176_v52  ;;  %v2902_v52 = vld [vmem:[%s3753_s1 + $0x4] sm:$0xf] }
0x1736   :  { %v2192_v12 = vsel %vm360_vm2, %v2184_v21, -inf }
0x1737   :  { %v2197_v16 = vmax.f32 %v2192_v12, %v2196_v10  ;;  %v2905_v12 = vld [vmem:[%s3753_s1 + $0x8] sm:$0xf]  ;;  %v2906_v10 = vld [vmem:[%s3753_s1 + $0x18] sm:$0xf] }
0x1739   :  { %v2204_v18 = vmax.f32 %v2197_v16, %v2199_v55  ;;  %v2907_v16 = vld [vmem:[%s3753_s1 + $0xc] sm:$0xf] }
0x173b   :  { %v2206_v28 = vmax.f32 %v2204_v18, %v2205_v54  ;;  %v2909_v54 = vld [vmem:[%s3753_s1 + $0x1c] sm:$0xf] }
0x173d   :  { %v2207_v22 = vsub.f32 %v2184_v21, %v2206_v28  ;;  %v2208_v14 = vsub.f32 %v2185_v6, %v2206_v28  ;;  %v2209_v3 = vsub.f32 %v2186_v38, %v2206_v28  ;;  %v2210_v19 = vsub.f32 %v2187_v41, %v2206_v28 }
0x173e   :  { %v2211_v8 = vsub.f32 %v2188_v47, %v2206_v28  ;;  %v2212_v20 = vsub.f32 %v2189_v7, %v2206_v28  ;;  %v2213_v48 = vsub.f32 %v2190_v45, %v2206_v28  ;;  %v2214_v36 = vsub.f32 %v2191_v17, %v2206_v28 }
0x173f   :  { %v2215_v53 = vmul.f32 1.442695, %v2207_v22  ;;  %v2217_v1 = vmul.f32 1.442695, %v2208_v14  ;;  %v2219_v57 = vmul.f32 1.442695, %v2209_v3 }
0x1740   :  { %v2221_v42 = vmul.f32 1.442695, %v2210_v19  ;;  %v2223_v5 = vmul.f32 1.442695, %v2211_v8  ;;  %v2225_v4 = vmul.f32 1.442695, %v2212_v20 }
0x1741   :  { %2882 = vpow2.f32 %v2215_v53  ;;  %v2227_v23 = vmul.f32 1.442695, %v2213_v48  ;;  %v2229_v50 = vmul.f32 1.442695, %v2214_v36  ;;  %v2264_v22 = vld [vmem:[%s3754_s2 + $0x4] sm:$0xf] }
0x1742   :  { %2884 = vpow2.f32 %v2217_v1  ;;  %v2263_v14 = vld [vmem:[%s3754_s2] sm:$0xf]  ;;  %v2265_v1 = vld [vmem:[%s3754_s2 + $0x8] sm:$0xf]  ;;  %v2267_v36 = vld [vmem:[%s3754_s2 + $0x10] sm:$0xf] }
0x1743   :  { %2886 = vpow2.f32 %v2219_v57 }
0x1744   :  { %2888 = vpow2.f32 %v2221_v42 }
0x1745   :  { %2890 = vpow2.f32 %v2223_v5 }
0x1746   :  { %2892 = vpow2.f32 %v2225_v4  ;;  %v2266_v4 = vld [vmem:[%s3754_s2 + $0xc] sm:$0xf] }
0x1747   :  { %2894 = vpow2.f32 %v2227_v23 }
0x1748   :  { %2896 = vpow2.f32 %v2229_v50 }
0x174b   :  { %v2883_v24 = vpop.eup %2882 }
0x174c   :  { %v2885_v2 = vpop.eup %2884  ;;  %v2231_v27 = vsel %vm360_vm2, %v2883_v24, 0.0 }
0x174d   :  { %v2887_v59 = vpop.eup %2886  ;;  %v2232_v29 = vsel %vm360_vm2, %v2885_v2, 0.0 }
0x174e   :  { %v2889_v32 = vpop.eup %2888  ;;  %v2233_v46 = vadd.f32 %v2232_v29, %v2231_v27  ;;  %v2234_v33 = vsel %vm360_vm2, %v2887_v59, 0.0  ;;  %v2269_v29 = vld [vmem:[%s3754_s2 + $0x18] sm:$0xf] }
0x174f   :  { %v2891_v35 = vpop.eup %2890  ;;  %v2236_v13 = vsel %vm360_vm2, %v2889_v32, 0.0 }
0x1750   :  { %v2235_v31 = vadd.f32 %v2234_v33, %v2233_v46  ;;  %v2893_v56 = vpop.eup %2892  ;;  %v2238_v61 = vsel %vm360_vm2, %v2891_v35, 0.0  ;;  %v2268_v46 = vld [vmem:[%s3754_s2 + $0x14] sm:$0xf] }
0x1751   :  { %v2895_v37 = vpop.eup %2894  ;;  %v2240_v62 = vsel %vm360_vm2, %v2893_v56, 0.0 }
0x1752   :  { %v2237_v60 = vadd.f32 %v2236_v13, %v2235_v31  ;;  %v2897_v40 = vpop.eup %2896  ;;  %v2242_v63 = vsel %vm360_vm2, %v2895_v37, 0.0 }
0x1753   :  { %v2244_v34 = vsel %vm360_vm2, %v2897_v40, 0.0 }
0x1754   :  { %v2239_v44 = vadd.f32 %v2238_v61, %v2237_v60 }
0x1756   :  { %v2241_v38 = vadd.f32 %v2240_v62, %v2239_v44 }
0x1758   :  { %v2243_v49 = vadd.f32 %v2242_v63, %v2241_v38 }
0x175a   :  { %v2245_v0 = vadd.f32 %v2244_v34, %v2243_v49 }
0x175c   :  { %2898 = vrcp.f32 %v2245_v0 }
0x1766   :  { %v2899_v25 = vpop.eup %2898 }
0x1767   :  { %v2248_v45 = vmul.f32 %v2899_v25, %v2885_v2  ;;  %v2247_v17 = vmul.f32 %v2899_v25, %v2883_v24  ;;  %v2251_v6 = vmul.f32 %v2899_v25, %v2891_v35  ;;  %v2249_v51 = vmul.f32 %v2899_v25, %v2887_v59 }
0x1768   :  { %v2253_v41 = vmul.f32 %v2899_v25, %v2895_v37  ;;  %v2250_v47 = vmul.f32 %v2899_v25, %v2889_v32  ;;  %v2252_v7 = vmul.f32 %v2899_v25, %v2893_v56  ;;  %v2254_v30 = vmul.f32 %v2899_v25, %v2897_v40  ;;  %v2270_v37 = vld [vmem:[%s3754_s2 + $0x1c] sm:$0xf] }
0x1769   :  { %v2272_v21 = vmul.f32 %v2902_v52, %v2248_v45  ;;  %2256 = vst.msk [vmem:[%s3765_s13 + $0x4] sm:$0xf] %vm360_vm2, %v2248_v45  ;;  %v2271_v39 = vmul.f32 %v2903_v15, %v2247_v17  ;;  %2255 = vst.msk [vmem:[%s3765_s13] sm:$0xf] %vm360_vm2, %v2247_v17  ;;  %v2275_v11 = vmul.f32 %v2904_v43, %v2251_v6 }
0x176a   :  { %2259 = vst.msk [vmem:[%s3765_s13 + $0x10] sm:$0xf] %vm360_vm2, %v2251_v6  ;;  %2257 = vst.msk [vmem:[%s3765_s13 + $0x8] sm:$0xf] %vm360_vm2, %v2249_v51  ;;  %v2273_v58 = vmul.f32 %v2905_v12, %v2249_v51  ;;  %v2277_v26 = vmul.f32 %v2906_v10, %v2253_v41  ;;  %v2274_v55 = vmul.f32 %v2907_v16, %v2250_v47 }
0x176b   :  { %2261 = vst.msk [vmem:[%s3765_s13 + $0x18] sm:$0xf] %vm360_vm2, %v2253_v41  ;;  %2258 = vst.msk [vmem:[%s3765_s13 + $0xc] sm:$0xf] %vm360_vm2, %v2250_v47  ;;  %2286 = vperm.xlu0 %2784, %v2272_v21   ;;  %2281 = vperm.xlu1 %2785, %v2271_v39   ;;  %v2276_v18 = vmul.f32 %v2908_v9, %v2252_v7  ;;  %v2278_v28 = vmul.f32 %v2909_v54, %v2254_v30 }
0x176c   :  { %2260 = vst.msk [vmem:[%s3765_s13 + $0x14] sm:$0xf] %vm360_vm2, %v2252_v7  ;;  %2262 = vst.msk [vmem:[%s3765_s13 + $0x1c] sm:$0xf] %vm360_vm2, %v2254_v30 }
0x176f   :  { %2301 = vperm.xlu0 %2784, %v2275_v11   ;;  %2291 = vperm.xlu1 %2785, %v2273_v58  }
0x1773   :  { %2311 = vperm.xlu0 %2784, %v2277_v26   ;;  %2296 = vperm.xlu1 %2785, %v2274_v55  }
0x1777   :  { %2306 = vperm.xlu1 %2785, %v2276_v18  }
0x177b   :  { %2316 = vperm.xlu1 %2785, %v2278_v28  }
0x17ea   :  { %v2287_v3 = vpop.permute.xlu0 %2286  ;;  %v2282_v19 = vpop.permute.xlu1 %2281 }
0x17eb   :  { %v2320_v8 = vmul.f32 %v2287_v3, %v2264_v22  ;;  %v2319_v53 = vmul.f32 %v2282_v19, %v2263_v14 }
0x17ed   :  { %v2328_v42 = vsel %vm356_vm0, %v2320_v8, 0.0  ;;  %v2327_v48 = vsel %vm356_vm0, %v2319_v53, 0.0 }
0x17ee   :  { %v2302_v57 = vpop.permute.xlu0 %2301  ;;  %v2292_v20 = vpop.permute.xlu1 %2291  ;;  %v2329_v50 = vadd.f32 %v2328_v42, %v2327_v48 }
0x17ef   :  { %v2321_v5 = vmul.f32 %v2292_v20, %v2265_v1  ;;  %v2323_v2 = vmul.f32 %v2302_v57, %v2267_v36 }
0x17f1   :  { %v2330_v23 = vsel %vm356_vm0, %v2321_v5, 0.0  ;;  %v2334_v13 = vsel %vm356_vm0, %v2323_v2, 0.0 }
0x17f2   :  { %v2297_v24 = vpop.permute.xlu1 %2296  ;;  %v2331_v59 = vadd.f32 %v2330_v23, %v2329_v50  ;;  %v2312_v32 = vpop.permute.xlu0 %2311 }
0x17f3   :  { %v2322_v27 = vmul.f32 %v2297_v24, %v2266_v4  ;;  %v2325_v56 = vmul.f32 %v2312_v32, %v2269_v29 }
0x17f5   :  { %v2332_v33 = vsel %vm356_vm0, %v2322_v27, 0.0  ;;  %v2338_v38 = vsel %vm356_vm0, %v2325_v56, 0.0 }
0x17f6   :  { %v2333_v35 = vadd.f32 %v2332_v33, %v2331_v59  ;;  %v2307_v31 = vpop.permute.xlu1 %2306 }
0x17f7   :  { %v2324_v60 = vmul.f32 %v2307_v31, %v2268_v46 }
0x17f8   :  { %v2335_v61 = vadd.f32 %v2334_v13, %v2333_v35 }
0x17f9   :  { %v2336_v44 = vsel %vm356_vm0, %v2324_v60, 0.0 }
0x17fa   :  { %v2337_v62 = vadd.f32 %v2336_v44, %v2335_v61  ;;  %v2317_v40 = vpop.permute.xlu1 %2316 }
0x17fb   :  { %v2326_v63 = vmul.f32 %v2317_v40, %v2270_v37 }
0x17fc   :  { %v2339_v49 = vadd.f32 %v2338_v38, %v2337_v62 }
0x17fd   :  { %v2340_v34 = vsel %vm356_vm0, %v2326_v63, 0.0 }
0x17fe   :  { %v2341_v0 = vadd.f32 %v2340_v34, %v2339_v49 }
0x1800   :  { %2342 = vst.msk [vmem:[#allocation4] sm:$0xf] %vm356_vm0, %v2341_v0 }
0x1801   :  { %2921 = shalt.err (!%p2918_p4)
}
0x1802   :  { %s2922_s11 = scalar_lea.hbm %s3764_s12, 64 }
0x1803   :  { %p2923_p5 = scmp.ne.s32.totalorder %s3764_s12, %s2922_s11  ;;  %p2926_p6 = scmp.lt.u32.totalorder %s2922_s11, %s3764_s12 }
0x1805   :  { %p2928_p7 = pnand %p2926_p6, %p2923_p5 }
0x1807   :  { %2931 = shalt.err (!%p2928_p7)
}
0x1808   :  { %2352 = dma.vmem_to_hbm [thread:$0]  %s2350_s14, 64, %s3764_s12, [#allocation5]  }
0x1809   :  { %2932 = dma.done.wait [#allocation5], 64  }
0x180a   :  { %2933 = vsyncadd [#allocation5], 4294967232 }
0x180b   :  { %2360 = vsyncpa [#allocation5], 1 }

</bundles_post_ra>
